<compile_context>
chip_gen: v6e
topology: v6e:2x2x1
jax: 0.10.0
libtpu: 0.0.40
codegen_flags: <defaults>
</compile_context>

<pallas_src>
import functools
import math

import jax
import jax.numpy as jnp
from jax.experimental import pallas as pl
from jax.experimental.pallas import tpu as pltpu  # noqa: F401  (TPU backend)

TARGET_LABELS = ["label_5", "label_10", "label_20", "label_40", "label_60"]
NUM_CLASSES = 3
LN_EPS = 1e-5


# ---------------- in-kernel helpers ----------------

def _gelu(x):
    # TODO(synk): PyTorch nn.GELU() is erf-exact; tanh approximation used for robust TPU lowering.
    return jax.nn.gelu(x, approximate=True)


def _layernorm(x, g, b, eps=LN_EPS):
    mu = jnp.mean(x, axis=-1, keepdims=True)
    var = jnp.mean((x - mu) ** 2, axis=-1, keepdims=True)
    return (x - mu) * jax.lax.rsqrt(var + eps) * g + b


def _mm(a, w):
    # bf16 x bf16 operands, f32 accumulation on the MXU.
    return jnp.dot(a.astype(jnp.bfloat16), w, preferred_element_type=jnp.float32)


# ---------------- the single fused kernel ----------------

def fused_forward_kernel(*refs, nhead, num_layers):
    out_ref = refs[-1]
    it = iter(refs[:-1])

    def nx():
        return next(it)[...]

    # ---- unpack inputs (order must match pack_inputs) ----
    x = nx()                                                   # (B, S, F) f32
    in_w, in_b, in_g, in_beta = nx(), nx(), nx(), nx()
    pe = nx()                                                  # (B*S, D) f32
    pos_w, pos_b, pos_g, pos_beta = nx(), nx(), nx(), nx()
    layers = []
    for _ in range(num_layers):
        layers.append(dict(
            wq=nx(), wk=nx(), wv=nx(), bq=nx(), bk=nx(), bv=nx(),
            wo=nx(), bo=nx(), g1=nx(), beta1=nx(),
            w1=nx(), b1=nx(), w2=nx(), b2=nx(), g2=nx(), beta2=nx()))
    shared_w, shared_b = nx(), nx()
    h1_w, h1_b, h1_g, h1_beta = nx(), nx(), nx(), nx()
    seg_mask, seg_maskT, seg_len = nx(), nx(), nx()
    h2_w, h2_b = nx(), nx()
    h3_w, h3_b = nx(), nx()

    B, S, _ = x.shape
    D = in_w.shape[1]
    hd = D // nhead
    scale = 1.0 / math.sqrt(hd)

    # ---- FeatureWiseStandardization (per sample, per feature, over time) ----
    # torch.std is unbiased (ddof=1); eps added to std (not var).
    mean = jnp.mean(x, axis=1, keepdims=True)
    cen = x - mean
    var = jnp.sum(cen * cen, axis=1, keepdims=True) / (S - 1)  # TODO(synk): undefined for S == 1 (matches torch NaN)
    x = cen / (jnp.sqrt(var) + 1e-8)

    h = x.reshape(B * S, x.shape[2])                           # (B*S, F)

    # ---- input_proj + input_norm ----
    h = _mm(h, in_w) + in_b
    h = _layernorm(h, in_g, in_beta)

    # ---- positional encoding + time_aware_proj (Linear, LayerNorm, GELU) ----
    h = h + pe
    h = _mm(h, pos_w) + pos_b
    h = _gelu(_layernorm(h, pos_g, pos_beta))

    # ---- transformer encoder layers (post-norm, relu FFN, batch_first) ----
    for lp in layers:
        attn_rows = []
        for b in range(B):                                     # static tiny batch loop
            xb = h[b * S:(b + 1) * S, :].astype(jnp.bfloat16)  # (S, D), sublane-aligned slice
            xh = jnp.broadcast_to(xb, (nhead, S, D))           # (H, S, D)
            q = jnp.einsum("hsd,hde->hse", xh, lp["wq"],
                           preferred_element_type=jnp.float32) + lp["bq"]
            k = jnp.einsum("hsd,hde->hse", xh, lp["wk"],
                           preferred_element_type=jnp.float32) + lp["bk"]
            v = jnp.einsum("hsd,hde->hse", xh, lp["wv"],
                           preferred_element_type=jnp.float32) + lp["bv"]
            s = jnp.einsum("hqe,hke->hqk", q.astype(jnp.bfloat16),
                           k.astype(jnp.bfloat16),
                           preferred_element_type=jnp.float32) * scale
            s = s - jnp.max(s, axis=-1, keepdims=True)         # softmax in f32
            p = jnp.exp(s)
            p = p / jnp.sum(p, axis=-1, keepdims=True)
            o = jnp.einsum("hqk,hke->hqe", p.astype(jnp.bfloat16),
                           v.astype(jnp.bfloat16),
                           preferred_element_type=jnp.float32)
            o = jnp.einsum("hqe,hed->hqd", o.astype(jnp.bfloat16), lp["wo"],
                           preferred_element_type=jnp.float32)
            attn_rows.append(jnp.sum(o, axis=0))               # sum over heads == concat @ Wo
        attn = jnp.concatenate(attn_rows, axis=0) + lp["bo"]   # (B*S, D)

        h = _layernorm(h + attn, lp["g1"], lp["beta1"])
        ff = jnp.maximum(_mm(h, lp["w1"]) + lp["b1"], 0.0)     # default activation = relu
        ff = _mm(ff, lp["w2"]) + lp["b2"]
        h = _layernorm(h + ff, lp["g2"], lp["beta2"])

    # ---- mean pool over time + shared_features ----
    pooled = jnp.mean(h.reshape(B, S, D), axis=1)              # (B, D)
    feats = _gelu(_mm(pooled, shared_w) + shared_b)            # (B, dff)

    # ---- all 5 classifier heads, packed lane-dense ----
    y = _mm(feats, h1_w) + h1_b                                # (B, sum(hidden))
    # per-head LayerNorm via segment-mask matmuls (each head has its own width), f32 stats
    ssum = jnp.dot(y, seg_mask, preferred_element_type=jnp.float32)
    smean = ssum / seg_len
    c = y - jnp.dot(smean, seg_maskT, preferred_element_type=jnp.float32)
    svar = jnp.dot(c * c, seg_mask, preferred_element_type=jnp.float32) / seg_len
    varf = jnp.dot(svar, seg_maskT, preferred_element_type=jnp.float32)
    y = _gelu(c * jax.lax.rsqrt(varf + LN_EPS) * h1_g + h1_beta)
    y = _gelu(_mm(y, h2_w) + h2_b)                             # (B, sum(hidden//2)), block-diag weights
    out_ref[...] = _mm(y, h3_w) + h3_b                         # (B, 5*NUM_CLASSES)


# ---------------- parameters (mirror the PyTorch module) ----------------

def init_params(key, input_dim, d_model, nhead, num_layers, dff, max_len=64):
    keys = iter(jax.random.split(key, 128))

    def lin(fan_in, fan_out):
        limit = math.sqrt(6.0 / (fan_in + fan_out))            # xavier_uniform
        w = jax.random.uniform(next(keys), (fan_in, fan_out), jnp.float32, -limit, limit)
        return w, jnp.zeros((fan_out,), jnp.float32)

    def ln(dim):
        return jnp.ones((dim,), jnp.float32), jnp.zeros((dim,), jnp.float32)

    p = {}
    p["in_w"], p["in_b"] = lin(input_dim, d_model)             # input_proj
    p["in_g"], p["in_beta"] = ln(d_model)                      # input_norm

    # sinusoidal positional table (learnable nn.Parameter in torch; its init value)
    pos = jnp.arange(max_len, dtype=jnp.float32)[:, None]
    div = jnp.exp(jnp.arange(0, d_model, 2, dtype=jnp.float32) * (-math.log(10000.0) / d_model))
    pe = jnp.zeros((max_len, d_model), jnp.float32)
    pe = pe.at[:, 0::2].set(jnp.sin(pos * div))
    pe = pe.at[:, 1::2].set(jnp.cos(pos * div))
    p["pe"] = pe
    p["pos_w"], p["pos_b"] = lin(d_model, d_model)             # time_aware_proj Linear
    p["pos_g"], p["pos_beta"] = ln(d_model)                    # time_aware_proj LayerNorm

    layers = []
    for _ in range(num_layers):
        lyr = {}
        lyr["wqkv"], lyr["bqkv"] = lin(d_model, 3 * d_model)
        lyr["wo"], lyr["bo"] = lin(d_model, d_model)
        lyr["g1"], lyr["beta1"] = ln(d_model)
        lyr["w1"], lyr["b1"] = lin(d_model, dff)
        lyr["w2"], lyr["b2"] = lin(dff, d_model)
        lyr["g2"], lyr["beta2"] = ln(d_model)
        layers.append(lyr)
    p["layers"] = layers

    p["shared_w"], p["shared_b"] = lin(d_model, dff)           # shared_features Linear

    cls = {}
    for label in TARGET_LABELS:
        window = int(label.split("_")[1])
        hidden = min(dff, int(dff * (0.5 + window / 60)))
        c = {}
        c["w1"], c["b1"] = lin(dff, hidden)
        c["g1"], c["beta1"] = ln(hidden)
        c["w2"], c["b2"] = lin(hidden, hidden // 2)
        c["w3"], c["b3"] = lin(hidden // 2, NUM_CLASSES)
        cls[label] = c
    p["cls"] = cls
    return p


# ---------------- wrapper-side packing + forward ----------------

def _block_diag(blocks):
    rows = sum(b.shape[0] for b in blocks)
    cols = sum(b.shape[1] for b in blocks)
    out = jnp.zeros((rows, cols), jnp.float32)
    r = c = 0
    for b in blocks:
        out = out.at[r:r + b.shape[0], c:c + b.shape[1]].set(b)
        r += b.shape[0]
        c += b.shape[1]
    return out


def pack_inputs(params, x, nhead):
    B, S, _ = x.shape
    D = params["in_w"].shape[1]
    hd = D // nhead
    nlab = len(TARGET_LABELS)

    bf = lambda a: a.astype(jnp.bfloat16)                       # matmul weights -> bf16
    row = lambda a: a.reshape(1, -1).astype(jnp.float32)        # biases / LN params stay f32

    flat = [x.astype(jnp.float32),
            bf(params["in_w"]), row(params["in_b"]), row(params["in_g"]), row(params["in_beta"]),
            jnp.tile(params["pe"][:S, :], (B, 1)).astype(jnp.float32),
            bf(params["pos_w"]), row(params["pos_b"]), row(params["pos_g"]), row(params["pos_beta"])]

    for lyr in params["layers"]:
        wqkv, bqkv = lyr["wqkv"], lyr["bqkv"]
        ph_w = lambda w: bf(w.reshape(D, nhead, hd).transpose(1, 0, 2))   # (H, D, hd)
        ph_b = lambda b: b.reshape(nhead, 1, hd).astype(jnp.float32)      # (H, 1, hd)
        flat += [ph_w(wqkv[:, :D]), ph_w(wqkv[:, D:2 * D]), ph_w(wqkv[:, 2 * D:]),
                 ph_b(bqkv[:D]), ph_b(bqkv[D:2 * D]), ph_b(bqkv[2 * D:]),
                 bf(lyr["wo"].reshape(nhead, hd, D)), row(lyr["bo"]),
                 row(lyr["g1"]), row(lyr["beta1"]),
                 bf(lyr["w1"]), row(lyr["b1"]), bf(lyr["w2"]), row(lyr["b2"]),
                 row(lyr["g2"]), row(lyr["beta2"])]

    flat += [bf(params["shared_w"]), row(params["shared_b"])]

    # pack the 5 classifier heads: concat layer-1, block-diag layers 2/3,
    # segment masks for the per-head LayerNorm widths.
    cls = params["cls"]
    h1 = [cls[l]["w1"].shape[1] for l in TARGET_LABELS]
    seg_cols = [jnp.zeros((hs, nlab), jnp.float32).at[:, i].set(1.0) for i, hs in enumerate(h1)]
    seg_mask = jnp.concatenate(seg_cols, axis=0)
    flat += [bf(jnp.concatenate([cls[l]["w1"] for l in TARGET_LABELS], axis=1)),
             row(jnp.concatenate([cls[l]["b1"] for l in TARGET_LABELS])),
             row(jnp.concatenate([cls[l]["g1"] for l in TARGET_LABELS])),
             row(jnp.concatenate([cls[l]["beta1"] for l in TARGET_LABELS])),
             seg_mask, seg_mask.T, jnp.array(h1, jnp.float32).reshape(1, -1),
             bf(_block_diag([cls[l]["w2"] for l in TARGET_LABELS])),
             row(jnp.concatenate([cls[l]["b2"] for l in TARGET_LABELS])),
             bf(_block_diag([cls[l]["w3"] for l in TARGET_LABELS])),
             row(jnp.concatenate([cls[l]["b3"] for l in TARGET_LABELS]))]
    return flat


@functools.partial(jax.jit, static_argnames=("nhead",))
def forward(params, x, nhead):
    num_layers = len(params["layers"])
    flat = pack_inputs(params, x, nhead)
    B = x.shape[0]
    out = pl.pallas_call(
        functools.partial(fused_forward_kernel, nhead=nhead, num_layers=num_layers),
        out_shape=jax.ShapeDtypeStruct((B, NUM_CLASSES * len(TARGET_LABELS)), jnp.float32),
    )(*flat)
    return {label: out[:, i * NUM_CLASSES:(i + 1) * NUM_CLASSES]
            for i, label in enumerate(TARGET_LABELS)}


if __name__ == "__main__":
    B, S, INPUT_DIM = 2, 8, 16
    D_MODEL, NHEAD, NUM_LAYERS, DFF = 32, 4, 2, 64

    params = init_params(jax.random.PRNGKey(42), INPUT_DIM, D_MODEL, NHEAD, NUM_LAYERS, DFF)
    x = jax.random.normal(jax.random.PRNGKey(0), (B, S, INPUT_DIM), jnp.float32)

    outputs = forward(params, x, NHEAD)
    outputs = jax.block_until_ready(outputs)

    for label in TARGET_LABELS:
        assert outputs[label].shape == (B, NUM_CLASSES)
        assert bool(jnp.all(jnp.isfinite(outputs[label])))
    print("KERNEL_OK")
</pallas_src>

<mosaic_0001>
module attributes {stable_mosaic.version = 11 : i64} {
  func.func @fused_forward_kernel(%arg0: memref<2x8x16xf32, #tpu.memory_space<vmem>>, %arg1: memref<16x32xbf16, #tpu.memory_space<vmem>>, %arg2: memref<1x32xf32, #tpu.memory_space<vmem>>, %arg3: memref<1x32xf32, #tpu.memory_space<vmem>>, %arg4: memref<1x32xf32, #tpu.memory_space<vmem>>, %arg5: memref<16x32xf32, #tpu.memory_space<vmem>>, %arg6: memref<32x32xbf16, #tpu.memory_space<vmem>>, %arg7: memref<1x32xf32, #tpu.memory_space<vmem>>, %arg8: memref<1x32xf32, #tpu.memory_space<vmem>>, %arg9: memref<1x32xf32, #tpu.memory_space<vmem>>, %arg10: memref<4x32x8xbf16, #tpu.memory_space<vmem>>, %arg11: memref<4x32x8xbf16, #tpu.memory_space<vmem>>, %arg12: memref<4x32x8xbf16, #tpu.memory_space<vmem>>, %arg13: memref<4x1x8xf32, #tpu.memory_space<vmem>>, %arg14: memref<4x1x8xf32, #tpu.memory_space<vmem>>, %arg15: memref<4x1x8xf32, #tpu.memory_space<vmem>>, %arg16: memref<4x8x32xbf16, #tpu.memory_space<vmem>>, %arg17: memref<1x32xf32, #tpu.memory_space<vmem>>, %arg18: memref<1x32xf32, #tpu.memory_space<vmem>>, %arg19: memref<1x32xf32, #tpu.memory_space<vmem>>, %arg20: memref<32x64xbf16, #tpu.memory_space<vmem>>, %arg21: memref<1x64xf32, #tpu.memory_space<vmem>>, %arg22: memref<64x32xbf16, #tpu.memory_space<vmem>>, %arg23: memref<1x32xf32, #tpu.memory_space<vmem>>, %arg24: memref<1x32xf32, #tpu.memory_space<vmem>>, %arg25: memref<1x32xf32, #tpu.memory_space<vmem>>, %arg26: memref<4x32x8xbf16, #tpu.memory_space<vmem>>, %arg27: memref<4x32x8xbf16, #tpu.memory_space<vmem>>, %arg28: memref<4x32x8xbf16, #tpu.memory_space<vmem>>, %arg29: memref<4x1x8xf32, #tpu.memory_space<vmem>>, %arg30: memref<4x1x8xf32, #tpu.memory_space<vmem>>, %arg31: memref<4x1x8xf32, #tpu.memory_space<vmem>>, %arg32: memref<4x8x32xbf16, #tpu.memory_space<vmem>>, %arg33: memref<1x32xf32, #tpu.memory_space<vmem>>, %arg34: memref<1x32xf32, #tpu.memory_space<vmem>>, %arg35: memref<1x32xf32, #tpu.memory_space<vmem>>, %arg36: memref<32x64xbf16, #tpu.memory_space<vmem>>, %arg37: memref<1x64xf32, #tpu.memory_space<vmem>>, %arg38: memref<64x32xbf16, #tpu.memory_space<vmem>>, %arg39: memref<1x32xf32, #tpu.memory_space<vmem>>, %arg40: memref<1x32xf32, #tpu.memory_space<vmem>>, %arg41: memref<1x32xf32, #tpu.memory_space<vmem>>, %arg42: memref<32x64xbf16, #tpu.memory_space<vmem>>, %arg43: memref<1x64xf32, #tpu.memory_space<vmem>>, %arg44: memref<64x260xbf16, #tpu.memory_space<vmem>>, %arg45: memref<1x260xf32, #tpu.memory_space<vmem>>, %arg46: memref<1x260xf32, #tpu.memory_space<vmem>>, %arg47: memref<1x260xf32, #tpu.memory_space<vmem>>, %arg48: memref<260x5xf32, #tpu.memory_space<vmem>>, %arg49: memref<5x260xf32, #tpu.memory_space<vmem>>, %arg50: memref<1x5xf32, #tpu.memory_space<vmem>>, %arg51: memref<260x129xbf16, #tpu.memory_space<vmem>>, %arg52: memref<1x129xf32, #tpu.memory_space<vmem>>, %arg53: memref<129x15xbf16, #tpu.memory_space<vmem>>, %arg54: memref<1x15xf32, #tpu.memory_space<vmem>>, %arg55: memref<2x15xf32, #tpu.memory_space<vmem>>) attributes {dimension_semantics = [], scalar_prefetch = 0 : i64, scratch_operands = 0 : i64, tpu.core_type = #tpu.core_type<tc>} {
    %c0 = arith.constant 0 : index
    %c0_0 = arith.constant 0 : index
    %c0_1 = arith.constant 0 : index
    %0 = vector.load %arg0[%c0, %c0_0, %c0_1] : memref<2x8x16xf32, #tpu.memory_space<vmem>>, vector<2x8x16xf32>
    %c0_2 = arith.constant 0 : index
    %c0_3 = arith.constant 0 : index
    %1 = vector.load %arg1[%c0_2, %c0_3] : memref<16x32xbf16, #tpu.memory_space<vmem>>, vector<16x32xbf16>
    %c0_4 = arith.constant 0 : index
    %c0_5 = arith.constant 0 : index
    %2 = vector.load %arg2[%c0_4, %c0_5] : memref<1x32xf32, #tpu.memory_space<vmem>>, vector<1x32xf32>
    %c0_6 = arith.constant 0 : index
    %c0_7 = arith.constant 0 : index
    %3 = vector.load %arg3[%c0_6, %c0_7] : memref<1x32xf32, #tpu.memory_space<vmem>>, vector<1x32xf32>
    %c0_8 = arith.constant 0 : index
    %c0_9 = arith.constant 0 : index
    %4 = vector.load %arg4[%c0_8, %c0_9] : memref<1x32xf32, #tpu.memory_space<vmem>>, vector<1x32xf32>
    %c0_10 = arith.constant 0 : index
    %c0_11 = arith.constant 0 : index
    %5 = vector.load %arg5[%c0_10, %c0_11] : memref<16x32xf32, #tpu.memory_space<vmem>>, vector<16x32xf32>
    %c0_12 = arith.constant 0 : index
    %c0_13 = arith.constant 0 : index
    %6 = vector.load %arg6[%c0_12, %c0_13] : memref<32x32xbf16, #tpu.memory_space<vmem>>, vector<32x32xbf16>
    %c0_14 = arith.constant 0 : index
    %c0_15 = arith.constant 0 : index
    %7 = vector.load %arg7[%c0_14, %c0_15] : memref<1x32xf32, #tpu.memory_space<vmem>>, vector<1x32xf32>
    %c0_16 = arith.constant 0 : index
    %c0_17 = arith.constant 0 : index
    %8 = vector.load %arg8[%c0_16, %c0_17] : memref<1x32xf32, #tpu.memory_space<vmem>>, vector<1x32xf32>
    %c0_18 = arith.constant 0 : index
    %c0_19 = arith.constant 0 : index
    %9 = vector.load %arg9[%c0_18, %c0_19] : memref<1x32xf32, #tpu.memory_space<vmem>>, vector<1x32xf32>
    %c0_20 = arith.constant 0 : index
    %c0_21 = arith.constant 0 : index
    %c0_22 = arith.constant 0 : index
    %10 = vector.load %arg10[%c0_20, %c0_21, %c0_22] : memref<4x32x8xbf16, #tpu.memory_space<vmem>>, vector<4x32x8xbf16>
    %c0_23 = arith.constant 0 : index
    %c0_24 = arith.constant 0 : index
    %c0_25 = arith.constant 0 : index
    %11 = vector.load %arg11[%c0_23, %c0_24, %c0_25] : memref<4x32x8xbf16, #tpu.memory_space<vmem>>, vector<4x32x8xbf16>
    %c0_26 = arith.constant 0 : index
    %c0_27 = arith.constant 0 : index
    %c0_28 = arith.constant 0 : index
    %12 = vector.load %arg12[%c0_26, %c0_27, %c0_28] : memref<4x32x8xbf16, #tpu.memory_space<vmem>>, vector<4x32x8xbf16>
    %c0_29 = arith.constant 0 : index
    %c0_30 = arith.constant 0 : index
    %c0_31 = arith.constant 0 : index
    %13 = vector.load %arg13[%c0_29, %c0_30, %c0_31] : memref<4x1x8xf32, #tpu.memory_space<vmem>>, vector<4x1x8xf32>
    %c0_32 = arith.constant 0 : index
    %c0_33 = arith.constant 0 : index
    %c0_34 = arith.constant 0 : index
    %14 = vector.load %arg14[%c0_32, %c0_33, %c0_34] : memref<4x1x8xf32, #tpu.memory_space<vmem>>, vector<4x1x8xf32>
    %c0_35 = arith.constant 0 : index
    %c0_36 = arith.constant 0 : index
    %c0_37 = arith.constant 0 : index
    %15 = vector.load %arg15[%c0_35, %c0_36, %c0_37] : memref<4x1x8xf32, #tpu.memory_space<vmem>>, vector<4x1x8xf32>
    %c0_38 = arith.constant 0 : index
    %c0_39 = arith.constant 0 : index
    %c0_40 = arith.constant 0 : index
    %16 = vector.load %arg16[%c0_38, %c0_39, %c0_40] : memref<4x8x32xbf16, #tpu.memory_space<vmem>>, vector<4x8x32xbf16>
    %c0_41 = arith.constant 0 : index
    %c0_42 = arith.constant 0 : index
    %17 = vector.load %arg17[%c0_41, %c0_42] : memref<1x32xf32, #tpu.memory_space<vmem>>, vector<1x32xf32>
    %c0_43 = arith.constant 0 : index
    %c0_44 = arith.constant 0 : index
    %18 = vector.load %arg18[%c0_43, %c0_44] : memref<1x32xf32, #tpu.memory_space<vmem>>, vector<1x32xf32>
    %c0_45 = arith.constant 0 : index
    %c0_46 = arith.constant 0 : index
    %19 = vector.load %arg19[%c0_45, %c0_46] : memref<1x32xf32, #tpu.memory_space<vmem>>, vector<1x32xf32>
    %c0_47 = arith.constant 0 : index
    %c0_48 = arith.constant 0 : index
    %20 = vector.load %arg20[%c0_47, %c0_48] : memref<32x64xbf16, #tpu.memory_space<vmem>>, vector<32x64xbf16>
    %c0_49 = arith.constant 0 : index
    %c0_50 = arith.constant 0 : index
    %21 = vector.load %arg21[%c0_49, %c0_50] : memref<1x64xf32, #tpu.memory_space<vmem>>, vector<1x64xf32>
    %c0_51 = arith.constant 0 : index
    %c0_52 = arith.constant 0 : index
    %22 = vector.load %arg22[%c0_51, %c0_52] : memref<64x32xbf16, #tpu.memory_space<vmem>>, vector<64x32xbf16>
    %c0_53 = arith.constant 0 : index
    %c0_54 = arith.constant 0 : index
    %23 = vector.load %arg23[%c0_53, %c0_54] : memref<1x32xf32, #tpu.memory_space<vmem>>, vector<1x32xf32>
    %c0_55 = arith.constant 0 : index
    %c0_56 = arith.constant 0 : index
    %24 = vector.load %arg24[%c0_55, %c0_56] : memref<1x32xf32, #tpu.memory_space<vmem>>, vector<1x32xf32>
    %c0_57 = arith.constant 0 : index
    %c0_58 = arith.constant 0 : index
    %25 = vector.load %arg25[%c0_57, %c0_58] : memref<1x32xf32, #tpu.memory_space<vmem>>, vector<1x32xf32>
    %c0_59 = arith.constant 0 : index
    %c0_60 = arith.constant 0 : index
    %c0_61 = arith.constant 0 : index
    %26 = vector.load %arg26[%c0_59, %c0_60, %c0_61] : memref<4x32x8xbf16, #tpu.memory_space<vmem>>, vector<4x32x8xbf16>
    %c0_62 = arith.constant 0 : index
    %c0_63 = arith.constant 0 : index
    %c0_64 = arith.constant 0 : index
    %27 = vector.load %arg27[%c0_62, %c0_63, %c0_64] : memref<4x32x8xbf16, #tpu.memory_space<vmem>>, vector<4x32x8xbf16>
    %c0_65 = arith.constant 0 : index
    %c0_66 = arith.constant 0 : index
    %c0_67 = arith.constant 0 : index
    %28 = vector.load %arg28[%c0_65, %c0_66, %c0_67] : memref<4x32x8xbf16, #tpu.memory_space<vmem>>, vector<4x32x8xbf16>
    %c0_68 = arith.constant 0 : index
    %c0_69 = arith.constant 0 : index
    %c0_70 = arith.constant 0 : index
    %29 = vector.load %arg29[%c0_68, %c0_69, %c0_70] : memref<4x1x8xf32, #tpu.memory_space<vmem>>, vector<4x1x8xf32>
    %c0_71 = arith.constant 0 : index
    %c0_72 = arith.constant 0 : index
    %c0_73 = arith.constant 0 : index
    %30 = vector.load %arg30[%c0_71, %c0_72, %c0_73] : memref<4x1x8xf32, #tpu.memory_space<vmem>>, vector<4x1x8xf32>
    %c0_74 = arith.constant 0 : index
    %c0_75 = arith.constant 0 : index
    %c0_76 = arith.constant 0 : index
    %31 = vector.load %arg31[%c0_74, %c0_75, %c0_76] : memref<4x1x8xf32, #tpu.memory_space<vmem>>, vector<4x1x8xf32>
    %c0_77 = arith.constant 0 : index
    %c0_78 = arith.constant 0 : index
    %c0_79 = arith.constant 0 : index
    %32 = vector.load %arg32[%c0_77, %c0_78, %c0_79] : memref<4x8x32xbf16, #tpu.memory_space<vmem>>, vector<4x8x32xbf16>
    %c0_80 = arith.constant 0 : index
    %c0_81 = arith.constant 0 : index
    %33 = vector.load %arg33[%c0_80, %c0_81] : memref<1x32xf32, #tpu.memory_space<vmem>>, vector<1x32xf32>
    %c0_82 = arith.constant 0 : index
    %c0_83 = arith.constant 0 : index
    %34 = vector.load %arg34[%c0_82, %c0_83] : memref<1x32xf32, #tpu.memory_space<vmem>>, vector<1x32xf32>
    %c0_84 = arith.constant 0 : index
    %c0_85 = arith.constant 0 : index
    %35 = vector.load %arg35[%c0_84, %c0_85] : memref<1x32xf32, #tpu.memory_space<vmem>>, vector<1x32xf32>
    %c0_86 = arith.constant 0 : index
    %c0_87 = arith.constant 0 : index
    %36 = vector.load %arg36[%c0_86, %c0_87] : memref<32x64xbf16, #tpu.memory_space<vmem>>, vector<32x64xbf16>
    %c0_88 = arith.constant 0 : index
    %c0_89 = arith.constant 0 : index
    %37 = vector.load %arg37[%c0_88, %c0_89] : memref<1x64xf32, #tpu.memory_space<vmem>>, vector<1x64xf32>
    %c0_90 = arith.constant 0 : index
    %c0_91 = arith.constant 0 : index
    %38 = vector.load %arg38[%c0_90, %c0_91] : memref<64x32xbf16, #tpu.memory_space<vmem>>, vector<64x32xbf16>
    %c0_92 = arith.constant 0 : index
    %c0_93 = arith.constant 0 : index
    %39 = vector.load %arg39[%c0_92, %c0_93] : memref<1x32xf32, #tpu.memory_space<vmem>>, vector<1x32xf32>
    %c0_94 = arith.constant 0 : index
    %c0_95 = arith.constant 0 : index
    %40 = vector.load %arg40[%c0_94, %c0_95] : memref<1x32xf32, #tpu.memory_space<vmem>>, vector<1x32xf32>
    %c0_96 = arith.constant 0 : index
    %c0_97 = arith.constant 0 : index
    %41 = vector.load %arg41[%c0_96, %c0_97] : memref<1x32xf32, #tpu.memory_space<vmem>>, vector<1x32xf32>
    %c0_98 = arith.constant 0 : index
    %c0_99 = arith.constant 0 : index
    %42 = vector.load %arg42[%c0_98, %c0_99] : memref<32x64xbf16, #tpu.memory_space<vmem>>, vector<32x64xbf16>
    %c0_100 = arith.constant 0 : index
    %c0_101 = arith.constant 0 : index
    %43 = vector.load %arg43[%c0_100, %c0_101] : memref<1x64xf32, #tpu.memory_space<vmem>>, vector<1x64xf32>
    %c0_102 = arith.constant 0 : index
    %c0_103 = arith.constant 0 : index
    %44 = vector.load %arg44[%c0_102, %c0_103] : memref<64x260xbf16, #tpu.memory_space<vmem>>, vector<64x260xbf16>
    %c0_104 = arith.constant 0 : index
    %c0_105 = arith.constant 0 : index
    %45 = vector.load %arg45[%c0_104, %c0_105] : memref<1x260xf32, #tpu.memory_space<vmem>>, vector<1x260xf32>
    %c0_106 = arith.constant 0 : index
    %c0_107 = arith.constant 0 : index
    %46 = vector.load %arg46[%c0_106, %c0_107] : memref<1x260xf32, #tpu.memory_space<vmem>>, vector<1x260xf32>
    %c0_108 = arith.constant 0 : index
    %c0_109 = arith.constant 0 : index
    %47 = vector.load %arg47[%c0_108, %c0_109] : memref<1x260xf32, #tpu.memory_space<vmem>>, vector<1x260xf32>
    %c0_110 = arith.constant 0 : index
    %c0_111 = arith.constant 0 : index
    %48 = vector.load %arg48[%c0_110, %c0_111] : memref<260x5xf32, #tpu.memory_space<vmem>>, vector<260x5xf32>
    %c0_112 = arith.constant 0 : index
    %c0_113 = arith.constant 0 : index
    %49 = vector.load %arg49[%c0_112, %c0_113] : memref<5x260xf32, #tpu.memory_space<vmem>>, vector<5x260xf32>
    %c0_114 = arith.constant 0 : index
    %c0_115 = arith.constant 0 : index
    %50 = vector.load %arg50[%c0_114, %c0_115] : memref<1x5xf32, #tpu.memory_space<vmem>>, vector<1x5xf32>
    %c0_116 = arith.constant 0 : index
    %c0_117 = arith.constant 0 : index
    %51 = vector.load %arg51[%c0_116, %c0_117] : memref<260x129xbf16, #tpu.memory_space<vmem>>, vector<260x129xbf16>
    %c0_118 = arith.constant 0 : index
    %c0_119 = arith.constant 0 : index
    %52 = vector.load %arg52[%c0_118, %c0_119] : memref<1x129xf32, #tpu.memory_space<vmem>>, vector<1x129xf32>
    %c0_120 = arith.constant 0 : index
    %c0_121 = arith.constant 0 : index
    %53 = vector.load %arg53[%c0_120, %c0_121] : memref<129x15xbf16, #tpu.memory_space<vmem>>, vector<129x15xbf16>
    %c0_122 = arith.constant 0 : index
    %c0_123 = arith.constant 0 : index
    %54 = vector.load %arg54[%c0_122, %c0_123] : memref<1x15xf32, #tpu.memory_space<vmem>>, vector<1x15xf32>
    %cst = arith.constant dense<0.000000e+00> : vector<2x16xf32>
    %55 = vector.multi_reduction <add>, %0, %cst [1] : vector<2x8x16xf32> to vector<2x16xf32>
    %56 = vector.shape_cast %55 : vector<2x16xf32> to vector<2x1x16xf32>
    %cst_124 = arith.constant 8.000000e+00 : f32
    %57 = vector.broadcast %cst_124 : f32 to vector<2x1x16xf32>
    %58 = arith.divf %56, %57 : vector<2x1x16xf32>
    %59 = vector.broadcast %58 : vector<2x1x16xf32> to vector<2x8x16xf32>
    %60 = arith.subf %0, %59 : vector<2x8x16xf32>
    %61 = arith.mulf %60, %60 : vector<2x8x16xf32>
    %cst_125 = arith.constant dense<0.000000e+00> : vector<2x16xf32>
    %62 = vector.multi_reduction <add>, %61, %cst_125 [1] : vector<2x8x16xf32> to vector<2x16xf32>
    %63 = vector.shape_cast %62 : vector<2x16xf32> to vector<2x1x16xf32>
    %cst_126 = arith.constant 7.000000e+00 : f32
    %64 = vector.broadcast %cst_126 : f32 to vector<2x1x16xf32>
    %65 = arith.divf %63, %64 : vector<2x1x16xf32>
    %66 = math.sqrt %65 : vector<2x1x16xf32>
    %cst_127 = arith.constant 9.99999993E-9 : f32
    %67 = vector.broadcast %cst_127 : f32 to vector<2x1x16xf32>
    %68 = arith.addf %66, %67 : vector<2x1x16xf32>
    %69 = vector.broadcast %68 : vector<2x1x16xf32> to vector<2x8x16xf32>
    %70 = arith.divf %60, %69 : vector<2x8x16xf32>
    %71 = vector.shape_cast %70 : vector<2x8x16xf32> to vector<16x16xf32>
    %72 = arith.truncf %71 : vector<16x16xf32> to vector<16x16xbf16>
    %cst_128 = arith.constant dense<0.000000e+00> : vector<16x32xf32>
    %73 = tpu.matmul %72, %1, %cst_128 {dimension_numbers = #tpu.dot_dimension_numbers<[1], [0], [0], [1], [0, 0, 1, 1], [], []>} : vector<16x16xbf16>, vector<16x32xbf16>, vector<16x32xf32> -> vector<16x32xf32>
    %74 = vector.broadcast %2 : vector<1x32xf32> to vector<16x32xf32>
    %75 = arith.addf %73, %74 : vector<16x32xf32>
    %cst_129 = arith.constant dense<0.000000e+00> : vector<16xf32>
    %76 = vector.multi_reduction <add>, %75, %cst_129 [1] : vector<16x32xf32> to vector<16xf32>
    %77 = vector.shape_cast %76 : vector<16xf32> to vector<16x1xf32>
    %cst_130 = arith.constant 3.200000e+01 : f32
    %78 = vector.broadcast %cst_130 : f32 to vector<16x1xf32>
    %79 = arith.divf %77, %78 : vector<16x1xf32>
    %80 = vector.broadcast %79 : vector<16x1xf32> to vector<16x32xf32>
    %81 = arith.subf %75, %80 : vector<16x32xf32>
    %82 = arith.mulf %81, %81 : vector<16x32xf32>
    %cst_131 = arith.constant dense<0.000000e+00> : vector<16xf32>
    %83 = vector.multi_reduction <add>, %82, %cst_131 [1] : vector<16x32xf32> to vector<16xf32>
    %84 = vector.shape_cast %83 : vector<16xf32> to vector<16x1xf32>
    %cst_132 = arith.constant 3.200000e+01 : f32
    %85 = vector.broadcast %cst_132 : f32 to vector<16x1xf32>
    %86 = arith.divf %84, %85 : vector<16x1xf32>
    %87 = vector.broadcast %79 : vector<16x1xf32> to vector<16x32xf32>
    %88 = arith.subf %75, %87 : vector<16x32xf32>
    %cst_133 = arith.constant 9.99999974E-6 : f32
    %89 = vector.broadcast %cst_133 : f32 to vector<16x1xf32>
    %90 = arith.addf %86, %89 : vector<16x1xf32>
    %91 = math.rsqrt %90 : vector<16x1xf32>
    %92 = vector.broadcast %91 : vector<16x1xf32> to vector<16x32xf32>
    %93 = arith.mulf %88, %92 : vector<16x32xf32>
    %94 = vector.broadcast %3 : vector<1x32xf32> to vector<16x32xf32>
    %95 = arith.mulf %93, %94 : vector<16x32xf32>
    %96 = vector.broadcast %4 : vector<1x32xf32> to vector<16x32xf32>
    %97 = arith.addf %95, %96 : vector<16x32xf32>
    %98 = arith.addf %97, %5 : vector<16x32xf32>
    %99 = arith.truncf %98 : vector<16x32xf32> to vector<16x32xbf16>
    %cst_134 = arith.constant dense<0.000000e+00> : vector<16x32xf32>
    %100 = tpu.matmul %99, %6, %cst_134 {dimension_numbers = #tpu.dot_dimension_numbers<[1], [0], [0], [1], [0, 0, 1, 1], [], []>} : vector<16x32xbf16>, vector<32x32xbf16>, vector<16x32xf32> -> vector<16x32xf32>
    %101 = vector.broadcast %7 : vector<1x32xf32> to vector<16x32xf32>
    %102 = arith.addf %100, %101 : vector<16x32xf32>
    %cst_135 = arith.constant dense<0.000000e+00> : vector<16xf32>
    %103 = vector.multi_reduction <add>, %102, %cst_135 [1] : vector<16x32xf32> to vector<16xf32>
    %104 = vector.shape_cast %103 : vector<16xf32> to vector<16x1xf32>
    %cst_136 = arith.constant 3.200000e+01 : f32
    %105 = vector.broadcast %cst_136 : f32 to vector<16x1xf32>
    %106 = arith.divf %104, %105 : vector<16x1xf32>
    %107 = vector.broadcast %106 : vector<16x1xf32> to vector<16x32xf32>
    %108 = arith.subf %102, %107 : vector<16x32xf32>
    %109 = arith.mulf %108, %108 : vector<16x32xf32>
    %cst_137 = arith.constant dense<0.000000e+00> : vector<16xf32>
    %110 = vector.multi_reduction <add>, %109, %cst_137 [1] : vector<16x32xf32> to vector<16xf32>
    %111 = vector.shape_cast %110 : vector<16xf32> to vector<16x1xf32>
    %cst_138 = arith.constant 3.200000e+01 : f32
    %112 = vector.broadcast %cst_138 : f32 to vector<16x1xf32>
    %113 = arith.divf %111, %112 : vector<16x1xf32>
    %114 = vector.broadcast %106 : vector<16x1xf32> to vector<16x32xf32>
    %115 = arith.subf %102, %114 : vector<16x32xf32>
    %cst_139 = arith.constant 9.99999974E-6 : f32
    %116 = vector.broadcast %cst_139 : f32 to vector<16x1xf32>
    %117 = arith.addf %113, %116 : vector<16x1xf32>
    %118 = math.rsqrt %117 : vector<16x1xf32>
    %119 = vector.broadcast %118 : vector<16x1xf32> to vector<16x32xf32>
    %120 = arith.mulf %115, %119 : vector<16x32xf32>
    %121 = vector.broadcast %8 : vector<1x32xf32> to vector<16x32xf32>
    %122 = arith.mulf %120, %121 : vector<16x32xf32>
    %123 = vector.broadcast %9 : vector<1x32xf32> to vector<16x32xf32>
    %124 = arith.addf %122, %123 : vector<16x32xf32>
    %125 = arith.mulf %124, %124 : vector<16x32xf32>
    %126 = arith.mulf %124, %125 : vector<16x32xf32>
    %cst_140 = arith.constant 4.471500e-02 : f32
    %127 = vector.broadcast %cst_140 : f32 to vector<16x32xf32>
    %128 = arith.mulf %127, %126 : vector<16x32xf32>
    %129 = arith.addf %124, %128 : vector<16x32xf32>
    %cst_141 = arith.constant 0.797884583 : f32
    %130 = vector.broadcast %cst_141 : f32 to vector<16x32xf32>
    %131 = arith.mulf %130, %129 : vector<16x32xf32>
    %132 = math.tanh %131 : vector<16x32xf32>
    %cst_142 = arith.constant 1.000000e+00 : f32
    %133 = vector.broadcast %cst_142 : f32 to vector<16x32xf32>
    %134 = arith.addf %133, %132 : vector<16x32xf32>
    %cst_143 = arith.constant 5.000000e-01 : f32
    %135 = vector.broadcast %cst_143 : f32 to vector<16x32xf32>
    %136 = arith.mulf %135, %134 : vector<16x32xf32>
    %137 = arith.mulf %124, %136 : vector<16x32xf32>
    %138 = vector.extract_strided_slice %137 {offsets = [0, 0], sizes = [8, 32], strides = [1, 1]} : vector<16x32xf32> to vector<8x32xf32>
    %139 = arith.truncf %138 : vector<8x32xf32> to vector<8x32xbf16>
    %140 = vector.shape_cast %139 : vector<8x32xbf16> to vector<1x8x32xbf16>
    %141 = vector.broadcast %140 : vector<1x8x32xbf16> to vector<4x8x32xbf16>
    "tpu.trace_start"() <{level = 10 : i32, message = "hsd,hde->hse"}> : () -> ()
    %cst_144 = arith.constant dense<0.000000e+00> : vector<4x8x8xf32>
    %142 = tpu.matmul %141, %10, %cst_144 {dimension_numbers = #tpu.dot_dimension_numbers<[2], [1], [1], [2], [0, 0, 0, 1, 1, 2], [0], [0]>} : vector<4x8x32xbf16>, vector<4x32x8xbf16>, vector<4x8x8xf32> -> vector<4x8x8xf32>
    "tpu.trace_stop"() : () -> ()
    %143 = vector.broadcast %13 : vector<4x1x8xf32> to vector<4x8x8xf32>
    %144 = arith.addf %142, %143 : vector<4x8x8xf32>
    "tpu.trace_start"() <{level = 10 : i32, message = "hsd,hde->hse"}> : () -> ()
    %cst_145 = arith.constant dense<0.000000e+00> : vector<4x8x8xf32>
    %145 = tpu.matmul %141, %11, %cst_145 {dimension_numbers = #tpu.dot_dimension_numbers<[2], [1], [1], [2], [0, 0, 0, 1, 1, 2], [0], [0]>} : vector<4x8x32xbf16>, vector<4x32x8xbf16>, vector<4x8x8xf32> -> vector<4x8x8xf32>
    "tpu.trace_stop"() : () -> ()
    %146 = vector.broadcast %14 : vector<4x1x8xf32> to vector<4x8x8xf32>
    %147 = arith.addf %145, %146 : vector<4x8x8xf32>
    "tpu.trace_start"() <{level = 10 : i32, message = "hsd,hde->hse"}> : () -> ()
    %cst_146 = arith.constant dense<0.000000e+00> : vector<4x8x8xf32>
    %148 = tpu.matmul %141, %12, %cst_146 {dimension_numbers = #tpu.dot_dimension_numbers<[2], [1], [1], [2], [0, 0, 0, 1, 1, 2], [0], [0]>} : vector<4x8x32xbf16>, vector<4x32x8xbf16>, vector<4x8x8xf32> -> vector<4x8x8xf32>
    "tpu.trace_stop"() : () -> ()
    %149 = vector.broadcast %15 : vector<4x1x8xf32> to vector<4x8x8xf32>
    %150 = arith.addf %148, %149 : vector<4x8x8xf32>
    %151 = arith.truncf %144 : vector<4x8x8xf32> to vector<4x8x8xbf16>
    %152 = arith.truncf %147 : vector<4x8x8xf32> to vector<4x8x8xbf16>
    "tpu.trace_start"() <{level = 10 : i32, message = "hqe,hke->hqk"}> : () -> ()
    %cst_147 = arith.constant dense<0.000000e+00> : vector<4x8x8xf32>
    %153 = tpu.matmul %151, %152, %cst_147 {dimension_numbers = #tpu.dot_dimension_numbers<[2], [2], [1], [1], [0, 0, 0, 1, 1, 1], [0], [0]>} : vector<4x8x8xbf16>, vector<4x8x8xbf16>, vector<4x8x8xf32> -> vector<4x8x8xf32>
    "tpu.trace_stop"() : () -> ()
    %cst_148 = arith.constant 0.353553385 : f32
    %154 = vector.broadcast %cst_148 : f32 to vector<4x8x8xf32>
    %155 = arith.mulf %153, %154 : vector<4x8x8xf32>
    %cst_149 = arith.constant dense<0xFF800000> : vector<4x8xf32>
    %156 = vector.multi_reduction <maximumf>, %155, %cst_149 [2] : vector<4x8x8xf32> to vector<4x8xf32>
    %157 = vector.shape_cast %156 : vector<4x8xf32> to vector<4x8x1xf32>
    %158 = vector.broadcast %157 : vector<4x8x1xf32> to vector<4x8x8xf32>
    %159 = arith.subf %155, %158 : vector<4x8x8xf32>
    %160 = math.exp %159 : vector<4x8x8xf32>
    %cst_150 = arith.constant dense<0.000000e+00> : vector<4x8xf32>
    %161 = vector.multi_reduction <add>, %160, %cst_150 [2] : vector<4x8x8xf32> to vector<4x8xf32>
    %162 = vector.shape_cast %161 : vector<4x8xf32> to vector<4x8x1xf32>
    %163 = vector.broadcast %162 : vector<4x8x1xf32> to vector<4x8x8xf32>
    %164 = arith.divf %160, %163 : vector<4x8x8xf32>
    %165 = arith.truncf %164 : vector<4x8x8xf32> to vector<4x8x8xbf16>
    %166 = arith.truncf %150 : vector<4x8x8xf32> to vector<4x8x8xbf16>
    "tpu.trace_start"() <{level = 10 : i32, message = "hqk,hke->hqe"}> : () -> ()
    %cst_151 = arith.constant dense<0.000000e+00> : vector<4x8x8xf32>
    %167 = tpu.matmul %165, %166, %cst_151 {dimension_numbers = #tpu.dot_dimension_numbers<[2], [1], [1], [2], [0, 0, 0, 1, 1, 2], [0], [0]>} : vector<4x8x8xbf16>, vector<4x8x8xbf16>, vector<4x8x8xf32> -> vector<4x8x8xf32>
    "tpu.trace_stop"() : () -> ()
    %168 = arith.truncf %167 : vector<4x8x8xf32> to vector<4x8x8xbf16>
    "tpu.trace_start"() <{level = 10 : i32, message = "hqe,hed->hqd"}> : () -> ()
    %cst_152 = arith.constant dense<0.000000e+00> : vector<4x8x32xf32>
    %169 = tpu.matmul %168, %16, %cst_152 {dimension_numbers = #tpu.dot_dimension_numbers<[2], [1], [1], [2], [0, 0, 0, 1, 1, 2], [0], [0]>} : vector<4x8x8xbf16>, vector<4x8x32xbf16>, vector<4x8x32xf32> -> vector<4x8x32xf32>
    "tpu.trace_stop"() : () -> ()
    %cst_153 = arith.constant dense<0.000000e+00> : vector<8x32xf32>
    %170 = vector.multi_reduction <add>, %169, %cst_153 [0] : vector<4x8x32xf32> to vector<8x32xf32>
    %171 = vector.extract_strided_slice %137 {offsets = [8, 0], sizes = [8, 32], strides = [1, 1]} : vector<16x32xf32> to vector<8x32xf32>
    %172 = arith.truncf %171 : vector<8x32xf32> to vector<8x32xbf16>
    %173 = vector.shape_cast %172 : vector<8x32xbf16> to vector<1x8x32xbf16>
    %174 = vector.broadcast %173 : vector<1x8x32xbf16> to vector<4x8x32xbf16>
    "tpu.trace_start"() <{level = 10 : i32, message = "hsd,hde->hse"}> : () -> ()
    %cst_154 = arith.constant dense<0.000000e+00> : vector<4x8x8xf32>
    %175 = tpu.matmul %174, %10, %cst_154 {dimension_numbers = #tpu.dot_dimension_numbers<[2], [1], [1], [2], [0, 0, 0, 1, 1, 2], [0], [0]>} : vector<4x8x32xbf16>, vector<4x32x8xbf16>, vector<4x8x8xf32> -> vector<4x8x8xf32>
    "tpu.trace_stop"() : () -> ()
    %176 = vector.broadcast %13 : vector<4x1x8xf32> to vector<4x8x8xf32>
    %177 = arith.addf %175, %176 : vector<4x8x8xf32>
    "tpu.trace_start"() <{level = 10 : i32, message = "hsd,hde->hse"}> : () -> ()
    %cst_155 = arith.constant dense<0.000000e+00> : vector<4x8x8xf32>
    %178 = tpu.matmul %174, %11, %cst_155 {dimension_numbers = #tpu.dot_dimension_numbers<[2], [1], [1], [2], [0, 0, 0, 1, 1, 2], [0], [0]>} : vector<4x8x32xbf16>, vector<4x32x8xbf16>, vector<4x8x8xf32> -> vector<4x8x8xf32>
    "tpu.trace_stop"() : () -> ()
    %179 = vector.broadcast %14 : vector<4x1x8xf32> to vector<4x8x8xf32>
    %180 = arith.addf %178, %179 : vector<4x8x8xf32>
    "tpu.trace_start"() <{level = 10 : i32, message = "hsd,hde->hse"}> : () -> ()
    %cst_156 = arith.constant dense<0.000000e+00> : vector<4x8x8xf32>
    %181 = tpu.matmul %174, %12, %cst_156 {dimension_numbers = #tpu.dot_dimension_numbers<[2], [1], [1], [2], [0, 0, 0, 1, 1, 2], [0], [0]>} : vector<4x8x32xbf16>, vector<4x32x8xbf16>, vector<4x8x8xf32> -> vector<4x8x8xf32>
    "tpu.trace_stop"() : () -> ()
    %182 = vector.broadcast %15 : vector<4x1x8xf32> to vector<4x8x8xf32>
    %183 = arith.addf %181, %182 : vector<4x8x8xf32>
    %184 = arith.truncf %177 : vector<4x8x8xf32> to vector<4x8x8xbf16>
    %185 = arith.truncf %180 : vector<4x8x8xf32> to vector<4x8x8xbf16>
    "tpu.trace_start"() <{level = 10 : i32, message = "hqe,hke->hqk"}> : () -> ()
    %cst_157 = arith.constant dense<0.000000e+00> : vector<4x8x8xf32>
    %186 = tpu.matmul %184, %185, %cst_157 {dimension_numbers = #tpu.dot_dimension_numbers<[2], [2], [1], [1], [0, 0, 0, 1, 1, 1], [0], [0]>} : vector<4x8x8xbf16>, vector<4x8x8xbf16>, vector<4x8x8xf32> -> vector<4x8x8xf32>
    "tpu.trace_stop"() : () -> ()
    %cst_158 = arith.constant 0.353553385 : f32
    %187 = vector.broadcast %cst_158 : f32 to vector<4x8x8xf32>
    %188 = arith.mulf %186, %187 : vector<4x8x8xf32>
    %cst_159 = arith.constant dense<0xFF800000> : vector<4x8xf32>
    %189 = vector.multi_reduction <maximumf>, %188, %cst_159 [2] : vector<4x8x8xf32> to vector<4x8xf32>
    %190 = vector.shape_cast %189 : vector<4x8xf32> to vector<4x8x1xf32>
    %191 = vector.broadcast %190 : vector<4x8x1xf32> to vector<4x8x8xf32>
    %192 = arith.subf %188, %191 : vector<4x8x8xf32>
    %193 = math.exp %192 : vector<4x8x8xf32>
    %cst_160 = arith.constant dense<0.000000e+00> : vector<4x8xf32>
    %194 = vector.multi_reduction <add>, %193, %cst_160 [2] : vector<4x8x8xf32> to vector<4x8xf32>
    %195 = vector.shape_cast %194 : vector<4x8xf32> to vector<4x8x1xf32>
    %196 = vector.broadcast %195 : vector<4x8x1xf32> to vector<4x8x8xf32>
    %197 = arith.divf %193, %196 : vector<4x8x8xf32>
    %198 = arith.truncf %197 : vector<4x8x8xf32> to vector<4x8x8xbf16>
    %199 = arith.truncf %183 : vector<4x8x8xf32> to vector<4x8x8xbf16>
    "tpu.trace_start"() <{level = 10 : i32, message = "hqk,hke->hqe"}> : () -> ()
    %cst_161 = arith.constant dense<0.000000e+00> : vector<4x8x8xf32>
    %200 = tpu.matmul %198, %199, %cst_161 {dimension_numbers = #tpu.dot_dimension_numbers<[2], [1], [1], [2], [0, 0, 0, 1, 1, 2], [0], [0]>} : vector<4x8x8xbf16>, vector<4x8x8xbf16>, vector<4x8x8xf32> -> vector<4x8x8xf32>
    "tpu.trace_stop"() : () -> ()
    %201 = arith.truncf %200 : vector<4x8x8xf32> to vector<4x8x8xbf16>
    "tpu.trace_start"() <{level = 10 : i32, message = "hqe,hed->hqd"}> : () -> ()
    %cst_162 = arith.constant dense<0.000000e+00> : vector<4x8x32xf32>
    %202 = tpu.matmul %201, %16, %cst_162 {dimension_numbers = #tpu.dot_dimension_numbers<[2], [1], [1], [2], [0, 0, 0, 1, 1, 2], [0], [0]>} : vector<4x8x8xbf16>, vector<4x8x32xbf16>, vector<4x8x32xf32> -> vector<4x8x32xf32>
    "tpu.trace_stop"() : () -> ()
    %cst_163 = arith.constant dense<0.000000e+00> : vector<8x32xf32>
    %203 = vector.multi_reduction <add>, %202, %cst_163 [0] : vector<4x8x32xf32> to vector<8x32xf32>
    %204 = tpu.concatenate %170, %203 in 0 : vector<8x32xf32>, vector<8x32xf32> -> vector<16x32xf32>
    %205 = vector.broadcast %17 : vector<1x32xf32> to vector<16x32xf32>
    %206 = arith.addf %204, %205 : vector<16x32xf32>
    %207 = arith.addf %137, %206 : vector<16x32xf32>
    %cst_164 = arith.constant dense<0.000000e+00> : vector<16xf32>
    %208 = vector.multi_reduction <add>, %207, %cst_164 [1] : vector<16x32xf32> to vector<16xf32>
    %209 = vector.shape_cast %208 : vector<16xf32> to vector<16x1xf32>
    %cst_165 = arith.constant 3.200000e+01 : f32
    %210 = vector.broadcast %cst_165 : f32 to vector<16x1xf32>
    %211 = arith.divf %209, %210 : vector<16x1xf32>
    %212 = vector.broadcast %211 : vector<16x1xf32> to vector<16x32xf32>
    %213 = arith.subf %207, %212 : vector<16x32xf32>
    %214 = arith.mulf %213, %213 : vector<16x32xf32>
    %cst_166 = arith.constant dense<0.000000e+00> : vector<16xf32>
    %215 = vector.multi_reduction <add>, %214, %cst_166 [1] : vector<16x32xf32> to vector<16xf32>
    %216 = vector.shape_cast %215 : vector<16xf32> to vector<16x1xf32>
    %cst_167 = arith.constant 3.200000e+01 : f32
    %217 = vector.broadcast %cst_167 : f32 to vector<16x1xf32>
    %218 = arith.divf %216, %217 : vector<16x1xf32>
    %219 = vector.broadcast %211 : vector<16x1xf32> to vector<16x32xf32>
    %220 = arith.subf %207, %219 : vector<16x32xf32>
    %cst_168 = arith.constant 9.99999974E-6 : f32
    %221 = vector.broadcast %cst_168 : f32 to vector<16x1xf32>
    %222 = arith.addf %218, %221 : vector<16x1xf32>
    %223 = math.rsqrt %222 : vector<16x1xf32>
    %224 = vector.broadcast %223 : vector<16x1xf32> to vector<16x32xf32>
    %225 = arith.mulf %220, %224 : vector<16x32xf32>
    %226 = vector.broadcast %18 : vector<1x32xf32> to vector<16x32xf32>
    %227 = arith.mulf %225, %226 : vector<16x32xf32>
    %228 = vector.broadcast %19 : vector<1x32xf32> to vector<16x32xf32>
    %229 = arith.addf %227, %228 : vector<16x32xf32>
    %230 = arith.truncf %229 : vector<16x32xf32> to vector<16x32xbf16>
    %cst_169 = arith.constant dense<0.000000e+00> : vector<16x64xf32>
    %231 = tpu.matmul %230, %20, %cst_169 {dimension_numbers = #tpu.dot_dimension_numbers<[1], [0], [0], [1], [0, 0, 1, 1], [], []>} : vector<16x32xbf16>, vector<32x64xbf16>, vector<16x64xf32> -> vector<16x64xf32>
    %232 = vector.broadcast %21 : vector<1x64xf32> to vector<16x64xf32>
    %233 = arith.addf %231, %232 : vector<16x64xf32>
    %cst_170 = arith.constant 0.000000e+00 : f32
    %234 = vector.broadcast %cst_170 : f32 to vector<16x64xf32>
    %235 = arith.maximumf %233, %234 : vector<16x64xf32>
    %236 = arith.truncf %235 : vector<16x64xf32> to vector<16x64xbf16>
    %cst_171 = arith.constant dense<0.000000e+00> : vector<16x32xf32>
    %237 = tpu.matmul %236, %22, %cst_171 {dimension_numbers = #tpu.dot_dimension_numbers<[1], [0], [0], [1], [0, 0, 1, 1], [], []>} : vector<16x64xbf16>, vector<64x32xbf16>, vector<16x32xf32> -> vector<16x32xf32>
    %238 = vector.broadcast %23 : vector<1x32xf32> to vector<16x32xf32>
    %239 = arith.addf %237, %238 : vector<16x32xf32>
    %240 = arith.addf %229, %239 : vector<16x32xf32>
    %cst_172 = arith.constant dense<0.000000e+00> : vector<16xf32>
    %241 = vector.multi_reduction <add>, %240, %cst_172 [1] : vector<16x32xf32> to vector<16xf32>
    %242 = vector.shape_cast %241 : vector<16xf32> to vector<16x1xf32>
    %cst_173 = arith.constant 3.200000e+01 : f32
    %243 = vector.broadcast %cst_173 : f32 to vector<16x1xf32>
    %244 = arith.divf %242, %243 : vector<16x1xf32>
    %245 = vector.broadcast %244 : vector<16x1xf32> to vector<16x32xf32>
    %246 = arith.subf %240, %245 : vector<16x32xf32>
    %247 = arith.mulf %246, %246 : vector<16x32xf32>
    %cst_174 = arith.constant dense<0.000000e+00> : vector<16xf32>
    %248 = vector.multi_reduction <add>, %247, %cst_174 [1] : vector<16x32xf32> to vector<16xf32>
    %249 = vector.shape_cast %248 : vector<16xf32> to vector<16x1xf32>
    %cst_175 = arith.constant 3.200000e+01 : f32
    %250 = vector.broadcast %cst_175 : f32 to vector<16x1xf32>
    %251 = arith.divf %249, %250 : vector<16x1xf32>
    %252 = vector.broadcast %244 : vector<16x1xf32> to vector<16x32xf32>
    %253 = arith.subf %240, %252 : vector<16x32xf32>
    %cst_176 = arith.constant 9.99999974E-6 : f32
    %254 = vector.broadcast %cst_176 : f32 to vector<16x1xf32>
    %255 = arith.addf %251, %254 : vector<16x1xf32>
    %256 = math.rsqrt %255 : vector<16x1xf32>
    %257 = vector.broadcast %256 : vector<16x1xf32> to vector<16x32xf32>
    %258 = arith.mulf %253, %257 : vector<16x32xf32>
    %259 = vector.broadcast %24 : vector<1x32xf32> to vector<16x32xf32>
    %260 = arith.mulf %258, %259 : vector<16x32xf32>
    %261 = vector.broadcast %25 : vector<1x32xf32> to vector<16x32xf32>
    %262 = arith.addf %260, %261 : vector<16x32xf32>
    %263 = vector.extract_strided_slice %262 {offsets = [0, 0], sizes = [8, 32], strides = [1, 1]} : vector<16x32xf32> to vector<8x32xf32>
    %264 = arith.truncf %263 : vector<8x32xf32> to vector<8x32xbf16>
    %265 = vector.shape_cast %264 : vector<8x32xbf16> to vector<1x8x32xbf16>
    %266 = vector.broadcast %265 : vector<1x8x32xbf16> to vector<4x8x32xbf16>
    "tpu.trace_start"() <{level = 10 : i32, message = "hsd,hde->hse"}> : () -> ()
    %cst_177 = arith.constant dense<0.000000e+00> : vector<4x8x8xf32>
    %267 = tpu.matmul %266, %26, %cst_177 {dimension_numbers = #tpu.dot_dimension_numbers<[2], [1], [1], [2], [0, 0, 0, 1, 1, 2], [0], [0]>} : vector<4x8x32xbf16>, vector<4x32x8xbf16>, vector<4x8x8xf32> -> vector<4x8x8xf32>
    "tpu.trace_stop"() : () -> ()
    %268 = vector.broadcast %29 : vector<4x1x8xf32> to vector<4x8x8xf32>
    %269 = arith.addf %267, %268 : vector<4x8x8xf32>
    "tpu.trace_start"() <{level = 10 : i32, message = "hsd,hde->hse"}> : () -> ()
    %cst_178 = arith.constant dense<0.000000e+00> : vector<4x8x8xf32>
    %270 = tpu.matmul %266, %27, %cst_178 {dimension_numbers = #tpu.dot_dimension_numbers<[2], [1], [1], [2], [0, 0, 0, 1, 1, 2], [0], [0]>} : vector<4x8x32xbf16>, vector<4x32x8xbf16>, vector<4x8x8xf32> -> vector<4x8x8xf32>
    "tpu.trace_stop"() : () -> ()
    %271 = vector.broadcast %30 : vector<4x1x8xf32> to vector<4x8x8xf32>
    %272 = arith.addf %270, %271 : vector<4x8x8xf32>
    "tpu.trace_start"() <{level = 10 : i32, message = "hsd,hde->hse"}> : () -> ()
    %cst_179 = arith.constant dense<0.000000e+00> : vector<4x8x8xf32>
    %273 = tpu.matmul %266, %28, %cst_179 {dimension_numbers = #tpu.dot_dimension_numbers<[2], [1], [1], [2], [0, 0, 0, 1, 1, 2], [0], [0]>} : vector<4x8x32xbf16>, vector<4x32x8xbf16>, vector<4x8x8xf32> -> vector<4x8x8xf32>
    "tpu.trace_stop"() : () -> ()
    %274 = vector.broadcast %31 : vector<4x1x8xf32> to vector<4x8x8xf32>
    %275 = arith.addf %273, %274 : vector<4x8x8xf32>
    %276 = arith.truncf %269 : vector<4x8x8xf32> to vector<4x8x8xbf16>
    %277 = arith.truncf %272 : vector<4x8x8xf32> to vector<4x8x8xbf16>
    "tpu.trace_start"() <{level = 10 : i32, message = "hqe,hke->hqk"}> : () -> ()
    %cst_180 = arith.constant dense<0.000000e+00> : vector<4x8x8xf32>
    %278 = tpu.matmul %276, %277, %cst_180 {dimension_numbers = #tpu.dot_dimension_numbers<[2], [2], [1], [1], [0, 0, 0, 1, 1, 1], [0], [0]>} : vector<4x8x8xbf16>, vector<4x8x8xbf16>, vector<4x8x8xf32> -> vector<4x8x8xf32>
    "tpu.trace_stop"() : () -> ()
    %cst_181 = arith.constant 0.353553385 : f32
    %279 = vector.broadcast %cst_181 : f32 to vector<4x8x8xf32>
    %280 = arith.mulf %278, %279 : vector<4x8x8xf32>
    %cst_182 = arith.constant dense<0xFF800000> : vector<4x8xf32>
    %281 = vector.multi_reduction <maximumf>, %280, %cst_182 [2] : vector<4x8x8xf32> to vector<4x8xf32>
    %282 = vector.shape_cast %281 : vector<4x8xf32> to vector<4x8x1xf32>
    %283 = vector.broadcast %282 : vector<4x8x1xf32> to vector<4x8x8xf32>
    %284 = arith.subf %280, %283 : vector<4x8x8xf32>
    %285 = math.exp %284 : vector<4x8x8xf32>
    %cst_183 = arith.constant dense<0.000000e+00> : vector<4x8xf32>
    %286 = vector.multi_reduction <add>, %285, %cst_183 [2] : vector<4x8x8xf32> to vector<4x8xf32>
    %287 = vector.shape_cast %286 : vector<4x8xf32> to vector<4x8x1xf32>
    %288 = vector.broadcast %287 : vector<4x8x1xf32> to vector<4x8x8xf32>
    %289 = arith.divf %285, %288 : vector<4x8x8xf32>
    %290 = arith.truncf %289 : vector<4x8x8xf32> to vector<4x8x8xbf16>
    %291 = arith.truncf %275 : vector<4x8x8xf32> to vector<4x8x8xbf16>
    "tpu.trace_start"() <{level = 10 : i32, message = "hqk,hke->hqe"}> : () -> ()
    %cst_184 = arith.constant dense<0.000000e+00> : vector<4x8x8xf32>
    %292 = tpu.matmul %290, %291, %cst_184 {dimension_numbers = #tpu.dot_dimension_numbers<[2], [1], [1], [2], [0, 0, 0, 1, 1, 2], [0], [0]>} : vector<4x8x8xbf16>, vector<4x8x8xbf16>, vector<4x8x8xf32> -> vector<4x8x8xf32>
    "tpu.trace_stop"() : () -> ()
    %293 = arith.truncf %292 : vector<4x8x8xf32> to vector<4x8x8xbf16>
    "tpu.trace_start"() <{level = 10 : i32, message = "hqe,hed->hqd"}> : () -> ()
    %cst_185 = arith.constant dense<0.000000e+00> : vector<4x8x32xf32>
    %294 = tpu.matmul %293, %32, %cst_185 {dimension_numbers = #tpu.dot_dimension_numbers<[2], [1], [1], [2], [0, 0, 0, 1, 1, 2], [0], [0]>} : vector<4x8x8xbf16>, vector<4x8x32xbf16>, vector<4x8x32xf32> -> vector<4x8x32xf32>
    "tpu.trace_stop"() : () -> ()
    %cst_186 = arith.constant dense<0.000000e+00> : vector<8x32xf32>
    %295 = vector.multi_reduction <add>, %294, %cst_186 [0] : vector<4x8x32xf32> to vector<8x32xf32>
    %296 = vector.extract_strided_slice %262 {offsets = [8, 0], sizes = [8, 32], strides = [1, 1]} : vector<16x32xf32> to vector<8x32xf32>
    %297 = arith.truncf %296 : vector<8x32xf32> to vector<8x32xbf16>
    %298 = vector.shape_cast %297 : vector<8x32xbf16> to vector<1x8x32xbf16>
    %299 = vector.broadcast %298 : vector<1x8x32xbf16> to vector<4x8x32xbf16>
    "tpu.trace_start"() <{level = 10 : i32, message = "hsd,hde->hse"}> : () -> ()
    %cst_187 = arith.constant dense<0.000000e+00> : vector<4x8x8xf32>
    %300 = tpu.matmul %299, %26, %cst_187 {dimension_numbers = #tpu.dot_dimension_numbers<[2], [1], [1], [2], [0, 0, 0, 1, 1, 2], [0], [0]>} : vector<4x8x32xbf16>, vector<4x32x8xbf16>, vector<4x8x8xf32> -> vector<4x8x8xf32>
    "tpu.trace_stop"() : () -> ()
    %301 = vector.broadcast %29 : vector<4x1x8xf32> to vector<4x8x8xf32>
    %302 = arith.addf %300, %301 : vector<4x8x8xf32>
    "tpu.trace_start"() <{level = 10 : i32, message = "hsd,hde->hse"}> : () -> ()
    %cst_188 = arith.constant dense<0.000000e+00> : vector<4x8x8xf32>
    %303 = tpu.matmul %299, %27, %cst_188 {dimension_numbers = #tpu.dot_dimension_numbers<[2], [1], [1], [2], [0, 0, 0, 1, 1, 2], [0], [0]>} : vector<4x8x32xbf16>, vector<4x32x8xbf16>, vector<4x8x8xf32> -> vector<4x8x8xf32>
    "tpu.trace_stop"() : () -> ()
    %304 = vector.broadcast %30 : vector<4x1x8xf32> to vector<4x8x8xf32>
    %305 = arith.addf %303, %304 : vector<4x8x8xf32>
    "tpu.trace_start"() <{level = 10 : i32, message = "hsd,hde->hse"}> : () -> ()
    %cst_189 = arith.constant dense<0.000000e+00> : vector<4x8x8xf32>
    %306 = tpu.matmul %299, %28, %cst_189 {dimension_numbers = #tpu.dot_dimension_numbers<[2], [1], [1], [2], [0, 0, 0, 1, 1, 2], [0], [0]>} : vector<4x8x32xbf16>, vector<4x32x8xbf16>, vector<4x8x8xf32> -> vector<4x8x8xf32>
    "tpu.trace_stop"() : () -> ()
    %307 = vector.broadcast %31 : vector<4x1x8xf32> to vector<4x8x8xf32>
    %308 = arith.addf %306, %307 : vector<4x8x8xf32>
    %309 = arith.truncf %302 : vector<4x8x8xf32> to vector<4x8x8xbf16>
    %310 = arith.truncf %305 : vector<4x8x8xf32> to vector<4x8x8xbf16>
    "tpu.trace_start"() <{level = 10 : i32, message = "hqe,hke->hqk"}> : () -> ()
    %cst_190 = arith.constant dense<0.000000e+00> : vector<4x8x8xf32>
    %311 = tpu.matmul %309, %310, %cst_190 {dimension_numbers = #tpu.dot_dimension_numbers<[2], [2], [1], [1], [0, 0, 0, 1, 1, 1], [0], [0]>} : vector<4x8x8xbf16>, vector<4x8x8xbf16>, vector<4x8x8xf32> -> vector<4x8x8xf32>
    "tpu.trace_stop"() : () -> ()
    %cst_191 = arith.constant 0.353553385 : f32
    %312 = vector.broadcast %cst_191 : f32 to vector<4x8x8xf32>
    %313 = arith.mulf %311, %312 : vector<4x8x8xf32>
    %cst_192 = arith.constant dense<0xFF800000> : vector<4x8xf32>
    %314 = vector.multi_reduction <maximumf>, %313, %cst_192 [2] : vector<4x8x8xf32> to vector<4x8xf32>
    %315 = vector.shape_cast %314 : vector<4x8xf32> to vector<4x8x1xf32>
    %316 = vector.broadcast %315 : vector<4x8x1xf32> to vector<4x8x8xf32>
    %317 = arith.subf %313, %316 : vector<4x8x8xf32>
    %318 = math.exp %317 : vector<4x8x8xf32>
    %cst_193 = arith.constant dense<0.000000e+00> : vector<4x8xf32>
    %319 = vector.multi_reduction <add>, %318, %cst_193 [2] : vector<4x8x8xf32> to vector<4x8xf32>
    %320 = vector.shape_cast %319 : vector<4x8xf32> to vector<4x8x1xf32>
    %321 = vector.broadcast %320 : vector<4x8x1xf32> to vector<4x8x8xf32>
    %322 = arith.divf %318, %321 : vector<4x8x8xf32>
    %323 = arith.truncf %322 : vector<4x8x8xf32> to vector<4x8x8xbf16>
    %324 = arith.truncf %308 : vector<4x8x8xf32> to vector<4x8x8xbf16>
    "tpu.trace_start"() <{level = 10 : i32, message = "hqk,hke->hqe"}> : () -> ()
    %cst_194 = arith.constant dense<0.000000e+00> : vector<4x8x8xf32>
    %325 = tpu.matmul %323, %324, %cst_194 {dimension_numbers = #tpu.dot_dimension_numbers<[2], [1], [1], [2], [0, 0, 0, 1, 1, 2], [0], [0]>} : vector<4x8x8xbf16>, vector<4x8x8xbf16>, vector<4x8x8xf32> -> vector<4x8x8xf32>
    "tpu.trace_stop"() : () -> ()
    %326 = arith.truncf %325 : vector<4x8x8xf32> to vector<4x8x8xbf16>
    "tpu.trace_start"() <{level = 10 : i32, message = "hqe,hed->hqd"}> : () -> ()
    %cst_195 = arith.constant dense<0.000000e+00> : vector<4x8x32xf32>
    %327 = tpu.matmul %326, %32, %cst_195 {dimension_numbers = #tpu.dot_dimension_numbers<[2], [1], [1], [2], [0, 0, 0, 1, 1, 2], [0], [0]>} : vector<4x8x8xbf16>, vector<4x8x32xbf16>, vector<4x8x32xf32> -> vector<4x8x32xf32>
    "tpu.trace_stop"() : () -> ()
    %cst_196 = arith.constant dense<0.000000e+00> : vector<8x32xf32>
    %328 = vector.multi_reduction <add>, %327, %cst_196 [0] : vector<4x8x32xf32> to vector<8x32xf32>
    %329 = tpu.concatenate %295, %328 in 0 : vector<8x32xf32>, vector<8x32xf32> -> vector<16x32xf32>
    %330 = vector.broadcast %33 : vector<1x32xf32> to vector<16x32xf32>
    %331 = arith.addf %329, %330 : vector<16x32xf32>
    %332 = arith.addf %262, %331 : vector<16x32xf32>
    %cst_197 = arith.constant dense<0.000000e+00> : vector<16xf32>
    %333 = vector.multi_reduction <add>, %332, %cst_197 [1] : vector<16x32xf32> to vector<16xf32>
    %334 = vector.shape_cast %333 : vector<16xf32> to vector<16x1xf32>
    %cst_198 = arith.constant 3.200000e+01 : f32
    %335 = vector.broadcast %cst_198 : f32 to vector<16x1xf32>
    %336 = arith.divf %334, %335 : vector<16x1xf32>
    %337 = vector.broadcast %336 : vector<16x1xf32> to vector<16x32xf32>
    %338 = arith.subf %332, %337 : vector<16x32xf32>
    %339 = arith.mulf %338, %338 : vector<16x32xf32>
    %cst_199 = arith.constant dense<0.000000e+00> : vector<16xf32>
    %340 = vector.multi_reduction <add>, %339, %cst_199 [1] : vector<16x32xf32> to vector<16xf32>
    %341 = vector.shape_cast %340 : vector<16xf32> to vector<16x1xf32>
    %cst_200 = arith.constant 3.200000e+01 : f32
    %342 = vector.broadcast %cst_200 : f32 to vector<16x1xf32>
    %343 = arith.divf %341, %342 : vector<16x1xf32>
    %344 = vector.broadcast %336 : vector<16x1xf32> to vector<16x32xf32>
    %345 = arith.subf %332, %344 : vector<16x32xf32>
    %cst_201 = arith.constant 9.99999974E-6 : f32
    %346 = vector.broadcast %cst_201 : f32 to vector<16x1xf32>
    %347 = arith.addf %343, %346 : vector<16x1xf32>
    %348 = math.rsqrt %347 : vector<16x1xf32>
    %349 = vector.broadcast %348 : vector<16x1xf32> to vector<16x32xf32>
    %350 = arith.mulf %345, %349 : vector<16x32xf32>
    %351 = vector.broadcast %34 : vector<1x32xf32> to vector<16x32xf32>
    %352 = arith.mulf %350, %351 : vector<16x32xf32>
    %353 = vector.broadcast %35 : vector<1x32xf32> to vector<16x32xf32>
    %354 = arith.addf %352, %353 : vector<16x32xf32>
    %355 = arith.truncf %354 : vector<16x32xf32> to vector<16x32xbf16>
    %cst_202 = arith.constant dense<0.000000e+00> : vector<16x64xf32>
    %356 = tpu.matmul %355, %36, %cst_202 {dimension_numbers = #tpu.dot_dimension_numbers<[1], [0], [0], [1], [0, 0, 1, 1], [], []>} : vector<16x32xbf16>, vector<32x64xbf16>, vector<16x64xf32> -> vector<16x64xf32>
    %357 = vector.broadcast %37 : vector<1x64xf32> to vector<16x64xf32>
    %358 = arith.addf %356, %357 : vector<16x64xf32>
    %cst_203 = arith.constant 0.000000e+00 : f32
    %359 = vector.broadcast %cst_203 : f32 to vector<16x64xf32>
    %360 = arith.maximumf %358, %359 : vector<16x64xf32>
    %361 = arith.truncf %360 : vector<16x64xf32> to vector<16x64xbf16>
    %cst_204 = arith.constant dense<0.000000e+00> : vector<16x32xf32>
    %362 = tpu.matmul %361, %38, %cst_204 {dimension_numbers = #tpu.dot_dimension_numbers<[1], [0], [0], [1], [0, 0, 1, 1], [], []>} : vector<16x64xbf16>, vector<64x32xbf16>, vector<16x32xf32> -> vector<16x32xf32>
    %363 = vector.broadcast %39 : vector<1x32xf32> to vector<16x32xf32>
    %364 = arith.addf %362, %363 : vector<16x32xf32>
    %365 = arith.addf %354, %364 : vector<16x32xf32>
    %cst_205 = arith.constant dense<0.000000e+00> : vector<16xf32>
    %366 = vector.multi_reduction <add>, %365, %cst_205 [1] : vector<16x32xf32> to vector<16xf32>
    %367 = vector.shape_cast %366 : vector<16xf32> to vector<16x1xf32>
    %cst_206 = arith.constant 3.200000e+01 : f32
    %368 = vector.broadcast %cst_206 : f32 to vector<16x1xf32>
    %369 = arith.divf %367, %368 : vector<16x1xf32>
    %370 = vector.broadcast %369 : vector<16x1xf32> to vector<16x32xf32>
    %371 = arith.subf %365, %370 : vector<16x32xf32>
    %372 = arith.mulf %371, %371 : vector<16x32xf32>
    %cst_207 = arith.constant dense<0.000000e+00> : vector<16xf32>
    %373 = vector.multi_reduction <add>, %372, %cst_207 [1] : vector<16x32xf32> to vector<16xf32>
    %374 = vector.shape_cast %373 : vector<16xf32> to vector<16x1xf32>
    %cst_208 = arith.constant 3.200000e+01 : f32
    %375 = vector.broadcast %cst_208 : f32 to vector<16x1xf32>
    %376 = arith.divf %374, %375 : vector<16x1xf32>
    %377 = vector.broadcast %369 : vector<16x1xf32> to vector<16x32xf32>
    %378 = arith.subf %365, %377 : vector<16x32xf32>
    %cst_209 = arith.constant 9.99999974E-6 : f32
    %379 = vector.broadcast %cst_209 : f32 to vector<16x1xf32>
    %380 = arith.addf %376, %379 : vector<16x1xf32>
    %381 = math.rsqrt %380 : vector<16x1xf32>
    %382 = vector.broadcast %381 : vector<16x1xf32> to vector<16x32xf32>
    %383 = arith.mulf %378, %382 : vector<16x32xf32>
    %384 = vector.broadcast %40 : vector<1x32xf32> to vector<16x32xf32>
    %385 = arith.mulf %383, %384 : vector<16x32xf32>
    %386 = vector.broadcast %41 : vector<1x32xf32> to vector<16x32xf32>
    %387 = arith.addf %385, %386 : vector<16x32xf32>
    %388 = vector.shape_cast %387 : vector<16x32xf32> to vector<2x8x32xf32>
    %cst_210 = arith.constant dense<0.000000e+00> : vector<2x32xf32>
    %389 = vector.multi_reduction <add>, %388, %cst_210 [1] : vector<2x8x32xf32> to vector<2x32xf32>
    %cst_211 = arith.constant 8.000000e+00 : f32
    %390 = vector.broadcast %cst_211 : f32 to vector<2x32xf32>
    %391 = arith.divf %389, %390 : vector<2x32xf32>
    %392 = arith.truncf %391 : vector<2x32xf32> to vector<2x32xbf16>
    %cst_212 = arith.constant dense<0.000000e+00> : vector<2x64xf32>
    %393 = tpu.matmul %392, %42, %cst_212 {dimension_numbers = #tpu.dot_dimension_numbers<[1], [0], [0], [1], [0, 0, 1, 1], [], []>} : vector<2x32xbf16>, vector<32x64xbf16>, vector<2x64xf32> -> vector<2x64xf32>
    %394 = vector.broadcast %43 : vector<1x64xf32> to vector<2x64xf32>
    %395 = arith.addf %393, %394 : vector<2x64xf32>
    %396 = arith.mulf %395, %395 : vector<2x64xf32>
    %397 = arith.mulf %395, %396 : vector<2x64xf32>
    %cst_213 = arith.constant 4.471500e-02 : f32
    %398 = vector.broadcast %cst_213 : f32 to vector<2x64xf32>
    %399 = arith.mulf %398, %397 : vector<2x64xf32>
    %400 = arith.addf %395, %399 : vector<2x64xf32>
    %cst_214 = arith.constant 0.797884583 : f32
    %401 = vector.broadcast %cst_214 : f32 to vector<2x64xf32>
    %402 = arith.mulf %401, %400 : vector<2x64xf32>
    %403 = math.tanh %402 : vector<2x64xf32>
    %cst_215 = arith.constant 1.000000e+00 : f32
    %404 = vector.broadcast %cst_215 : f32 to vector<2x64xf32>
    %405 = arith.addf %404, %403 : vector<2x64xf32>
    %cst_216 = arith.constant 5.000000e-01 : f32
    %406 = vector.broadcast %cst_216 : f32 to vector<2x64xf32>
    %407 = arith.mulf %406, %405 : vector<2x64xf32>
    %408 = arith.mulf %395, %407 : vector<2x64xf32>
    %409 = arith.truncf %408 : vector<2x64xf32> to vector<2x64xbf16>
    %cst_217 = arith.constant dense<0.000000e+00> : vector<2x260xf32>
    %410 = tpu.matmul %409, %44, %cst_217 {dimension_numbers = #tpu.dot_dimension_numbers<[1], [0], [0], [1], [0, 0, 1, 1], [], []>} : vector<2x64xbf16>, vector<64x260xbf16>, vector<2x260xf32> -> vector<2x260xf32>
    %411 = vector.broadcast %45 : vector<1x260xf32> to vector<2x260xf32>
    %412 = arith.addf %410, %411 : vector<2x260xf32>
    %cst_218 = arith.constant dense<0.000000e+00> : vector<2x5xf32>
    %413 = tpu.matmul %412, %48, %cst_218 {dimension_numbers = #tpu.dot_dimension_numbers<[1], [0], [0], [1], [0, 0, 1, 1], [], []>} : vector<2x260xf32>, vector<260x5xf32>, vector<2x5xf32> -> vector<2x5xf32>
    %414 = vector.broadcast %50 : vector<1x5xf32> to vector<2x5xf32>
    %415 = arith.divf %413, %414 : vector<2x5xf32>
    %cst_219 = arith.constant dense<0.000000e+00> : vector<2x260xf32>
    %416 = tpu.matmul %415, %49, %cst_219 {dimension_numbers = #tpu.dot_dimension_numbers<[1], [0], [0], [1], [0, 0, 1, 1], [], []>} : vector<2x5xf32>, vector<5x260xf32>, vector<2x260xf32> -> vector<2x260xf32>
    %417 = arith.subf %412, %416 : vector<2x260xf32>
    %418 = arith.mulf %417, %417 : vector<2x260xf32>
    %cst_220 = arith.constant dense<0.000000e+00> : vector<2x5xf32>
    %419 = tpu.matmul %418, %48, %cst_220 {dimension_numbers = #tpu.dot_dimension_numbers<[1], [0], [0], [1], [0, 0, 1, 1], [], []>} : vector<2x260xf32>, vector<260x5xf32>, vector<2x5xf32> -> vector<2x5xf32>
    %420 = vector.broadcast %50 : vector<1x5xf32> to vector<2x5xf32>
    %421 = arith.divf %419, %420 : vector<2x5xf32>
    %cst_221 = arith.constant dense<0.000000e+00> : vector<2x260xf32>
    %422 = tpu.matmul %421, %49, %cst_221 {dimension_numbers = #tpu.dot_dimension_numbers<[1], [0], [0], [1], [0, 0, 1, 1], [], []>} : vector<2x5xf32>, vector<5x260xf32>, vector<2x260xf32> -> vector<2x260xf32>
    %cst_222 = arith.constant 9.99999974E-6 : f32
    %423 = vector.broadcast %cst_222 : f32 to vector<2x260xf32>
    %424 = arith.addf %422, %423 : vector<2x260xf32>
    %425 = math.rsqrt %424 : vector<2x260xf32>
    %426 = arith.mulf %417, %425 : vector<2x260xf32>
    %427 = vector.broadcast %46 : vector<1x260xf32> to vector<2x260xf32>
    %428 = arith.mulf %426, %427 : vector<2x260xf32>
    %429 = vector.broadcast %47 : vector<1x260xf32> to vector<2x260xf32>
    %430 = arith.addf %428, %429 : vector<2x260xf32>
    %431 = arith.mulf %430, %430 : vector<2x260xf32>
    %432 = arith.mulf %430, %431 : vector<2x260xf32>
    %cst_223 = arith.constant 4.471500e-02 : f32
    %433 = vector.broadcast %cst_223 : f32 to vector<2x260xf32>
    %434 = arith.mulf %433, %432 : vector<2x260xf32>
    %435 = arith.addf %430, %434 : vector<2x260xf32>
    %cst_224 = arith.constant 0.797884583 : f32
    %436 = vector.broadcast %cst_224 : f32 to vector<2x260xf32>
    %437 = arith.mulf %436, %435 : vector<2x260xf32>
    %438 = math.tanh %437 : vector<2x260xf32>
    %cst_225 = arith.constant 1.000000e+00 : f32
    %439 = vector.broadcast %cst_225 : f32 to vector<2x260xf32>
    %440 = arith.addf %439, %438 : vector<2x260xf32>
    %cst_226 = arith.constant 5.000000e-01 : f32
    %441 = vector.broadcast %cst_226 : f32 to vector<2x260xf32>
    %442 = arith.mulf %441, %440 : vector<2x260xf32>
    %443 = arith.mulf %430, %442 : vector<2x260xf32>
    %444 = arith.truncf %443 : vector<2x260xf32> to vector<2x260xbf16>
    %cst_227 = arith.constant dense<0.000000e+00> : vector<2x129xf32>
    %445 = tpu.matmul %444, %51, %cst_227 {dimension_numbers = #tpu.dot_dimension_numbers<[1], [0], [0], [1], [0, 0, 1, 1], [], []>} : vector<2x260xbf16>, vector<260x129xbf16>, vector<2x129xf32> -> vector<2x129xf32>
    %446 = vector.broadcast %52 : vector<1x129xf32> to vector<2x129xf32>
    %447 = arith.addf %445, %446 : vector<2x129xf32>
    %448 = arith.mulf %447, %447 : vector<2x129xf32>
    %449 = arith.mulf %447, %448 : vector<2x129xf32>
    %cst_228 = arith.constant 4.471500e-02 : f32
    %450 = vector.broadcast %cst_228 : f32 to vector<2x129xf32>
    %451 = arith.mulf %450, %449 : vector<2x129xf32>
    %452 = arith.addf %447, %451 : vector<2x129xf32>
    %cst_229 = arith.constant 0.797884583 : f32
    %453 = vector.broadcast %cst_229 : f32 to vector<2x129xf32>
    %454 = arith.mulf %453, %452 : vector<2x129xf32>
    %455 = math.tanh %454 : vector<2x129xf32>
    %cst_230 = arith.constant 1.000000e+00 : f32
    %456 = vector.broadcast %cst_230 : f32 to vector<2x129xf32>
    %457 = arith.addf %456, %455 : vector<2x129xf32>
    %cst_231 = arith.constant 5.000000e-01 : f32
    %458 = vector.broadcast %cst_231 : f32 to vector<2x129xf32>
    %459 = arith.mulf %458, %457 : vector<2x129xf32>
    %460 = arith.mulf %447, %459 : vector<2x129xf32>
    %461 = arith.truncf %460 : vector<2x129xf32> to vector<2x129xbf16>
    %cst_232 = arith.constant dense<0.000000e+00> : vector<2x15xf32>
    %462 = tpu.matmul %461, %53, %cst_232 {dimension_numbers = #tpu.dot_dimension_numbers<[1], [0], [0], [1], [0, 0, 1, 1], [], []>} : vector<2x129xbf16>, vector<129x15xbf16>, vector<2x15xf32> -> vector<2x15xf32>
    %463 = vector.broadcast %54 : vector<1x15xf32> to vector<2x15xf32>
    %464 = arith.addf %462, %463 : vector<2x15xf32>
    %c0_233 = arith.constant 0 : index
    %c0_234 = arith.constant 0 : index
    %465 = vector.load %arg55[%c0_233, %c0_234] : memref<2x15xf32, #tpu.memory_space<vmem>>, vector<2x15xf32>
    tpu.vector_store %arg55[%c0_233, %c0_234], %464 {strides = array<i32>} : memref<2x15xf32, #tpu.memory_space<vmem>>, vector<2x15xf32>,
    return
  }
}

</mosaic_0001>

<bundles_post_ra>
// kernel: forward.1
= control target key start
LH: loop header
LB: loop body
LE: loop exit
PB: predicated region body
PF: predicated region fallthrough
CT: control target
= control target key end

     0   :  { %v9248_v0 = vmov 0.0   ;;  %s9249_s3 = smov 1   ;;  %vm9250_vm0 = vmmov 0   ;;  %vm522_vm1 = vcmask 130048   ;;  %s9251_s10 = smov 2   ;;  %vm638_vm6 = vcmask 261120   ;;  %s10961_s0 = inlined_call_operand.smem [shape: u32[56], index: -1, kind: input, shape index: {}] }
   0x1   :  { %8164 = vmatprep.subr.bf16.mxu0 %v9248_v0  ;;  %s7473_s6 = sld [smem:[%s10961_s0 + %s9249_s3]]   ;;  %8166 = vmatprep.mubr.msk.bf16.mxu0 %vm9250_vm0, %v9248_v0  ;;  %s9252_s14 = smov 6   ;;  %vm1515_vm7 = vcmask 64512   ;;  %vm1759_vm8 = vcmask 1043456   ;;  %vm3383_vm9 = vcmask 523264   ;;  %vm6162_vm10 = vcmask 1041409  }
   0x2   :  { %s1_s9 = sld [smem:[%s10961_s0]]   ;;  %8186 = vmatprep.subr.bf16.mxu1 %v9248_v0  ;;  %8190 = vmatprep.mubr.msk.bf16.mxu1 %vm9250_vm0, %v9248_v0  ;;  %s9253_s18 = smov 3   ;;  %vm6394_vm11 = vcmask 31744   ;;  %vm6553_vm12 = vcmask 1044480   ;;  %vm6549_vm13 = vcmask 39936   ;;  %vm7251_vm14 = vcmask 1041408  }
   0x3   :  { %s7474_s13 = sld [smem:[%s10961_s0 + %s9251_s10]]   ;;  %s9254_s22 = smov 4   ;;  %vm7421_vm15 = vcmask 1040384  }
   0x4   :  { %s7478_s17 = sld [smem:[%s10961_s0 + %s9252_s14]]   ;;  %s9255_s26 = smov 5  }
   0x5   :  { %s7475_s21 = sld [smem:[%s10961_s0 + %s9253_s18]]   ;;  %s9256_s30 = smov 7  }
   0x6   :  { %s7476_s25 = sld [smem:[%s10961_s0 + %s9254_s22]]   ;;  %s9257_s4 = smov 10  }
   0x7   :  { %v8988_v1 = vld [vmem:[%s7473_s6] sm:$0xff]   ;;  %s7477_s29 = sld [smem:[%s10961_s0 + %s9255_s26]]   ;;  %s9258_s8 = smov 11  }
   0x8   :  { %v227_v2 = vld [vmem:[%s1_s9] sm:$0xff]  ;;  %v228_v3 = vld [vmem:[%s1_s9 + $0x8] sm:$0xff]  ;;  %8165 = vmatpush3.bf16.msra.mxu0 %v8988_v1  ;;  %s7479_s3 = sld [smem:[%s10961_s0 + %s9256_s30]]   ;;  %s9259_s12 = smov 12  }
   0x9   :  { %v523_v4 = vsel %vm522_vm1, %v227_v2, 0.0  ;;  %v530_v5 = vsel %vm522_vm1, %v228_v3, 0.0  ;;  %8170 = vmatprep.subr.bf16.mxu0 %v9248_v0  ;;  %v7528_v57 = vld [vmem:[%s7474_s13] ss:$0 sm:$0xff]  ;;  %s9365_s7 = sld [smem:[%s10961_s0 + %s9257_s4]]   ;;  %s9260_s16 = smov 8  }
   0xa   :  { %v524_v6 = vrot.slane %v523_v4, 4  ;;  %v531_v7 = vrot.slane %v530_v5, 4  ;;  %s9390_s11 = sld [smem:[%s10961_s0 + %s9258_s8]]   ;;  %s9261_s20 = smov 9  }
   0xb   :  { %s9395_s15 = sld [smem:[%s10961_s0 + %s9259_s12]]   ;;  %s9262_s24 = smov 14  }
   0xc   :  { %v525_v8 = vadd.f32 %v524_v6, %v523_v4  ;;  %v532_v9 = vadd.f32 %v531_v7, %v530_v5  ;;  %s7480_s19 = sld [smem:[%s10961_s0 + %s9260_s16]]   ;;  %s9263_s28 = smov 13  }
   0xd   :  { %s7481_s23 = sld [smem:[%s10961_s0 + %s9261_s20]]   ;;  %s9264_s2 = smov 15  }
   0xe   :  { %v526_v10 = vrot.slane %v525_v8, 2  ;;  %v533_v11 = vrot.slane %v532_v9, 2  ;;  %s9566_s27 = sld [smem:[%s10961_s0 + %s9262_s24]]   ;;  %s9265_s6 = smov 16  }
   0xf   :  { %s9575_s1 = sld [smem:[%s10961_s0 + %s9263_s28]]   ;;  %s9266_s10 = smov 17  }
  0x10   :  { %v527_v12 = vadd.f32 %v526_v10, %v525_v8  ;;  %v534_v13 = vadd.f32 %v533_v11, %v532_v9  ;;  %s9602_s5 = sld [smem:[%s10961_s0 + %s9264_s2]]   ;;  %s9267_s14 = smov 20  }
  0x11   :  { %s7488_s9 = sld [smem:[%s10961_s0 + %s9265_s6]]   ;;  %s9268_s18 = smov 22  }
  0x12   :  { %v528_v14 = vrot.slane %v527_v12, 1  ;;  %v535_v15 = vrot.slane %v534_v13, 1  ;;  %s7489_s13 = sld [smem:[%s10961_s0 + %s9266_s10]]   ;;  %s9269_s22 = smov 18  }
  0x13   :  { %s9270_s26 = smov 19   ;;  %s9271_s30 = smov 21  }
  0x14   :  { %v529_v16 = vadd.f32 %v528_v14, %v527_v12  ;;  %v536_v17 = vadd.f32 %v535_v15, %v534_v13  ;;  %v8989_v13 = vld [vmem:[%s7478_s17 + $0x8] sm:$0xff]   ;;  %v8990_v14 = vld [vmem:[%s7478_s17] sm:$0xff]   ;;  %s7492_s17 = sld [smem:[%s10961_s0 + %s9267_s14]]   ;;  %s9272_s4 = smov 23  }
  0x15   :  { %s9273_s8 = smov 26   ;;  %s9274_s12 = smov 27  }
  0x16   :  { %v538_v18 = vmul.f32 0.125, %v529_v16  ;;  %v539_v19 = vmul.f32 0.125, %v536_v17  ;;  %s9275_s16 = smov 28   ;;  %s9276_s20 = smov 24  }
  0x17   :  { %s9277_s24 = smov 25   ;;  %s9278_s28 = smov 30  }
  0x18   :  { %v540_v20 = vsub.f32 %v227_v2, %v538_v18  ;;  %v541_v21 = vsub.f32 %v228_v3, %v539_v19  ;;  %s9279_s2 = smov 29   ;;  %s9280_s6 = smov 31  }
  0x19   :  { %s9281_s10 = smov 32   ;;  %s9282_s14 = smov 33  }
  0x1a   :  { %v542_v22 = vmul.f32 %v540_v20, %v540_v20  ;;  %v543_v23 = vmul.f32 %v541_v21, %v541_v21 }
  0x1c   :  { %v544_v24 = vsel %vm522_vm1, %v542_v22, 0.0  ;;  %v551_v25 = vsel %vm522_vm1, %v543_v23, 0.0  ;;  %v7531_v22 = vld [vmem:[%s7475_s21] ss:$0 sm:$0xff]  ;;  %s9951_s21 = sld [smem:[%s10961_s0 + %s9268_s18]]   ;;  %s9283_s18 = smov 36  }
  0x1d   :  { %v545_v26 = vrot.slane %v544_v24, 4  ;;  %v552_v27 = vrot.slane %v551_v25, 4 }
  0x1f   :  { %v546_v28 = vadd.f32 %v545_v26, %v544_v24  ;;  %v553_v29 = vadd.f32 %v552_v27, %v551_v25  ;;  %v7532_v26 = vld [vmem:[%s7476_s25] ss:$0 sm:$0xff]  ;;  %s7490_s25 = sld [smem:[%s10961_s0 + %s9269_s22]]   ;;  %s9284_s22 = smov 38  }
  0x21   :  { %v547_v30 = vrot.slane %v546_v28, 2  ;;  %v554_v31 = vrot.slane %v553_v29, 2 }
  0x23   :  { %v548_v32 = vadd.f32 %v547_v30, %v546_v28  ;;  %v555_v33 = vadd.f32 %v554_v31, %v553_v29  ;;  %v234_v30 = vld [vmem:[%s7477_s29] sm:$0xff]  ;;  %v235_v31 = vld [vmem:[%s7477_s29 + $0x8] sm:$0xff]  ;;  %s7491_s29 = sld [smem:[%s10961_s0 + %s9270_s26]]   ;;  %s9285_s26 = smov 34  }
  0x25   :  { %v549_v34 = vrot.slane %v548_v32, 1  ;;  %v556_v35 = vrot.slane %v555_v33, 1 }
  0x27   :  { %v550_v36 = vadd.f32 %v549_v34, %v548_v32  ;;  %v557_v37 = vadd.f32 %v556_v35, %v555_v33 }
  0x29   :  { %v559_v38 = vmul.f32 0.14285715, %v550_v36  ;;  %v560_v39 = vmul.f32 0.14285715, %v557_v37  ;;  %v7533_v36 = vld [vmem:[%s7479_s3] ss:$0 sm:$0xff]  ;;  %s7493_s3 = sld [smem:[%s10961_s0 + %s9271_s30]]  }
  0x2a   :  { %s9286_s30 = smov 35  }
  0x2b   :  { %9128 = vrsqrt.f32 %v559_v38  ;;  %vm563_vm2 = vcmp.eq.f32.partialorder %v559_v38, inf  ;;  %v566_v41 = vand.u32 2147483648, %v559_v38  ;;  %vm565_vm3 = vcmp.eq.f32.partialorder %v559_v38, 0.0 }
  0x2c   :  { %9130 = vrsqrt.f32 %v560_v39  ;;  %vm570_vm4 = vcmp.eq.f32.partialorder %v560_v39, inf  ;;  %v573_v44 = vand.u32 2147483648, %v560_v39  ;;  %vm572_vm5 = vcmp.eq.f32.partialorder %v560_v39, 0.0 }
  0x38   :  { %v9129_v40 = vpop.eup %9128 }
  0x39   :  { %v9131_v42 = vpop.eup %9130  ;;  %v562_v43 = vmul.f32 %v9129_v40, %v559_v38 }
  0x3a   :  { %v569_v45 = vmul.f32 %v9131_v42, %v560_v39 }
  0x3b   :  { %v564_v46 = vsel %vm563_vm2, %v559_v38, %v562_v43 }
  0x3c   :  { %v567_v47 = vsel %vm565_vm3, %v566_v41, %v564_v46  ;;  %v571_v48 = vsel %vm570_vm4, %v560_v39, %v569_v45 }
  0x3d   :  { %v574_v49 = vsel %vm572_vm5, %v573_v44, %v571_v48  ;;  %v575_v50 = vadd.f32 1e-08, %v567_v47 }
  0x3e   :  { %v576_v51 = vadd.f32 1e-08, %v574_v49  ;;  %v9368_v49 = vld [vmem:[%s9365_s7 + $0x8] sm:$0xff]  }
  0x3f   :  { %9132 = vrcp.f32 %v575_v50  ;;  %v9371_v50 = vld [vmem:[%s9365_s7 + $0x18] sm:$0xff]  }
  0x40   :  { %9134 = vrcp.f32 %v576_v51  ;;  %8187 = vmatpush3.bf16.msra.mxu1 %v9371_v50  ;;  %v9378_v51 = vld [vmem:[%s9365_s7] sm:$0xff]  }
  0x41   :  { %8188 = vmatprep.subr.bf16.mxu1 %v9248_v0 }
  0x4c   :  { %v9133_v52 = vpop.eup %9132 }
  0x4d   :  { %v9135_v53 = vpop.eup %9134  ;;  %v578_v54 = vmul.f32 %v9133_v52, %v540_v20  ;;  %v9381_v52 = vld [vmem:[%s9365_s7 + $0x10] sm:$0xff]  }
  0x4e   :  { %v580_v55 = vmul.f32 %v9135_v53, %v541_v21  ;;  %8189 = vmatpush3.bf16.msra.mxu1 %v9381_v52 }
  0x4f   :  { %8202 = vmatprep.subr.bf16.mxu1 %v9248_v0 }
  0x50   :  { %v581_v56 = vpack.c.bf16 %v580_v55, %v578_v54 }
  0x52   :  { %8167 = vmatmul.mubr.msk.bf16.vlgmr.msra.gmra.mxu0 %vm522_vm1, %v581_v56  ;;  %vm7467_vm1 = vcmask 115712  }
  0x53   :  { %8174 = vmatprep.mubr.msk.bf16.mxu0 %vm9250_vm0, %v9248_v0  ;;  %8171 = vmatpush3.bf16.msra.mxu0 %v8989_v13  ;;  %v9442_v13 = vld [vmem:[%s9390_s11 + $0x8] sm:$0xff]  }
  0x54   :  { %8172 = vmatprep.subr.bf16.mxu0 %v9248_v0 }
  0x57   :  { %8173 = vmatpush3.bf16.msra.mxu0 %v8990_v14  ;;  %v9445_v14 = vld [vmem:[%s9390_s11 + $0x18] sm:$0xff]  }
  0x58   :  { %8178 = vmatprep.subr.bf16.mxu0 %v9248_v0 }
 0x112   :  { %v631_v58 = vpop.f32.mrf.mxu0 }
 0x113   :  { %v632_v59 = vadd.f32 %v7528_v57, %v631_v58 }
 0x114   :  { %v8168_v60 = vpop.f32.mrf.mxu0 }
 0x115   :  { %v639_v61 = vsel %vm638_vm6, %v632_v59, 0.0 }
 0x116   :  { %640 = vadd.xlane.f32.xlu0 %v639_v61  ;;  %v634_v62 = vpop.f32.mrf.mxu0 }
 0x117   :  { %v635_v63 = vadd.f32 %v7528_v57, %v634_v62  ;;  %v9403_v57 = vld [vmem:[%s7480_s19] ss:$0 sm:$0xff]  ;;  %s10020_s19 = sld [smem:[%s10961_s0 + %s9275_s16]]   ;;  %s9290_s16 = smov 40  }
 0x118   :  { %v8169_v1 = vpop.f32.mrf.mxu0 }
 0x119   :  { %v642_v2 = vsel %vm638_vm6, %v635_v63, 0.0 }
 0x11a   :  { %643 = vadd.xlane.f32.xlu0 %v642_v2 }
 0x19f   :  { %v641_v3 = vpop.xlane.xlu0 %640 }
 0x1a0   :  { %v646_v4 = vmul.f32 0.03125, %v641_v3 }
 0x1a2   :  { %v648_v5 = vsub.f32 %v632_v59, %v646_v4  ;;  %v9405_v59 = vld [vmem:[%s7481_s23] ss:$0 sm:$0xff]  ;;  %s7496_s23 = sld [smem:[%s10961_s0 + %s9276_s20]]   ;;  %s9291_s20 = smov 41  }
 0x1a3   :  { %v644_v6 = vpop.xlane.xlu0 %643 }
 0x1a4   :  { %v647_v7 = vmul.f32 0.03125, %v644_v6  ;;  %v650_v8 = vmul.f32 %v648_v5, %v648_v5 }
 0x1a6   :  { %v649_v9 = vsub.f32 %v635_v63, %v647_v7  ;;  %v652_v10 = vsel %vm638_vm6, %v650_v8, 0.0  ;;  %v9412_v8 = vld [vmem:[%s9365_s7 + $0x28] sm:$0xff]  }
 0x1a7   :  { %653 = vadd.xlane.f32.xlu1 %v652_v10 }
 0x1a8   :  { %v651_v11 = vmul.f32 %v649_v9, %v649_v9 }
 0x1aa   :  { %v655_v12 = vsel %vm638_vm6, %v651_v11, 0.0  ;;  %v9428_v11 = vld [vmem:[%s9365_s7 + $0x20] sm:$0xff]  }
 0x1ab   :  { %656 = vadd.xlane.f32.xlu1 %v655_v12  ;;  %v9431_v12 = vld [vmem:[%s9365_s7 + $0x30] sm:$0xff]  }
 0x230   :  { %v654_v15 = vpop.xlane.xlu1 %653 }
 0x231   :  { %v658_v16 = vmul.f32 0.03125, %v654_v15  ;;  %v9456_v15 = vld [vmem:[%s9390_s11] sm:$0xff]  }
 0x233   :  { %v660_v17 = vadd.f32 1e-05, %v658_v16  ;;  %v9459_v16 = vld [vmem:[%s9390_s11 + $0x10] sm:$0xff]  }
 0x234   :  { %v657_v18 = vpop.xlane.xlu1 %656 }
 0x235   :  { %9136 = vrsqrt.f32 %v660_v17  ;;  %v659_v19 = vmul.f32 0.03125, %v657_v18  ;;  %v9470_v17 = vld [vmem:[%s9390_s11 + $0x28] sm:$0xff]   ;;  %v9473_v18 = vld [vmem:[%s9390_s11 + $0x38] sm:$0xff]  }
 0x237   :  { %v661_v20 = vadd.f32 1e-05, %v659_v19  ;;  %v9484_v19 = vld [vmem:[%s9390_s11 + $0x20] sm:$0xff]  }
 0x239   :  { %9138 = vrsqrt.f32 %v661_v20  ;;  %v9487_v20 = vld [vmem:[%s9390_s11 + $0x30] sm:$0xff]   ;;  %s9990_s11 = sld [smem:[%s10961_s0 + %s9273_s8]]   ;;  %s9288_s8 = smov 39  }
 0x242   :  { %v9137_v21 = vpop.eup %9136 }
 0x243   :  { %v664_v23 = vmul.f32 %v9137_v21, %v648_v5  ;;  %v9498_v21 = vld [vmem:[%s9395_s15 + $0x8] sm:$0xff]  }
 0x245   :  { %v672_v24 = vmul.f32 %v7531_v22, %v664_v23  ;;  %v9512_v23 = vld [vmem:[%s9395_s15] sm:$0xff]  }
 0x246   :  { %v9139_v25 = vpop.eup %9138 }
 0x247   :  { %v665_v27 = vmul.f32 %v9139_v25, %v649_v9  ;;  %v680_v29 = vadd.f32 %v7532_v26, %v672_v24  ;;  %v9415_v9 = vld [vmem:[%s9365_s7 + $0x38] sm:$0xff]   ;;  %v9515_v24 = vld [vmem:[%s9395_s15 + $0x10] sm:$0xff]   ;;  %v9526_v25 = vld [vmem:[%s9395_s15 + $0x28] sm:$0xff]   ;;  %s7495_s7 = sld [smem:[%s10961_s0 + %s9272_s4]]   ;;  %s9287_s4 = smov 37  }
 0x249   :  { %v673_v28 = vmul.f32 %v7531_v22, %v665_v27  ;;  %v682_v33 = vadd.f32 %v680_v29, %v234_v30  ;;  %v9501_v22 = vld [vmem:[%s9395_s15 + $0x18] sm:$0xff]   ;;  %v9540_v27 = vld [vmem:[%s9395_s15 + $0x20] sm:$0xff]  }
 0x24b   :  { %v681_v32 = vadd.f32 %v7532_v26, %v673_v28  ;;  %v9529_v26 = vld [vmem:[%s9395_s15 + $0x38] sm:$0xff]   ;;  %v9543_v28 = vld [vmem:[%s9395_s15 + $0x30] sm:$0xff]   ;;  %s10002_s15 = sld [smem:[%s10961_s0 + %s9274_s12]]   ;;  %s9289_s12 = smov 42  }
 0x24d   :  { %v683_v34 = vadd.f32 %v681_v32, %v235_v31 }
 0x24f   :  { %v684_v35 = vpack.c.bf16 %v683_v34, %v682_v33 }
 0x251   :  { %8175 = vmatmul.mubr.msk.bf16.vlgmr.msra.gmra.mxu0 %vm638_vm6, %v684_v35 }
 0x252   :  { %8182 = vmatprep.mubr.msk.bf16.mxu0 %vm9250_vm0, %v9248_v0  ;;  %8179 = vmatpush3.bf16.msra.mxu0 %v9368_v49 }
 0x253   :  { %8180 = vmatprep.subr.bf16.mxu0 %v9248_v0 }
 0x256   :  { %8181 = vmatpush3.bf16.msra.mxu0 %v9378_v51 }
 0x257   :  { %8194 = vmatprep.subr.bf16.mxu0 %v9248_v0 }
 0x311   :  { %v740_v37 = vpop.f32.mrf.mxu0 }
 0x312   :  { %v741_v38 = vadd.f32 %v7533_v36, %v740_v37 }
 0x313   :  { %v8176_v39 = vpop.f32.mrf.mxu0 }
 0x314   :  { %v747_v40 = vsel %vm638_vm6, %v741_v38, 0.0 }
 0x315   :  { %748 = vadd.xlane.f32.xlu0 %v747_v40  ;;  %v743_v41 = vpop.f32.mrf.mxu0 }
 0x316   :  { %v9359_v42 = vadd.f32 %v7533_v36, %v743_v41 }
 0x317   :  { %v8177_v43 = vpop.f32.mrf.mxu0 }
 0x39e   :  { %v749_v44 = vpop.xlane.xlu0 %748 }
 0x39f   :  { %v753_v45 = vmul.f32 0.03125, %v749_v44 }
 0x3a1   :  { %v755_v46 = vsub.f32 %v741_v38, %v753_v45 }
 0x3a3   :  { %v757_v47 = vmul.f32 %v755_v46, %v755_v46 }
 0x3a5   :  { %v759_v48 = vsel %vm638_vm6, %v757_v47, 0.0  ;;  %v9581_v47 = vld [vmem:[%s9566_s27 + $0x1] ss:$0 sm:$0xff] }
 0x3a6   :  { %760 = vadd.xlane.f32.xlu1 %v759_v48 }
 0x42f   :  { %v761_v53 = vpop.xlane.xlu1 %760 }
 0x430   :  { %v765_v54 = vmul.f32 0.03125, %v761_v53 }
 0x432   :  { %v767_v55 = vadd.f32 1e-05, %v765_v54 }
 0x434   :  { %9140 = vrsqrt.f32 %v767_v55 }
 0x441   :  { %v9141_v56 = vpop.eup %9140 }
 0x442   :  { %v771_v58 = vmul.f32 %v9141_v56, %v755_v46  ;;  %v9578_v46 = vld [vmem:[%s9566_s27] ss:$0 sm:$0xff] }
 0x444   :  { %v779_v60 = vmul.f32 %v9403_v57, %v771_v58 }
 0x446   :  { %v787_v61 = vadd.f32 %v9405_v59, %v779_v60 }
 0x448   :  { %v789_v62 = vmul.f32 %v787_v61, %v787_v61 }
 0x44a   :  { %v791_v63 = vmul.f32 %v789_v62, %v787_v61  ;;  %v9586_v62 = vld [vmem:[%s9575_s1] ss:$0 sm:$0xff] }
 0x44c   :  { %v793_v1 = vmul.f32 0.044715, %v791_v63  ;;  %v9589_v63 = vld [vmem:[%s9575_s1 + $0x1] ss:$0 sm:$0xff] }
 0x44e   :  { %v795_v2 = vadd.f32 %v793_v1, %v787_v61 }
 0x450   :  { %v797_v3 = vmul.f32 0.7978846, %v795_v2 }
 0x452   :  { %9142 = vtanh.f32 %v797_v3 }
 0x45f   :  { %v9143_v4 = vpop.eup %9142 }
 0x460   :  { %v801_v5 = vadd.f32 1.0, %v9143_v4 }
 0x462   :  { %v803_v6 = vmul.f32 0.5, %v801_v5 }
 0x464   :  { %v9409_v7 = vmul.f32 %v803_v6, %v787_v61 }
 0x466   :  { %v9419_v10 = vpack.c.bf16 %v9409_v7, %v9409_v7 }
 0x468   :  { %8183 = vmatmul.mubr.msk.bf16.vlgmr.msra.gmra.mxu0 %vm638_vm6, %v9419_v10  ;;  %8191 = vmatmul.mubr.msk.bf16.vlgmr.msra.gmra.mxu1 %vm638_vm6, %v9419_v10 }
 0x469   :  { %8195 = vmatpush3.bf16.msra.mxu0 %v9412_v8  ;;  %8203 = vmatpush3.bf16.msra.mxu1 %v9415_v9 }
 0x46a   :  { %8196 = vmatprep.subr.bf16.mxu0 %v9248_v0  ;;  %8204 = vmatprep.subr.bf16.mxu1 %v9248_v0 }
 0x46b   :  { %8198 = vmatprep.mubr.msk.bf16.mxu0 %vm9250_vm0, %v9248_v0  ;;  %8206 = vmatprep.mubr.msk.bf16.mxu1 %vm9250_vm0, %v9248_v0 }
 0x46d   :  { %8197 = vmatpush3.bf16.msra.mxu0 %v9428_v11  ;;  %8205 = vmatpush3.bf16.msra.mxu1 %v9431_v12 }
 0x46e   :  { %8210 = vmatprep.subr.bf16.mxu0 %v9248_v0  ;;  %8218 = vmatprep.subr.bf16.mxu1 %v9248_v0 }
 0x470   :  { %8199 = vmatmul.mubr.msk.bf16.vlgmr.msra.gmra.mxu0 %vm638_vm6, %v9419_v10  ;;  %8207 = vmatmul.mubr.msk.bf16.vlgmr.msra.gmra.mxu1 %vm638_vm6, %v9419_v10 }
 0x471   :  { %8211 = vmatpush3.bf16.msra.mxu0 %v9442_v13  ;;  %8219 = vmatpush3.bf16.msra.mxu1 %v9445_v14 }
 0x472   :  { %8212 = vmatprep.subr.bf16.mxu0 %v9248_v0  ;;  %8220 = vmatprep.subr.bf16.mxu1 %v9248_v0 }
 0x473   :  { %8214 = vmatprep.mubr.msk.bf16.mxu0 %vm9250_vm0, %v9248_v0  ;;  %8222 = vmatprep.mubr.msk.bf16.mxu1 %vm9250_vm0, %v9248_v0 }
 0x475   :  { %8213 = vmatpush3.bf16.msra.mxu0 %v9456_v15  ;;  %8221 = vmatpush3.bf16.msra.mxu1 %v9459_v16 }
 0x476   :  { %8226 = vmatprep.subr.bf16.mxu0 %v9248_v0  ;;  %8234 = vmatprep.subr.bf16.mxu1 %v9248_v0 }
 0x478   :  { %8215 = vmatmul.mubr.msk.bf16.vlgmr.msra.gmra.mxu0 %vm638_vm6, %v9419_v10  ;;  %8223 = vmatmul.mubr.msk.bf16.vlgmr.msra.gmra.mxu1 %vm638_vm6, %v9419_v10 }
 0x479   :  { %8227 = vmatpush3.bf16.msra.mxu0 %v9470_v17  ;;  %8235 = vmatpush3.bf16.msra.mxu1 %v9473_v18 }
 0x47a   :  { %8228 = vmatprep.subr.bf16.mxu0 %v9248_v0  ;;  %8236 = vmatprep.subr.bf16.mxu1 %v9248_v0 }
 0x47b   :  { %8230 = vmatprep.mubr.msk.bf16.mxu0 %vm9250_vm0, %v9248_v0  ;;  %8238 = vmatprep.mubr.msk.bf16.mxu1 %vm9250_vm0, %v9248_v0 }
 0x47d   :  { %8229 = vmatpush3.bf16.msra.mxu0 %v9484_v19  ;;  %8237 = vmatpush3.bf16.msra.mxu1 %v9487_v20 }
 0x47e   :  { %8242 = vmatprep.subr.bf16.mxu0 %v9248_v0  ;;  %8250 = vmatprep.subr.bf16.mxu1 %v9248_v0 }
 0x480   :  { %8231 = vmatmul.mubr.msk.bf16.vlgmr.msra.gmra.mxu0 %vm638_vm6, %v9419_v10  ;;  %8239 = vmatmul.mubr.msk.bf16.vlgmr.msra.gmra.mxu1 %vm638_vm6, %v9419_v10 }
 0x481   :  { %8243 = vmatpush3.bf16.msra.mxu0 %v9498_v21  ;;  %8251 = vmatpush3.bf16.msra.mxu1 %v9501_v22 }
 0x482   :  { %8244 = vmatprep.subr.bf16.mxu0 %v9248_v0  ;;  %8252 = vmatprep.subr.bf16.mxu1 %v9248_v0 }
 0x483   :  { %8246 = vmatprep.mubr.msk.bf16.mxu0 %vm9250_vm0, %v9248_v0  ;;  %8254 = vmatprep.mubr.msk.bf16.mxu1 %vm9250_vm0, %v9248_v0 }
 0x485   :  { %8245 = vmatpush3.bf16.msra.mxu0 %v9512_v23  ;;  %8253 = vmatpush3.bf16.msra.mxu1 %v9515_v24 }
 0x486   :  { %8258 = vmatprep.subr.bf16.mxu0 %v9248_v0  ;;  %8266 = vmatprep.subr.bf16.mxu1 %v9248_v0 }
 0x488   :  { %8247 = vmatmul.mubr.msk.bf16.vlgmr.msra.gmra.mxu0 %vm638_vm6, %v9419_v10  ;;  %8255 = vmatmul.mubr.msk.bf16.vlgmr.msra.gmra.mxu1 %vm638_vm6, %v9419_v10 }
 0x489   :  { %8259 = vmatpush3.bf16.msra.mxu0 %v9526_v25  ;;  %8267 = vmatpush3.bf16.msra.mxu1 %v9529_v26 }
 0x48a   :  { %8260 = vmatprep.subr.bf16.mxu0 %v9248_v0  ;;  %8268 = vmatprep.subr.bf16.mxu1 %v9248_v0 }
 0x48b   :  { %8262 = vmatprep.mubr.msk.bf16.mxu0 %vm9250_vm0, %v9248_v0  ;;  %8270 = vmatprep.mubr.msk.bf16.mxu1 %vm9250_vm0, %v9248_v0 }
 0x48d   :  { %8261 = vmatpush3.bf16.msra.mxu0 %v9540_v27  ;;  %8269 = vmatpush3.bf16.msra.mxu1 %v9543_v28 }
 0x48e   :  { %8274 = vmatprep.subr.bf16.mxu0 %v9248_v0  ;;  %8280 = vmatprep.subr.bf16.mxu1 %v9248_v0 }
 0x490   :  { %8263 = vmatmul.mubr.msk.bf16.vlgmr.msra.gmra.mxu0 %vm638_vm6, %v9419_v10  ;;  %8271 = vmatmul.mubr.msk.bf16.vlgmr.msra.gmra.mxu1 %vm638_vm6, %v9419_v10  ;;  %v9594_v10 = vld [vmem:[%s9566_s27 + $0x2] ss:$0 sm:$0xff] }
 0x491   :  { %8276 = vmatprep.mubr.msk.bf16.mxu0 %vm9250_vm0, %v9248_v0  ;;  %8282 = vmatprep.mubr.msk.bf16.mxu1 %vm9250_vm0, %v9248_v0 }
 0x528   :  { %v881_v29 = vpop.f32.mrf.mxu0  ;;  %v933_v30 = vpop.f32.mrf.mxu1 }
 0x52a   :  { %v8184_v31 = vpop.f32.mrf.mxu0  ;;  %v8192_v32 = vpop.f32.mrf.mxu1 }
 0x52b   :  { %v9597_v31 = vld [vmem:[%s9566_s27 + $0x3] ss:$0 sm:$0xff]  ;;  %v882_v32 = vadd.f32 %v9586_v62, %v881_v29  ;;  %s7497_s27 = sld [smem:[%s10961_s0 + %s9277_s24]]   ;;  %s9292_s24 = smov 44  }
 0x52c   :  { %v884_v33 = vpop.f32.mrf.mxu0  ;;  %v936_v34 = vpop.f32.mrf.mxu1 }
 0x52d   :  { %v934_v33 = vadd.f32 %v9589_v63, %v933_v30  ;;  %v9614_v30 = vld [vmem:[%s9575_s1 + $0x3] ss:$0 sm:$0xff] }
 0x52e   :  { %v8185_v35 = vpop.f32.mrf.mxu0  ;;  %v8193_v36 = vpop.f32.mrf.mxu1 }
 0x530   :  { %v9568_v37 = vpop.f32.mrf.mxu0  ;;  %v9570_v38 = vpop.f32.mrf.mxu1 }
 0x532   :  { %v8200_v39 = vpop.f32.mrf.mxu0  ;;  %v8208_v40 = vpop.f32.mrf.mxu1 }
 0x534   :  { %v988_v41 = vpop.f32.mrf.mxu0  ;;  %v1040_v43 = vpop.f32.mrf.mxu1 }
 0x535   :  { %v1507_v43 = vpack.c.bf16 %v882_v32, %v882_v32 }
 0x536   :  { %v8201_v44 = vpop.f32.mrf.mxu0  ;;  %v8209_v45 = vpop.f32.mrf.mxu1 }
 0x537   :  { %v1508_v44 = vpack.c.bf16 %v934_v33, %v934_v33 }
 0x538   :  { %v1113_v48 = vpop.f32.mrf.mxu0  ;;  %v1165_v53 = vpop.f32.mrf.mxu1 }
 0x539   :  { %v1114_v54 = vadd.f32 %v9578_v46, %v1113_v48  ;;  %v1166_v55 = vadd.f32 %v9581_v47, %v1165_v53  ;;  %v9611_v48 = vld [vmem:[%s9575_s1 + $0x2] ss:$0 sm:$0xff]  ;;  %s10191_s1 = sld [smem:[%s10961_s0 + %s9278_s28]]   ;;  %s9294_s28 = smov 48  }
 0x53a   :  { %v8216_v56 = vpop.f32.mrf.mxu0  ;;  %v8224_v58 = vpop.f32.mrf.mxu1 }
 0x53b   :  { %v1511_v60 = vpack.c.bf16 %v1114_v54, %v1114_v54  ;;  %v1512_v61 = vpack.c.bf16 %v1166_v55, %v1166_v55 }
 0x53c   :  { %v1116_v1 = vpop.f32.mrf.mxu0  ;;  %v1168_v2 = vpop.f32.mrf.mxu1 }
 0x53d   :  { %v1520_v3 = vsel %vm1515_vm7, %v1511_v60, 0  ;;  %v1566_v4 = vsel %vm1515_vm7, %v1512_v61, 0  ;;  %v9621_v61 = vld [vmem:[%s9602_s5] ss:$0 sm:$0xff]  ;;  %v9624_v1 = vld [vmem:[%s9602_s5 + $0x1] ss:$0 sm:$0xff]  ;;  %v986_v2 = vadd.f32 %v9611_v48, %v9568_v37 }
 0x53e   :  { %v8217_v5 = vpop.f32.mrf.mxu0  ;;  %v8225_v6 = vpop.f32.mrf.mxu1  ;;  %8275 = vmatpush3.bf16.xpose.msra.mxu0 %v1520_v3  ;;  %8281 = vmatpush3.bf16.xpose.msra.mxu1 %v1566_v4  ;;  %v1038_v3 = vadd.f32 %v9614_v30, %v9570_v38 }
 0x53f   :  { %8286 = vmatprep.subr.bf16.mxu0 %v9248_v0  ;;  %8292 = vmatprep.subr.bf16.mxu1 %v9248_v0  ;;  %v1509_v38 = vpack.c.bf16 %v986_v2, %v986_v2 }
 0x540   :  { %v1217_v34 = vpop.f32.mrf.mxu0  ;;  %v1269_v35 = vpop.f32.mrf.mxu1 }
 0x541   :  { %v1218_v36 = vadd.f32 %v9594_v10, %v1217_v34  ;;  %v1270_v39 = vadd.f32 %v9597_v31, %v1269_v35  ;;  %v1510_v34 = vpack.c.bf16 %v1038_v3, %v1038_v3 }
 0x542   :  { %v8232_v40 = vpop.f32.mrf.mxu0  ;;  %v8240_v41 = vpop.f32.mrf.mxu1 }
 0x543   :  { %v1513_v45 = vpack.c.bf16 %v1218_v36, %v1218_v36  ;;  %v1514_v29 = vpack.c.bf16 %v1270_v39, %v1270_v39 }
 0x544   :  { %v1220_v53 = vpop.f32.mrf.mxu0  ;;  %v1272_v54 = vpop.f32.mrf.mxu1 }
 0x545   :  { %v1612_v55 = vsel %vm1515_vm7, %v1513_v45, 0  ;;  %v1658_v56 = vsel %vm1515_vm7, %v1514_v29, 0  ;;  %8277 = vmatmul.mubr.msk.bf16.vlgmr.msra.gmra.mxu0 %vm1515_vm7, %v1507_v43  ;;  %8283 = vmatmul.mubr.msk.bf16.vlgmr.msra.gmra.mxu1 %vm1515_vm7, %v1508_v44 }
 0x546   :  { %v8233_v58 = vpop.f32.mrf.mxu0  ;;  %v8241_v60 = vpop.f32.mrf.mxu1  ;;  %8287 = vmatpush3.bf16.xpose.msra.mxu0 %v1612_v55  ;;  %8293 = vmatpush3.bf16.xpose.msra.mxu1 %v1658_v56 }
 0x547   :  { %8288 = vmatprep.mubr.msk.bf16.mxu0 %vm9250_vm0, %v9248_v0  ;;  %8294 = vmatprep.mubr.msk.bf16.mxu1 %vm9250_vm0, %v9248_v0 }
 0x548   :  { %v1345_v4 = vpop.f32.mrf.mxu0  ;;  %v1397_v5 = vpop.f32.mrf.mxu1  ;;  %8298 = vmatprep.subr.bf16.mxu0 %v9248_v0  ;;  %8304 = vmatprep.subr.bf16.mxu1 %v9248_v0 }
 0x549   :  { %v1346_v6 = vadd.f32 %v9621_v61, %v1345_v4  ;;  %v1398_v32 = vadd.f32 %v9624_v1, %v1397_v5 }
 0x54a   :  { %v8248_v37 = vpop.f32.mrf.mxu0  ;;  %v8256_v33 = vpop.f32.mrf.mxu1 }
 0x54b   :  { %v1752_v35 = vpack.c.bf16 %v1346_v6, %v1346_v6  ;;  %v1753_v36 = vpack.c.bf16 %v1398_v32, %v1398_v32 }
 0x54c   :  { %v1348_v39 = vpop.f32.mrf.mxu0  ;;  %v1400_v40 = vpop.f32.mrf.mxu1 }
 0x54d   :  { %v1761_v41 = vsel %vm1759_vm8, %v1752_v35, 0  ;;  %v1807_v43 = vsel %vm1759_vm8, %v1753_v36, 0  ;;  %8289 = vmatmul.mubr.msk.bf16.vlgmr.msra.gmra.mxu0 %vm1515_vm7, %v1509_v38  ;;  %8295 = vmatmul.mubr.msk.bf16.vlgmr.msra.gmra.mxu1 %vm1515_vm7, %v1510_v34 }
 0x54e   :  { %v8249_v44 = vpop.f32.mrf.mxu0  ;;  %v8257_v45 = vpop.f32.mrf.mxu1  ;;  %8299 = vmatpush3.bf16.msra.mxu0 %v1761_v41  ;;  %8305 = vmatpush3.bf16.msra.mxu1 %v1807_v43 }
 0x54f   :  { %8300 = vmatprep.mubr.msk.bf16.mxu0 %vm9250_vm0, %v9248_v0  ;;  %8306 = vmatprep.mubr.msk.bf16.mxu1 %vm9250_vm0, %v9248_v0 }
 0x550   :  { %v9646_v29 = vpop.f32.mrf.mxu0  ;;  %v9648_v53 = vpop.f32.mrf.mxu1  ;;  %8310 = vmatprep.subr.bf16.mxu0 %v9248_v0  ;;  %8316 = vmatprep.subr.bf16.mxu1 %v9248_v0 }
 0x552   :  { %v8264_v54 = vpop.f32.mrf.mxu0  ;;  %v8272_v55 = vpop.f32.mrf.mxu1 }
 0x554   :  { %v1452_v56 = vpop.f32.mrf.mxu0  ;;  %v1504_v58 = vpop.f32.mrf.mxu1 }
 0x556   :  { %v8265_v60 = vpop.f32.mrf.mxu0  ;;  %v8273_v2 = vpop.f32.mrf.mxu1 }
 0x605   :  { %v1556_v3 = vpop.f32.mrf.mxu0  ;;  %v1602_v4 = vpop.f32.mrf.mxu1 }
 0x606   :  { %v1700_v5 = vmul.f32 0.35355338, %v1556_v3  ;;  %v1701_v6 = vmul.f32 0.35355338, %v1602_v4 }
 0x607   :  { %v8278_v32 = vpop.f32.mrf.mxu0  ;;  %v8284_v37 = vpop.f32.mrf.mxu1 }
 0x608   :  { %v1707_v33 = vsel %vm1515_vm7, %v1701_v6, -inf  ;;  %v1704_v38 = vsel %vm1515_vm7, %v1700_v5, -inf }
 0x609   :  { %1708 = vmax.xlane.f32.xlu1 %v1707_v33  ;;  %v1605_v34 = vpop.f32.mrf.mxu1  ;;  %1705 = vmax.xlane.f32.xlu0 %v1704_v38  ;;  %v1559_v35 = vpop.f32.mrf.mxu0 }
 0x60b   :  { %v8279_v36 = vpop.f32.mrf.mxu0  ;;  %v8285_v39 = vpop.f32.mrf.mxu1 }
 0x60d   :  { %v1648_v40 = vpop.f32.mrf.mxu0  ;;  %v1694_v41 = vpop.f32.mrf.mxu1 }
 0x60e   :  { %v1702_v43 = vmul.f32 0.35355338, %v1648_v40  ;;  %v1703_v44 = vmul.f32 0.35355338, %v1694_v41 }
 0x60f   :  { %v8290_v45 = vpop.f32.mrf.mxu0  ;;  %v8296_v54 = vpop.f32.mrf.mxu1 }
 0x610   :  { %v1713_v55 = vsel %vm1515_vm7, %v1703_v44, -inf  ;;  %v1710_v56 = vsel %vm1515_vm7, %v1702_v43, -inf }
 0x611   :  { %1714 = vmax.xlane.f32.xlu1 %v1713_v55  ;;  %v1697_v58 = vpop.f32.mrf.mxu1  ;;  %1711 = vmax.xlane.f32.xlu0 %v1710_v56  ;;  %v1651_v60 = vpop.f32.mrf.mxu0 }
 0x613   :  { %v8291_v2 = vpop.f32.mrf.mxu0  ;;  %v8297_v3 = vpop.f32.mrf.mxu1 }
 0x692   :  { %v1709_v4 = vpop.xlane.xlu1 %1708  ;;  %v1706_v32 = vpop.xlane.xlu0 %1705 }
 0x693   :  { %v1717_v37 = vsub.f32 %v1701_v6, %v1709_v4  ;;  %v1716_v33 = vsub.f32 %v1700_v5, %v1706_v32  ;;  %v9663_v4 = vld [vmem:[%s9602_s5 + $0x3] ss:$0 sm:$0xff] }
 0x695   :  { %v1722_v38 = vmul.f32 1.442695, %v1717_v37  ;;  %v1720_v34 = vmul.f32 1.442695, %v1716_v33  ;;  %v9666_v37 = vld [vmem:[%s9602_s5 + $0x2] ss:$0 sm:$0xff]  ;;  %s10196_s5 = sld [smem:[%s10961_s0 + %s9279_s2]]  }
 0x696   :  { %s9295_s2 = smov 43  }
 0x697   :  { %9144 = vpow2.f32 %v1722_v38  ;;  %v1502_v38 = vadd.f32 %v9663_v4, %v9648_v53 }
 0x698   :  { %9146 = vpow2.f32 %v1720_v34  ;;  %v1450_v34 = vadd.f32 %v9666_v37, %v9646_v29 }
 0x69a   :  { %v1715_v35 = vpop.xlane.xlu1 %1714  ;;  %v1712_v36 = vpop.xlane.xlu0 %1711 }
 0x69b   :  { %v1719_v39 = vsub.f32 %v1703_v44, %v1715_v35  ;;  %v1718_v40 = vsub.f32 %v1702_v43, %v1712_v36  ;;  %v750_v44 = vsel %vm638_vm6, %v9359_v42, 0.0 }
 0x69d   :  { %v1726_v41 = vmul.f32 1.442695, %v1719_v39  ;;  %v1724_v45 = vmul.f32 1.442695, %v1718_v40 }
 0x69f   :  { %9148 = vpow2.f32 %v1726_v41  ;;  %v1755_v41 = vpack.c.bf16 %v1502_v38, %v1502_v38 }
 0x6a0   :  { %9150 = vpow2.f32 %v1724_v45 }
 0x6a4   :  { %v9145_v54 = vpop.eup %9144 }
 0x6a5   :  { %v9147_v55 = vpop.eup %9146  ;;  %v1731_v56 = vsel %vm1515_vm7, %v9145_v54, 0.0 }
 0x6a6   :  { %1732 = vadd.xlane.f32.xlu1 %v1731_v56  ;;  %v1728_v5 = vsel %vm1515_vm7, %v9147_v55, 0.0  ;;  %v1754_v56 = vpack.c.bf16 %v1450_v34, %v1450_v34  ;;  %v304_v34 = vld [vmem:[%s7488_s9 + $0x4] sm:$0xf] }
 0x6a7   :  { %1729 = vadd.xlane.f32.xlu0 %v1728_v5 }
 0x6a8   :  { %v1853_v53 = vsel %vm1759_vm8, %v1754_v56, 0 }
 0x6ac   :  { %v9149_v6 = vpop.eup %9148 }
 0x6ad   :  { %v9151_v58 = vpop.eup %9150  ;;  %v1737_v60 = vsel %vm1515_vm7, %v9149_v6, 0.0 }
 0x6ae   :  { %1738 = vadd.xlane.f32.xlu1 %v1737_v60  ;;  %v1734_v43 = vsel %vm1515_vm7, %v9151_v58, 0.0 }
 0x6af   :  { %1735 = vadd.xlane.f32.xlu0 %v1734_v43 }
 0x6b3   :  { %751 = vadd.xlane.f32.xlu0 %v750_v44 }
 0x72f   :  { %v1733_v2 = vpop.xlane.xlu1 %1732 }
 0x730   :  { %9152 = vrcp.f32 %v1733_v2  ;;  %v1730_v3 = vpop.xlane.xlu0 %1729 }
 0x731   :  { %9154 = vrcp.f32 %v1730_v3  ;;  %v1899_v3 = vsel %vm1759_vm8, %v1755_v41, 0 }
 0x737   :  { %v1739_v32 = vpop.xlane.xlu1 %1738 }
 0x738   :  { %9156 = vrcp.f32 %v1739_v32  ;;  %v1736_v33 = vpop.xlane.xlu0 %1735 }
 0x739   :  { %9158 = vrcp.f32 %v1736_v33 }
 0x73c   :  { %v752_v35 = vpop.xlane.xlu0 %751 }
 0x73d   :  { %v9153_v36 = vpop.eup %9152  ;;  %v754_v39 = vmul.f32 0.03125, %v752_v35  ;;  %v9697_v35 = vsel %vm1759_vm8, %v304_v34, 0 }
 0x73e   :  { %v9155_v40 = vpop.eup %9154  ;;  %v1743_v45 = vmul.f32 %v9153_v36, %v9145_v54 }
 0x73f   :  { %v756_v5 = vsub.f32 %v9359_v42, %v754_v39  ;;  %v1741_v60 = vmul.f32 %v9155_v40, %v9147_v55 }
 0x740   :  { %v1749_v43 = vpack.c.bf16 %v1743_v45, %v1743_v45 }
 0x741   :  { %v1748_v44 = vpack.c.bf16 %v1741_v60, %v1741_v60  ;;  %v758_v2 = vmul.f32 %v756_v5, %v756_v5 }
 0x742   :  { %8307 = vmatmul.mubr.msk.bf16.vlgmr.msra.gmra.mxu1 %vm1515_vm7, %v1749_v43 }
 0x743   :  { %8301 = vmatmul.mubr.msk.bf16.vlgmr.msra.gmra.mxu0 %vm1515_vm7, %v1748_v44  ;;  %8317 = vmatpush3.bf16.msra.mxu1 %v1899_v3  ;;  %v762_v29 = vsel %vm638_vm6, %v758_v2, 0.0 }
 0x744   :  { %8311 = vmatpush3.bf16.msra.mxu0 %v1853_v53  ;;  %763 = vadd.xlane.f32.xlu1 %v762_v29  ;;  %v306_v29 = vld [vmem:[%s7488_s9 + $0xc] sm:$0xf] }
 0x745   :  { %v9157_v54 = vpop.eup %9156  ;;  %8312 = vmatprep.mubr.msk.bf16.mxu0 %vm9250_vm0, %v9248_v0  ;;  %8318 = vmatprep.mubr.msk.bf16.mxu1 %vm9250_vm0, %v9248_v0 }
 0x746   :  { %v9159_v42 = vpop.eup %9158  ;;  %v1747_v55 = vmul.f32 %v9157_v54, %v9149_v6  ;;  %8322 = vmatprep.subr.bf16.mxu0 %v9248_v0  ;;  %8328 = vmatprep.subr.bf16.mxu1 %v9248_v0  ;;  %v303_v6 = vld [vmem:[%s7488_s9] sm:$0xf]  ;;  %v305_v54 = vld [vmem:[%s7488_s9 + $0x8] sm:$0xf]  ;;  %s10212_s9 = sld [smem:[%s10961_s0 + %s9280_s6]]   ;;  %s9296_s6 = smov 45  }
 0x747   :  { %v1745_v32 = vmul.f32 %v9159_v42, %v9151_v58  ;;  %v9694_v58 = vsel %vm1759_vm8, %v303_v6, 0 }
 0x748   :  { %v1751_v33 = vpack.c.bf16 %v1747_v55, %v1747_v55 }
 0x749   :  { %v1750_v38 = vpack.c.bf16 %v1745_v32, %v1745_v32 }
 0x74a   :  { %8319 = vmatmul.mubr.msk.bf16.vlgmr.msra.gmra.mxu1 %vm1515_vm7, %v1751_v33  ;;  %v9706_v33 = vsel %vm1759_vm8, %v306_v29, 0 }
 0x74b   :  { %8313 = vmatmul.mubr.msk.bf16.vlgmr.msra.gmra.mxu0 %vm1515_vm7, %v1750_v38  ;;  %8330 = vmatprep.mubr.msk.bf16.mxu1 %vm9250_vm0, %v9248_v0 }
 0x74c   :  { %8324 = vmatprep.mubr.msk.bf16.mxu0 %vm9250_vm0, %v9248_v0  ;;  %8323 = vmatpush3.bf16.msra.mxu0 %v9694_v58 }
 0x74d   :  { %8329 = vmatpush3.bf16.msra.mxu1 %v9697_v35  ;;  %8334 = vmatprep.subr.bf16.mxu0 %v9248_v0 }
 0x74e   :  { %8340 = vmatprep.subr.bf16.mxu1 %v9248_v0 }
 0x7cd   :  { %v764_v36 = vpop.xlane.xlu1 %763 }
 0x7ce   :  { %v766_v39 = vmul.f32 0.03125, %v764_v36 }
 0x7d0   :  { %v768_v40 = vadd.f32 1e-05, %v766_v39 }
 0x7d2   :  { %9160 = vrsqrt.f32 %v768_v40 }
 0x7df   :  { %v9161_v41 = vpop.eup %9160 }
 0x7e0   :  { %v772_v45 = vmul.f32 %v9161_v41, %v756_v5 }
 0x7e2   :  { %v780_v56 = vmul.f32 %v9403_v57, %v772_v45  ;;  %v9709_v57 = vsel %vm1759_vm8, %v305_v54, 0 }
 0x7e4   :  { %v788_v60 = vadd.f32 %v9405_v59, %v780_v56 }
 0x7e6   :  { %v790_v43 = vmul.f32 %v788_v60, %v788_v60 }
 0x7e8   :  { %v792_v44 = vmul.f32 %v790_v43, %v788_v60 }
 0x7ea   :  { %v794_v2 = vmul.f32 0.044715, %v792_v44 }
 0x7ec   :  { %v796_v3 = vadd.f32 %v794_v2, %v788_v60 }
 0x7ee   :  { %v798_v53 = vmul.f32 0.7978846, %v796_v3 }
 0x7f0   :  { %9162 = vtanh.f32 %v798_v53 }
 0x7fd   :  { %v9163_v38 = vpop.eup %9162 }
 0x7fe   :  { %v802_v36 = vadd.f32 1.0, %v9163_v38 }
 0x800   :  { %v804_v56 = vmul.f32 0.5, %v802_v36 }
 0x802   :  { %v1843_v42 = vpop.f32.mrf.mxu1  ;;  %v9724_v54 = vmul.f32 %v804_v56, %v788_v60 }
 0x803   :  { %v1797_v55 = vpop.f32.mrf.mxu0  ;;  %v1942_v32 = vpack.c.bf16 %v1843_v42, %v1843_v42 }
 0x804   :  { %v1941_v5 = vpack.c.bf16 %v1797_v55, %v1797_v55  ;;  %v8308_v6 = vpop.f32.mrf.mxu1 }
 0x805   :  { %v8302_v59 = vpop.f32.mrf.mxu0  ;;  %8331 = vmatmul.mubr.msk.bf16.vlgmr.msra.gmra.mxu1 %vm1515_vm7, %v1942_v32 }
 0x806   :  { %8325 = vmatmul.mubr.msk.bf16.vlgmr.msra.gmra.mxu0 %vm1515_vm7, %v1941_v5  ;;  %v1846_v34 = vpop.f32.mrf.mxu1  ;;  %8341 = vmatpush3.bf16.msra.mxu1 %v9706_v33 }
 0x807   :  { %v1800_v39 = vpop.f32.mrf.mxu0  ;;  %8335 = vmatpush3.bf16.msra.mxu0 %v9709_v57  ;;  %8336 = vmatprep.mubr.msk.bf16.mxu0 %vm9250_vm0, %v9248_v0 }
 0x808   :  { %v8309_v40 = vpop.f32.mrf.mxu1  ;;  %8342 = vmatprep.mubr.msk.bf16.mxu1 %vm9250_vm0, %v9248_v0  ;;  %8346 = vmatprep.subr.bf16.mxu0 %v9248_v0 }
 0x809   :  { %v8303_v41 = vpop.f32.mrf.mxu0  ;;  %8354 = vmatprep.subr.bf16.mxu1 %v9248_v0 }
 0x80a   :  { %v1935_v45 = vpop.f32.mrf.mxu1 }
 0x80b   :  { %v1889_v43 = vpop.f32.mrf.mxu0  ;;  %v1944_v44 = vpack.c.bf16 %v1935_v45, %v1935_v45 }
 0x80c   :  { %v1943_v2 = vpack.c.bf16 %v1889_v43, %v1889_v43  ;;  %v8320_v3 = vpop.f32.mrf.mxu1 }
 0x80d   :  { %v8314_v53 = vpop.f32.mrf.mxu0  ;;  %8343 = vmatmul.mubr.msk.bf16.vlgmr.msra.gmra.mxu1 %vm1515_vm7, %v1944_v44 }
 0x80e   :  { %8337 = vmatmul.mubr.msk.bf16.vlgmr.msra.gmra.mxu0 %vm1515_vm7, %v1943_v2  ;;  %v1938_v29 = vpop.f32.mrf.mxu1  ;;  %8355 = vmatpush3.bf16.msra.mxu1 %v9371_v50  ;;  %v9736_v50 = vpack.c.bf16 %v9724_v54, %v9724_v54 }
 0x80f   :  { %v1892_v42 = vpop.f32.mrf.mxu0  ;;  %8347 = vmatpush3.bf16.msra.mxu0 %v9368_v49  ;;  %8356 = vmatprep.subr.bf16.mxu1 %v9248_v0 }
 0x810   :  { %v8321_v55 = vpop.f32.mrf.mxu1  ;;  %8348 = vmatprep.subr.bf16.mxu0 %v9248_v0  ;;  %8350 = vmatprep.mubr.msk.bf16.mxu0 %vm9250_vm0, %v9248_v0 }
 0x811   :  { %v8315_v32 = vpop.f32.mrf.mxu0  ;;  %8358 = vmatprep.mubr.msk.bf16.mxu1 %vm9250_vm0, %v9248_v0 }
 0x812   :  { %8357 = vmatpush3.bf16.msra.mxu1 %v9381_v52 }
 0x813   :  { %8349 = vmatpush3.bf16.msra.mxu0 %v9378_v51  ;;  %8370 = vmatprep.subr.bf16.mxu1 %v9248_v0 }
 0x814   :  { %8362 = vmatprep.subr.bf16.mxu0 %v9248_v0 }
 0x815   :  { %8359 = vmatmul.mubr.msk.bf16.vlgmr.msra.gmra.mxu1 %vm638_vm6, %v9736_v50 }
 0x816   :  { %8351 = vmatmul.mubr.msk.bf16.vlgmr.msra.gmra.mxu0 %vm638_vm6, %v9736_v50  ;;  %8371 = vmatpush3.bf16.msra.mxu1 %v9415_v9 }
 0x817   :  { %8363 = vmatpush3.bf16.msra.mxu0 %v9412_v8  ;;  %8372 = vmatprep.subr.bf16.mxu1 %v9248_v0 }
 0x818   :  { %8364 = vmatprep.subr.bf16.mxu0 %v9248_v0  ;;  %8366 = vmatprep.mubr.msk.bf16.mxu0 %vm9250_vm0, %v9248_v0 }
 0x819   :  { %8374 = vmatprep.mubr.msk.bf16.mxu1 %vm9250_vm0, %v9248_v0 }
 0x81a   :  { %8373 = vmatpush3.bf16.msra.mxu1 %v9431_v12 }
 0x81b   :  { %8365 = vmatpush3.bf16.msra.mxu0 %v9428_v11  ;;  %8386 = vmatprep.subr.bf16.mxu1 %v9248_v0 }
 0x81c   :  { %8378 = vmatprep.subr.bf16.mxu0 %v9248_v0 }
 0x81d   :  { %8375 = vmatmul.mubr.msk.bf16.vlgmr.msra.gmra.mxu1 %vm638_vm6, %v9736_v50 }
 0x81e   :  { %8367 = vmatmul.mubr.msk.bf16.vlgmr.msra.gmra.mxu0 %vm638_vm6, %v9736_v50  ;;  %8387 = vmatpush3.bf16.msra.mxu1 %v9445_v14 }
 0x81f   :  { %8379 = vmatpush3.bf16.msra.mxu0 %v9442_v13  ;;  %8388 = vmatprep.subr.bf16.mxu1 %v9248_v0 }
 0x820   :  { %8380 = vmatprep.subr.bf16.mxu0 %v9248_v0  ;;  %8382 = vmatprep.mubr.msk.bf16.mxu0 %vm9250_vm0, %v9248_v0 }
 0x821   :  { %8390 = vmatprep.mubr.msk.bf16.mxu1 %vm9250_vm0, %v9248_v0 }
 0x822   :  { %8389 = vmatpush3.bf16.msra.mxu1 %v9459_v16 }
 0x823   :  { %8381 = vmatpush3.bf16.msra.mxu0 %v9456_v15  ;;  %8402 = vmatprep.subr.bf16.mxu1 %v9248_v0 }
 0x824   :  { %8394 = vmatprep.subr.bf16.mxu0 %v9248_v0 }
 0x825   :  { %8391 = vmatmul.mubr.msk.bf16.vlgmr.msra.gmra.mxu1 %vm638_vm6, %v9736_v50 }
 0x826   :  { %8383 = vmatmul.mubr.msk.bf16.vlgmr.msra.gmra.mxu0 %vm638_vm6, %v9736_v50  ;;  %8403 = vmatpush3.bf16.msra.mxu1 %v9473_v18 }
 0x827   :  { %8395 = vmatpush3.bf16.msra.mxu0 %v9470_v17  ;;  %8404 = vmatprep.subr.bf16.mxu1 %v9248_v0 }
 0x828   :  { %8396 = vmatprep.subr.bf16.mxu0 %v9248_v0  ;;  %8398 = vmatprep.mubr.msk.bf16.mxu0 %vm9250_vm0, %v9248_v0 }
 0x829   :  { %8406 = vmatprep.mubr.msk.bf16.mxu1 %vm9250_vm0, %v9248_v0 }
 0x82a   :  { %8405 = vmatpush3.bf16.msra.mxu1 %v9487_v20 }
 0x82b   :  { %8397 = vmatpush3.bf16.msra.mxu0 %v9484_v19  ;;  %8418 = vmatprep.subr.bf16.mxu1 %v9248_v0 }
 0x82c   :  { %8410 = vmatprep.subr.bf16.mxu0 %v9248_v0 }
 0x82d   :  { %8407 = vmatmul.mubr.msk.bf16.vlgmr.msra.gmra.mxu1 %vm638_vm6, %v9736_v50 }
 0x82e   :  { %8399 = vmatmul.mubr.msk.bf16.vlgmr.msra.gmra.mxu0 %vm638_vm6, %v9736_v50  ;;  %8419 = vmatpush3.bf16.msra.mxu1 %v9501_v22 }
 0x82f   :  { %8411 = vmatpush3.bf16.msra.mxu0 %v9498_v21  ;;  %8420 = vmatprep.subr.bf16.mxu1 %v9248_v0 }
 0x830   :  { %8412 = vmatprep.subr.bf16.mxu0 %v9248_v0  ;;  %8414 = vmatprep.mubr.msk.bf16.mxu0 %vm9250_vm0, %v9248_v0 }
 0x831   :  { %8422 = vmatprep.mubr.msk.bf16.mxu1 %vm9250_vm0, %v9248_v0 }
 0x832   :  { %8421 = vmatpush3.bf16.msra.mxu1 %v9515_v24 }
 0x833   :  { %8413 = vmatpush3.bf16.msra.mxu0 %v9512_v23  ;;  %8434 = vmatprep.subr.bf16.mxu1 %v9248_v0 }
 0x834   :  { %8426 = vmatprep.subr.bf16.mxu0 %v9248_v0 }
 0x835   :  { %8423 = vmatmul.mubr.msk.bf16.vlgmr.msra.gmra.mxu1 %vm638_vm6, %v9736_v50 }
 0x836   :  { %8415 = vmatmul.mubr.msk.bf16.vlgmr.msra.gmra.mxu0 %vm638_vm6, %v9736_v50  ;;  %8435 = vmatpush3.bf16.msra.mxu1 %v9529_v26 }
 0x837   :  { %8427 = vmatpush3.bf16.msra.mxu0 %v9526_v25  ;;  %8436 = vmatprep.subr.bf16.mxu1 %v9248_v0 }
 0x838   :  { %8428 = vmatprep.subr.bf16.mxu0 %v9248_v0  ;;  %8430 = vmatprep.mubr.msk.bf16.mxu0 %vm9250_vm0, %v9248_v0 }
 0x839   :  { %8438 = vmatprep.mubr.msk.bf16.mxu1 %vm9250_vm0, %v9248_v0 }
 0x83a   :  { %8437 = vmatpush3.bf16.msra.mxu1 %v9543_v28 }
 0x83b   :  { %8429 = vmatpush3.bf16.msra.mxu0 %v9540_v27  ;;  %8448 = vmatprep.subr.bf16.mxu1 %v9248_v0 }
 0x83c   :  { %8442 = vmatprep.subr.bf16.mxu0 %v9248_v0 }
 0x83d   :  { %8439 = vmatmul.mubr.msk.bf16.vlgmr.msra.gmra.mxu1 %vm638_vm6, %v9736_v50 }
 0x83e   :  { %8431 = vmatmul.mubr.msk.bf16.vlgmr.msra.gmra.mxu0 %vm638_vm6, %v9736_v50  ;;  %8450 = vmatprep.mubr.msk.bf16.mxu1 %vm9250_vm0, %v9248_v0 }
 0x83f   :  { %8444 = vmatprep.mubr.msk.bf16.mxu0 %vm9250_vm0, %v9248_v0 }
 0x8c5   :  { %v2031_v49 = vpop.f32.mrf.mxu1 }
 0x8c6   :  { %v1985_v51 = vpop.f32.mrf.mxu0  ;;  %v2130_v52 = vsel %vm638_vm6, %v2031_v49, 0.0 }
 0x8c7   :  { %v2129_v8 = vsel %vm638_vm6, %v1985_v51, 0.0  ;;  %v8332_v9 = vpop.f32.mrf.mxu1 }
 0x8c8   :  { %v2131_v11 = vadd.f32 %v2130_v52, %v2129_v8  ;;  %v8326_v12 = vpop.f32.mrf.mxu0 }
 0x8c9   :  { %v2034_v13 = vpop.f32.mrf.mxu1 }
 0x8ca   :  { %v1988_v14 = vpop.f32.mrf.mxu0 }
 0x8cb   :  { %v8333_v15 = vpop.f32.mrf.mxu1 }
 0x8cc   :  { %v8327_v16 = vpop.f32.mrf.mxu0 }
 0x8cd   :  { %v2123_v17 = vpop.f32.mrf.mxu1 }
 0x8ce   :  { %v2077_v18 = vpop.f32.mrf.mxu0  ;;  %v2134_v23 = vsel %vm638_vm6, %v2123_v17, 0.0 }
 0x8cf   :  { %v2132_v19 = vsel %vm638_vm6, %v2077_v18, 0.0  ;;  %v8344_v20 = vpop.f32.mrf.mxu1 }
 0x8d0   :  { %v2133_v21 = vadd.f32 %v2132_v19, %v2131_v11  ;;  %v8338_v22 = vpop.f32.mrf.mxu0 }
 0x8d1   :  { %v2126_v24 = vpop.f32.mrf.mxu1 }
 0x8d2   :  { %v9833_v25 = vadd.f32 %v2134_v23, %v2133_v21  ;;  %v2080_v26 = vpop.f32.mrf.mxu0 }
 0x8d3   :  { %v8345_v27 = vpop.f32.mrf.mxu1 }
 0x8d4   :  { %v8339_v28 = vpop.f32.mrf.mxu0 }
 0x8d5   :  { %v2214_v60 = vpop.f32.mrf.mxu1 }
 0x8d6   :  { %v2174_v38 = vpop.f32.mrf.mxu0  ;;  %v2215_v13 = vadd.f32 %v9589_v63, %v2214_v60 }
 0x8d7   :  { %v8360_v5 = vpop.f32.mrf.mxu1 }
 0x8d8   :  { %v8352_v6 = vpop.f32.mrf.mxu0  ;;  %v2621_v19 = vpack.c.bf16 %v2215_v13, %v2215_v13 }
 0x8d9   :  { %v2217_v59 = vpop.f32.mrf.mxu1 }
 0x8da   :  { %v2177_v34 = vpop.f32.mrf.mxu0 }
 0x8db   :  { %v8361_v36 = vpop.f32.mrf.mxu1 }
 0x8dc   :  { %v8353_v39 = vpop.f32.mrf.mxu0 }
 0x8dd   :  { %v2294_v40 = vpop.f32.mrf.mxu1 }
 0x8de   :  { %v2254_v41 = vpop.f32.mrf.mxu0 }
 0x8df   :  { %v8376_v45 = vpop.f32.mrf.mxu1  ;;  %v2255_v28 = vadd.f32 %v9611_v48, %v2254_v41 }
 0x8e0   :  { %v8368_v56 = vpop.f32.mrf.mxu0 }
 0x8e1   :  { %v2297_v43 = vpop.f32.mrf.mxu1  ;;  %v2622_v39 = vpack.c.bf16 %v2255_v28, %v2255_v28 }
 0x8e2   :  { %v2257_v44 = vpop.f32.mrf.mxu0 }
 0x8e3   :  { %v8377_v2 = vpop.f32.mrf.mxu1 }
 0x8e4   :  { %v8369_v3 = vpop.f32.mrf.mxu0 }
 0x8e5   :  { %v2374_v53 = vpop.f32.mrf.mxu1 }
 0x8e6   :  { %v2334_v29 = vpop.f32.mrf.mxu0  ;;  %v2375_v42 = vadd.f32 %v9581_v47, %v2374_v53 }
 0x8e7   :  { %v2335_v55 = vadd.f32 %v9578_v46, %v2334_v29  ;;  %v8392_v32 = vpop.f32.mrf.mxu1  ;;  %v2175_v46 = vadd.f32 %v9586_v62, %v2174_v38 }
 0x8e8   :  { %v2625_v50 = vpack.c.bf16 %v2375_v42, %v2375_v42  ;;  %v8384_v49 = vpop.f32.mrf.mxu0 }
 0x8e9   :  { %v2624_v51 = vpack.c.bf16 %v2335_v55, %v2335_v55  ;;  %v2377_v52 = vpop.f32.mrf.mxu1  ;;  %v2620_v22 = vpack.c.bf16 %v2175_v46, %v2175_v46 }
 0x8ea   :  { %v2678_v8 = vsel %vm1515_vm7, %v2625_v50, 0  ;;  %v2337_v9 = vpop.f32.mrf.mxu0 }
 0x8eb   :  { %v2632_v11 = vsel %vm1515_vm7, %v2624_v51, 0  ;;  %v8393_v12 = vpop.f32.mrf.mxu1  ;;  %8449 = vmatpush3.bf16.xpose.msra.mxu1 %v2678_v8 }
 0x8ec   :  { %v8385_v14 = vpop.f32.mrf.mxu0  ;;  %8443 = vmatpush3.bf16.xpose.msra.mxu0 %v2632_v11  ;;  %8460 = vmatprep.subr.bf16.mxu1 %v9248_v0 }
 0x8ed   :  { %v2454_v47 = vpop.f32.mrf.mxu1  ;;  %8454 = vmatprep.subr.bf16.mxu0 %v9248_v0 }
 0x8ee   :  { %v2414_v15 = vpop.f32.mrf.mxu0  ;;  %v2455_v16 = vadd.f32 %v9597_v31, %v2454_v47 }
 0x8ef   :  { %v2415_v17 = vadd.f32 %v9594_v10, %v2414_v15  ;;  %v8408_v18 = vpop.f32.mrf.mxu1  ;;  %v2295_v10 = vadd.f32 %v9614_v30, %v2294_v40 }
 0x8f0   :  { %v2627_v20 = vpack.c.bf16 %v2455_v16, %v2455_v16  ;;  %v8400_v21 = vpop.f32.mrf.mxu0 }
 0x8f1   :  { %v2626_v63 = vpack.c.bf16 %v2415_v17, %v2415_v17  ;;  %v2457_v23 = vpop.f32.mrf.mxu1  ;;  %v2623_v59 = vpack.c.bf16 %v2295_v10, %v2295_v10 }
 0x8f2   :  { %v2770_v24 = vsel %vm1515_vm7, %v2627_v20, 0  ;;  %v2417_v26 = vpop.f32.mrf.mxu0  ;;  %8451 = vmatmul.mubr.msk.bf16.vlgmr.msra.gmra.mxu1 %vm1515_vm7, %v2621_v19 }
 0x8f3   :  { %v2724_v62 = vsel %vm1515_vm7, %v2626_v63, 0  ;;  %8445 = vmatmul.mubr.msk.bf16.vlgmr.msra.gmra.mxu0 %vm1515_vm7, %v2620_v22  ;;  %v8409_v27 = vpop.f32.mrf.mxu1  ;;  %8461 = vmatpush3.bf16.xpose.msra.mxu1 %v2770_v24 }
 0x8f4   :  { %v8401_v31 = vpop.f32.mrf.mxu0  ;;  %8455 = vmatpush3.bf16.xpose.msra.mxu0 %v2724_v62  ;;  %8456 = vmatprep.mubr.msk.bf16.mxu0 %vm9250_vm0, %v9248_v0 }
 0x8f5   :  { %v2534_v60 = vpop.f32.mrf.mxu1  ;;  %8462 = vmatprep.mubr.msk.bf16.mxu1 %vm9250_vm0, %v9248_v0  ;;  %8466 = vmatprep.subr.bf16.mxu0 %v9248_v0 }
 0x8f6   :  { %v2494_v38 = vpop.f32.mrf.mxu0  ;;  %v2535_v5 = vadd.f32 %v9624_v1, %v2534_v60  ;;  %8472 = vmatprep.subr.bf16.mxu1 %v9248_v0 }
 0x8f7   :  { %v2495_v30 = vadd.f32 %v9621_v61, %v2494_v38  ;;  %v8424_v6 = vpop.f32.mrf.mxu1 }
 0x8f8   :  { %v2865_v34 = vpack.c.bf16 %v2535_v5, %v2535_v5  ;;  %v8416_v36 = vpop.f32.mrf.mxu0 }
 0x8f9   :  { %v2864_v40 = vpack.c.bf16 %v2495_v30, %v2495_v30  ;;  %v2537_v48 = vpop.f32.mrf.mxu1 }
 0x8fa   :  { %v2918_v41 = vsel %vm1759_vm8, %v2865_v34, 0  ;;  %v2497_v45 = vpop.f32.mrf.mxu0  ;;  %8463 = vmatmul.mubr.msk.bf16.vlgmr.msra.gmra.mxu1 %vm1515_vm7, %v2623_v59  ;;  %v9882_v48 = vld [vmem:[%s7489_s13] ss:$0 sm:$0xff]  ;;  %s10312_s13 = sld [smem:[%s10961_s0 + %s9281_s10]]   ;;  %s9297_s10 = smov 49  }
 0x8fb   :  { %v2872_v56 = vsel %vm1759_vm8, %v2864_v40, 0  ;;  %8457 = vmatmul.mubr.msk.bf16.vlgmr.msra.gmra.mxu0 %vm1515_vm7, %v2622_v39  ;;  %v8425_v1 = vpop.f32.mrf.mxu1  ;;  %8473 = vmatpush3.bf16.msra.mxu1 %v2918_v41  ;;  %v3241_v41 = vadd.f32 %v9882_v48, %v9833_v25 }
 0x8fc   :  { %v8417_v43 = vpop.f32.mrf.mxu0  ;;  %8467 = vmatpush3.bf16.msra.mxu0 %v2872_v56  ;;  %8468 = vmatprep.mubr.msk.bf16.mxu0 %vm9250_vm0, %v9248_v0 }
 0x8fd   :  { %v9865_v61 = vpop.f32.mrf.mxu1  ;;  %8474 = vmatprep.mubr.msk.bf16.mxu1 %vm9250_vm0, %v9248_v0  ;;  %8478 = vmatprep.subr.bf16.mxu0 %v9248_v0 }
 0x8fe   :  { %v9870_v44 = vpop.f32.mrf.mxu0  ;;  %8484 = vmatprep.subr.bf16.mxu1 %v9248_v0 }
 0x8ff   :  { %v8440_v2 = vpop.f32.mrf.mxu1 }
 0x900   :  { %v8432_v3 = vpop.f32.mrf.mxu0  ;;  %v3243_v2 = vadd.f32 %v3241_v41, %v9409_v7 }
 0x901   :  { %v2617_v53 = vpop.f32.mrf.mxu1 }
 0x902   :  { %v2577_v29 = vpop.f32.mrf.mxu0  ;;  %v3245_v3 = vsel %vm638_vm6, %v3243_v2, 0.0 }
 0x903   :  { %v8441_v42 = vpop.f32.mrf.mxu1 }
 0x904   :  { %v8433_v55 = vpop.f32.mrf.mxu0 }
 0x905   :  { %v2615_v55 = vadd.f32 %v9663_v4, %v9865_v61 }
 0x9b2   :  { %v2714_v32 = vpop.f32.mrf.mxu1 }
 0x9b3   :  { %v2668_v50 = vpop.f32.mrf.mxu0  ;;  %v2813_v49 = vmul.f32 0.35355338, %v2714_v32  ;;  %v2575_v32 = vadd.f32 %v9666_v37, %v9870_v44 }
 0x9b4   :  { %v2812_v51 = vmul.f32 0.35355338, %v2668_v50  ;;  %v8452_v52 = vpop.f32.mrf.mxu1 }
 0x9b5   :  { %v8446_v8 = vpop.f32.mrf.mxu0  ;;  %v2819_v9 = vsel %vm1515_vm7, %v2813_v49, -inf  ;;  %v2867_v52 = vpack.c.bf16 %v2615_v55, %v2615_v55 }
 0x9b6   :  { %2820 = vmax.xlane.f32.xlu1 %v2819_v9  ;;  %v2717_v11 = vpop.f32.mrf.mxu1  ;;  %v2816_v12 = vsel %vm1515_vm7, %v2812_v51, -inf  ;;  %v2866_v9 = vpack.c.bf16 %v2575_v32, %v2575_v32 }
 0x9b7   :  { %2817 = vmax.xlane.f32.xlu0 %v2816_v12  ;;  %v2671_v13 = vpop.f32.mrf.mxu0  ;;  %v3010_v4 = vsel %vm1759_vm8, %v2867_v52, 0 }
 0x9b8   :  { %v8453_v14 = vpop.f32.mrf.mxu1  ;;  %v2964_v37 = vsel %vm1759_vm8, %v2866_v9, 0 }
 0x9b9   :  { %v8447_v46 = vpop.f32.mrf.mxu0 }
 0x9ba   :  { %v2806_v47 = vpop.f32.mrf.mxu1 }
 0x9bb   :  { %v2760_v15 = vpop.f32.mrf.mxu0  ;;  %v2815_v16 = vmul.f32 0.35355338, %v2806_v47 }
 0x9bc   :  { %v2814_v17 = vmul.f32 0.35355338, %v2760_v15  ;;  %v8464_v18 = vpop.f32.mrf.mxu1 }
 0x9bd   :  { %v8458_v19 = vpop.f32.mrf.mxu0  ;;  %v2825_v20 = vsel %vm1515_vm7, %v2815_v16, -inf }
 0x9be   :  { %2826 = vmax.xlane.f32.xlu1 %v2825_v20  ;;  %v2809_v21 = vpop.f32.mrf.mxu1  ;;  %v2822_v22 = vsel %vm1515_vm7, %v2814_v17, -inf }
 0x9bf   :  { %2823 = vmax.xlane.f32.xlu0 %v2822_v22  ;;  %v2763_v63 = vpop.f32.mrf.mxu0 }
 0x9c0   :  { %v8465_v23 = vpop.f32.mrf.mxu1 }
 0x9c1   :  { %v8459_v24 = vpop.f32.mrf.mxu0 }
 0xa3f   :  { %v2821_v26 = vpop.xlane.xlu1 %2820 }
 0xa40   :  { %v2829_v62 = vsub.f32 %v2813_v49, %v2821_v26  ;;  %v2818_v27 = vpop.xlane.xlu0 %2817 }
 0xa41   :  { %v2828_v10 = vsub.f32 %v2812_v51, %v2818_v27 }
 0xa42   :  { %v2834_v31 = vmul.f32 1.442695, %v2829_v62 }
 0xa43   :  { %v2832_v28 = vmul.f32 1.442695, %v2828_v10 }
 0xa44   :  { %9164 = vpow2.f32 %v2834_v31 }
 0xa45   :  { %9166 = vpow2.f32 %v2832_v28 }
 0xa47   :  { %v2827_v60 = vpop.xlane.xlu1 %2826 }
 0xa48   :  { %v2831_v38 = vsub.f32 %v2815_v16, %v2827_v60  ;;  %v2824_v5 = vpop.xlane.xlu0 %2823 }
 0xa49   :  { %v2830_v30 = vsub.f32 %v2814_v17, %v2824_v5 }
 0xa4a   :  { %v2838_v6 = vmul.f32 1.442695, %v2831_v38 }
 0xa4b   :  { %v2836_v59 = vmul.f32 1.442695, %v2830_v30 }
 0xa4c   :  { %9168 = vpow2.f32 %v2838_v6 }
 0xa4d   :  { %9170 = vpow2.f32 %v2836_v59 }
 0xa51   :  { %v9165_v34 = vpop.eup %9164 }
 0xa52   :  { %v9167_v36 = vpop.eup %9166  ;;  %v2843_v39 = vsel %vm1515_vm7, %v9165_v34, 0.0 }
 0xa53   :  { %2844 = vadd.xlane.f32.xlu1 %v2843_v39  ;;  %v2840_v40 = vsel %vm1515_vm7, %v9167_v36, 0.0 }
 0xa54   :  { %2841 = vadd.xlane.f32.xlu0 %v2840_v40 }
 0xa59   :  { %v9169_v45 = vpop.eup %9168 }
 0xa5a   :  { %v9171_v56 = vpop.eup %9170  ;;  %v2849_v1 = vsel %vm1515_vm7, %v9169_v45, 0.0 }
 0xa5b   :  { %2850 = vadd.xlane.f32.xlu1 %v2849_v1  ;;  %v2846_v43 = vsel %vm1515_vm7, %v9171_v56, 0.0 }
 0xa5c   :  { %2847 = vadd.xlane.f32.xlu0 %v2846_v43 }
 0xa60   :  { %3246 = vadd.xlane.f32.xlu0 %v3245_v3 }
 0xadc   :  { %v2845_v53 = vpop.xlane.xlu1 %2844 }
 0xadd   :  { %9172 = vrcp.f32 %v2845_v53  ;;  %v2842_v29 = vpop.xlane.xlu0 %2841 }
 0xade   :  { %9174 = vrcp.f32 %v2842_v29 }
 0xae4   :  { %v2851_v42 = vpop.xlane.xlu1 %2850 }
 0xae5   :  { %9176 = vrcp.f32 %v2851_v42  ;;  %v2848_v25 = vpop.xlane.xlu0 %2847 }
 0xae6   :  { %9178 = vrcp.f32 %v2848_v25 }
 0xae9   :  { %v3247_v50 = vpop.xlane.xlu0 %3246 }
 0xaea   :  { %v9173_v7 = vpop.eup %9172  ;;  %v3251_v49 = vmul.f32 0.03125, %v3247_v50 }
 0xaeb   :  { %v9175_v51 = vpop.eup %9174  ;;  %v2855_v8 = vmul.f32 %v9173_v7, %v9165_v34 }
 0xaec   :  { %v9894_v11 = vsub.f32 %v3243_v2, %v3251_v49  ;;  %v2853_v12 = vmul.f32 %v9175_v51, %v9167_v36 }
 0xaed   :  { %v2861_v13 = vpack.c.bf16 %v2855_v8, %v2855_v8 }
 0xaee   :  { %v2860_v14 = vpack.c.bf16 %v2853_v12, %v2853_v12  ;;  %v3255_v46 = vmul.f32 %v9894_v11, %v9894_v11 }
 0xaef   :  { %8475 = vmatmul.mubr.msk.bf16.vlgmr.msra.gmra.mxu1 %vm1515_vm7, %v2861_v13 }
 0xaf0   :  { %8469 = vmatmul.mubr.msk.bf16.vlgmr.msra.gmra.mxu0 %vm1515_vm7, %v2860_v14  ;;  %8485 = vmatpush3.bf16.msra.mxu1 %v3010_v4  ;;  %v3257_v61 = vsel %vm638_vm6, %v3255_v46, 0.0  ;;  %v9015_v4 = vld [vmem:[%s7492_s17 + $0x8] sm:$0xff]  }
 0xaf1   :  { %8479 = vmatpush3.bf16.msra.mxu0 %v2964_v37  ;;  %3258 = vadd.xlane.f32.xlu0 %v3257_v61 }
 0xaf2   :  { %v9177_v44 = vpop.eup %9176  ;;  %8480 = vmatprep.mubr.msk.bf16.mxu0 %vm9250_vm0, %v9248_v0  ;;  %8486 = vmatprep.mubr.msk.bf16.mxu1 %vm9250_vm0, %v9248_v0 }
 0xaf3   :  { %v9179_v47 = vpop.eup %9178  ;;  %v2859_v15 = vmul.f32 %v9177_v44, %v9169_v45  ;;  %8490 = vmatprep.subr.bf16.mxu0 %v9248_v0  ;;  %8496 = vmatprep.subr.bf16.mxu1 %v9248_v0 }
 0xaf4   :  { %v2857_v16 = vmul.f32 %v9179_v47, %v9171_v56 }
 0xaf5   :  { %v2863_v17 = vpack.c.bf16 %v2859_v15, %v2859_v15 }
 0xaf6   :  { %v2862_v18 = vpack.c.bf16 %v2857_v16, %v2857_v16 }
 0xaf7   :  { %8487 = vmatmul.mubr.msk.bf16.vlgmr.msra.gmra.mxu1 %vm1515_vm7, %v2863_v17 }
 0xaf8   :  { %8481 = vmatmul.mubr.msk.bf16.vlgmr.msra.gmra.mxu0 %vm1515_vm7, %v2862_v18  ;;  %8497 = vmatpush3.bf16.msra.mxu1 %v9697_v35 }
 0xaf9   :  { %8491 = vmatpush3.bf16.msra.mxu0 %v9694_v58  ;;  %8492 = vmatprep.mubr.msk.bf16.mxu0 %vm9250_vm0, %v9248_v0 }
 0xafa   :  { %8498 = vmatprep.mubr.msk.bf16.mxu1 %vm9250_vm0, %v9248_v0  ;;  %8502 = vmatprep.subr.bf16.mxu0 %v9248_v0 }
 0xafb   :  { %8508 = vmatprep.subr.bf16.mxu1 %v9248_v0 }
 0xb7a   :  { %v3259_v37 = vpop.xlane.xlu0 %3258 }
 0xb7b   :  { %v3263_v61 = vmul.f32 0.03125, %v3259_v37  ;;  %v10070_v37 = vld [vmem:[%s10002_s15 + $0x28] sm:$0xff]  }
 0xb7d   :  { %v3265_v44 = vadd.f32 1e-05, %v3263_v61  ;;  %v10081_v61 = vld [vmem:[%s9990_s11 + $0x30] sm:$0xff]  }
 0xb7f   :  { %9180 = vrsqrt.f32 %v3265_v44  ;;  %v10084_v44 = vld [vmem:[%s10002_s15 + $0x20] sm:$0xff]  }
 0xb8c   :  { %v9181_v17 = vpop.eup %9180 }
 0xb8d   :  { %v3269_v18 = vmul.f32 %v9181_v17, %v9894_v11  ;;  %v9019_v11 = vld [vmem:[%s9951_s21 + $0x8] sm:$0xff]   ;;  %v10112_v17 = vld [vmem:[%s10020_s19] sm:$0xff]  }
 0xbaf   :  { %v2954_v19 = vpop.f32.mrf.mxu1 }
 0xbb0   :  { %v2908_v20 = vpop.f32.mrf.mxu0  ;;  %v3053_v21 = vpack.c.bf16 %v2954_v19, %v2954_v19  ;;  %v7624_v19 = vld [vmem:[%s7490_s25] ss:$0 sm:$0xff]  ;;  %s10576_s25 = sld [smem:[%s10961_s0 + %s9284_s22]]   ;;  %s9300_s22 = smov 46  }
 0xbb1   :  { %v3052_v22 = vpack.c.bf16 %v2908_v20, %v2908_v20  ;;  %v8476_v63 = vpop.f32.mrf.mxu1 }
 0xbb2   :  { %v8470_v23 = vpop.f32.mrf.mxu0  ;;  %8499 = vmatmul.mubr.msk.bf16.vlgmr.msra.gmra.mxu1 %vm1515_vm7, %v3053_v21  ;;  %v7625_v63 = vld [vmem:[%s7491_s29] ss:$0 sm:$0xff]  ;;  %s7506_s29 = sld [smem:[%s10961_s0 + %s9285_s26]]   ;;  %s9301_s26 = smov 47  }
 0xbb3   :  { %8493 = vmatmul.mubr.msk.bf16.vlgmr.msra.gmra.mxu0 %vm1515_vm7, %v3052_v22  ;;  %v2957_v58 = vpop.f32.mrf.mxu1  ;;  %8509 = vmatpush3.bf16.msra.mxu1 %v9706_v33  ;;  %v3277_v22 = vmul.f32 %v7624_v19, %v3269_v18  ;;  %v10123_v18 = vld [vmem:[%s10002_s15 + $0x38] sm:$0xff]  }
 0xbb4   :  { %v2911_v35 = vpop.f32.mrf.mxu0  ;;  %8503 = vmatpush3.bf16.msra.mxu0 %v9709_v57  ;;  %8504 = vmatprep.mubr.msk.bf16.mxu0 %vm9250_vm0, %v9248_v0 }
 0xbb5   :  { %v8477_v24 = vpop.f32.mrf.mxu1  ;;  %8510 = vmatprep.mubr.msk.bf16.mxu1 %vm9250_vm0, %v9248_v0  ;;  %8514 = vmatprep.subr.bf16.mxu0 %v9248_v0  ;;  %v3285_v58 = vadd.f32 %v7625_v63, %v3277_v22  ;;  %v10151_v22 = vld [vmem:[%s10020_s19 + $0x18] sm:$0xff]  }
 0xbb6   :  { %v8471_v26 = vpop.f32.mrf.mxu0  ;;  %8522 = vmatprep.subr.bf16.mxu1 %v9248_v0 }
 0xbb7   :  { %v3046_v62 = vpop.f32.mrf.mxu1  ;;  %v9018_v26 = vld [vmem:[%s9951_s21 + $0x10] sm:$0xff]  }
 0xbb8   :  { %v3000_v27 = vpop.f32.mrf.mxu0  ;;  %v3055_v10 = vpack.c.bf16 %v3046_v62, %v3046_v62  ;;  %v9020_v62 = vld [vmem:[%s9951_s21] sm:$0xff]  }
 0xbb9   :  { %v3054_v31 = vpack.c.bf16 %v3000_v27, %v3000_v27  ;;  %v8488_v33 = vpop.f32.mrf.mxu1  ;;  %v7626_v27 = vld [vmem:[%s7493_s3] ss:$0 sm:$0xff]  ;;  %s7507_s3 = sld [smem:[%s10961_s0 + %s9286_s30]]   ;;  %s9302_s30 = smov 53  }
 0xbba   :  { %v8482_v28 = vpop.f32.mrf.mxu0  ;;  %8511 = vmatmul.mubr.msk.bf16.vlgmr.msra.gmra.mxu1 %vm1515_vm7, %v3055_v10 }
 0xbbb   :  { %8505 = vmatmul.mubr.msk.bf16.vlgmr.msra.gmra.mxu0 %vm1515_vm7, %v3054_v31  ;;  %v3049_v57 = vpop.f32.mrf.mxu1  ;;  %8530 = vmatprep.mubr.msk.bf16.mxu1 %vm9250_vm0, %v9248_v0 }
 0xbbc   :  { %v3003_v60 = vpop.f32.mrf.mxu0  ;;  %8518 = vmatprep.mubr.msk.bf16.mxu0 %vm9250_vm0, %v9248_v0  ;;  %8515 = vmatpush3.bf16.msra.mxu0 %v9015_v4  ;;  %v10053_v4 = vld [vmem:[%s9990_s11 + $0x10] sm:$0xff]  }
 0xbbd   :  { %v8489_v38 = vpop.f32.mrf.mxu1  ;;  %8516 = vmatprep.subr.bf16.mxu0 %v9248_v0 }
 0xbbe   :  { %v8483_v5 = vpop.f32.mrf.mxu0 }
 0xc72   :  { %v3136_v30 = vpop.f32.mrf.mxu1 }
 0xc73   :  { %v3093_v6 = vpop.f32.mrf.mxu0  ;;  %v3229_v41 = vsel %vm638_vm6, %v3136_v30, 0.0 }
 0xc74   :  { %v8500_v59 = vpop.f32.mrf.mxu1  ;;  %v3228_v40 = vsel %vm638_vm6, %v3093_v6, 0.0  ;;  %v7630_v6 = vld [vmem:[%s7495_s7] ss:$0 sm:$0xff]  ;;  %s7509_s7 = sld [smem:[%s10961_s0 + %s9287_s4]]   ;;  %s9303_s4 = smov 52  }
 0xc75   :  { %v8494_v34 = vpop.f32.mrf.mxu0  ;;  %v3230_v43 = vadd.f32 %v3229_v41, %v3228_v40 }
 0xc76   :  { %v3139_v36 = vpop.f32.mrf.mxu1 }
 0xc77   :  { %v3096_v39 = vpop.f32.mrf.mxu0 }
 0xc78   :  { %v8501_v45 = vpop.f32.mrf.mxu1 }
 0xc79   :  { %v8495_v56 = vpop.f32.mrf.mxu0 }
 0xc7a   :  { %v3222_v1 = vpop.f32.mrf.mxu1 }
 0xc7b   :  { %v3179_v2 = vpop.f32.mrf.mxu0  ;;  %v3233_v25 = vsel %vm638_vm6, %v3222_v1, 0.0 }
 0xc7c   :  { %v3231_v3 = vsel %vm638_vm6, %v3179_v2, 0.0  ;;  %v8512_v53 = vpop.f32.mrf.mxu1 }
 0xc7d   :  { %v3232_v29 = vadd.f32 %v3231_v3, %v3230_v43  ;;  %v8506_v42 = vpop.f32.mrf.mxu0 }
 0xc7e   :  { %v3225_v55 = vpop.f32.mrf.mxu1  ;;  %v9996_v42 = vld [vmem:[%s9990_s11 + $0x28] sm:$0xff]  }
 0xc7f   :  { %v3234_v32 = vadd.f32 %v3233_v25, %v3232_v29  ;;  %v3182_v50 = vpop.f32.mrf.mxu0  ;;  %v9993_v29 = vld [vmem:[%s9990_s11 + $0x8] sm:$0xff]   ;;  %v10008_v25 = vld [vmem:[%s9990_s11] sm:$0xff]  }
 0xc80   :  { %v8513_v7 = vpop.f32.mrf.mxu1  ;;  %v10011_v55 = vld [vmem:[%s9990_s11 + $0x20] sm:$0xff]  }
 0xc81   :  { %v3242_v49 = vadd.f32 %v9882_v48, %v3234_v32  ;;  %v8507_v51 = vpop.f32.mrf.mxu0  ;;  %v9016_v48 = vld [vmem:[%s7492_s17] sm:$0xff]   ;;  %s7505_s17 = sld [smem:[%s10961_s0 + %s9282_s14]]   ;;  %s9298_s14 = smov 50  }
 0xc82   :  { %8517 = vmatpush3.bf16.msra.mxu0 %v9016_v48  ;;  %v10028_v51 = vld [vmem:[%s7496_s23] ss:$0 sm:$0xff]  ;;  %s7513_s23 = sld [smem:[%s10961_s0 + %s9291_s20]]  }
 0xc83   :  { %v3244_v52 = vadd.f32 %v3242_v49, %v9724_v54  ;;  %8534 = vmatprep.subr.bf16.mxu0 %v9248_v0  ;;  %v9017_v54 = vld [vmem:[%s9951_s21 + $0x18] sm:$0xff]   ;;  %v10056_v48 = vld [vmem:[%s10002_s15] sm:$0xff]   ;;  %s7508_s21 = sld [smem:[%s10961_s0 + %s9283_s18]]   ;;  %s9299_s18 = smov 51  }
 0xc84   :  { %8523 = vmatpush3.bf16.msra.mxu1 %v9017_v54  ;;  %v10067_v54 = vld [vmem:[%s9990_s11 + $0x38] sm:$0xff]  }
 0xc85   :  { %v3248_v8 = vsel %vm638_vm6, %v3244_v52, 0.0  ;;  %8524 = vmatprep.subr.bf16.mxu1 %v9248_v0 }
 0xc86   :  { %3249 = vadd.xlane.f32.xlu1 %v3248_v8  ;;  %v10030_v8 = vld [vmem:[%s7497_s27] ss:$0 sm:$0xff]  ;;  %s7516_s27 = sld [smem:[%s10961_s0 + %s9292_s24]]  }
 0xc88   :  { %8525 = vmatpush3.bf16.msra.mxu1 %v9018_v26 }
 0xc89   :  { %8526 = vmatprep.subr.bf16.mxu1 %v9248_v0 }
 0xc8c   :  { %8527 = vmatpush3.bf16.msra.mxu1 %v9019_v11 }
 0xc8d   :  { %8528 = vmatprep.subr.bf16.mxu1 %v9248_v0 }
 0xc90   :  { %8529 = vmatpush3.bf16.msra.mxu1 %v9020_v62 }
 0xc91   :  { %8550 = vmatprep.subr.bf16.mxu1 %v9248_v0 }
 0xd0f   :  { %v3250_v9 = vpop.xlane.xlu1 %3249 }
 0xd10   :  { %v3252_v12 = vmul.f32 0.03125, %v3250_v9 }
 0xd12   :  { %v3254_v13 = vsub.f32 %v3244_v52, %v3252_v12 }
 0xd14   :  { %v3256_v14 = vmul.f32 %v3254_v13, %v3254_v13 }
 0xd16   :  { %v3260_v46 = vsel %vm638_vm6, %v3256_v14, 0.0  ;;  %v10040_v14 = vld [vmem:[%s10002_s15 + $0x8] sm:$0xff]  }
 0xd17   :  { %3261 = vadd.xlane.f32.xlu1 %v3260_v46 }
 0xda0   :  { %v3262_v47 = vpop.xlane.xlu1 %3261 }
 0xda1   :  { %v3264_v15 = vmul.f32 0.03125, %v3262_v47  ;;  %v10095_v47 = vld [vmem:[%s10002_s15 + $0x18] sm:$0xff]  }
 0xda3   :  { %v3266_v16 = vadd.f32 1e-05, %v3264_v15  ;;  %v10098_v15 = vld [vmem:[%s10020_s19 + $0x8] sm:$0xff]  }
 0xda5   :  { %9182 = vrsqrt.f32 %v3266_v16  ;;  %v10109_v16 = vld [vmem:[%s10002_s15 + $0x10] sm:$0xff]  }
 0xdb2   :  { %v9183_v20 = vpop.eup %9182 }
 0xdb3   :  { %v3270_v21 = vmul.f32 %v9183_v20, %v3254_v13  ;;  %v10037_v13 = vld [vmem:[%s9990_s11 + $0x18] sm:$0xff]   ;;  %v10137_v20 = vld [vmem:[%s10002_s15 + $0x30] sm:$0xff]   ;;  %s7511_s11 = sld [smem:[%s10961_s0 + %s9288_s8]]   ;;  %s9304_s8 = smov 54  }
 0xdb4   :  { %s7514_s15 = sld [smem:[%s10961_s0 + %s9289_s12]]   ;;  %s9305_s12 = smov 55  }
 0xdb5   :  { %v3278_v23 = vmul.f32 %v7624_v19, %v3270_v21  ;;  %v10126_v19 = vld [vmem:[%s10020_s19 + $0x28] sm:$0xff]   ;;  %v10140_v21 = vld [vmem:[%s10020_s19 + $0x20] sm:$0xff]  }
 0xdb7   :  { %v9962_v35 = vadd.f32 %v7625_v63, %v3278_v23  ;;  %v10161_v63 = vld [vmem:[%s10020_s19 + $0x10] sm:$0xff]   ;;  %v10170_v23 = vld [vmem:[%s10020_s19 + $0x38] sm:$0xff]  }
 0xdb9   :  { %v3287_v24 = vpack.c.bf16 %v9962_v35, %v3285_v58 }
 0xdbb   :  { %8519 = vmatmul.mubr.msk.bf16.vlgmr.msra.gmra.mxu0 %vm638_vm6, %v3287_v24 }
 0xdbc   :  { %8538 = vmatprep.mubr.msk.bf16.mxu0 %vm9250_vm0, %v9248_v0  ;;  %8535 = vmatpush3.bf16.msra.mxu0 %v9993_v29 }
 0xdbd   :  { %8536 = vmatprep.subr.bf16.mxu0 %v9248_v0 }
 0xdc0   :  { %8537 = vmatpush3.bf16.msra.mxu0 %v10008_v25 }
 0xdc1   :  { %8542 = vmatprep.subr.bf16.mxu0 %v9248_v0 }
 0xe7b   :  { %v3343_v10 = vpop.f32.mrf.mxu0 }
 0xe7c   :  { %v3344_v33 = vadd.f32 %v7626_v27, %v3343_v10 }
 0xe7d   :  { %v8520_v31 = vpop.f32.mrf.mxu0 }
 0xe7e   :  { %v3350_v38 = vmax.f32 %v3344_v33, 0.0 }
 0xe7f   :  { %v3346_v28 = vpop.f32.mrf.mxu0 }
 0xe80   :  { %v3347_v57 = vadd.f32 %v7626_v27, %v3346_v28  ;;  %v10199_v28 = vld [vmem:[%s10191_s1] ss:$0 sm:$0xff] }
 0xe81   :  { %v8521_v60 = vpop.f32.mrf.mxu0 }
 0xe82   :  { %v3351_v5 = vmax.f32 %v3347_v57, 0.0 }
 0xe84   :  { %v3352_v30 = vpack.c.bf16 %v3351_v5, %v3350_v38 }
 0xe86   :  { %8531 = vmatmul.mubr.msk.bf16.vlgmr.msra.gmra.mxu1 %vm3383_vm9, %v3352_v30 }
 0xe87   :  { %8554 = vmatprep.mubr.msk.bf16.mxu1 %vm9250_vm0, %v9248_v0  ;;  %8551 = vmatpush3.bf16.msra.mxu1 %v9996_v42 }
 0xe88   :  { %8552 = vmatprep.subr.bf16.mxu1 %v9248_v0 }
 0xe8b   :  { %8553 = vmatpush3.bf16.msra.mxu1 %v10011_v55 }
 0xe8c   :  { %8566 = vmatprep.subr.bf16.mxu1 %v9248_v0 }
 0xf46   :  { %v3421_v59 = vpop.f32.mrf.mxu1 }
 0xf47   :  { %v3422_v34 = vadd.f32 %v7630_v6, %v3421_v59  ;;  %v10203_v59 = vld [vmem:[%s10196_s5] ss:$0 sm:$0xff] }
 0xf48   :  { %v8532_v36 = vpop.f32.mrf.mxu1 }
 0xf49   :  { %v3428_v39 = vadd.f32 %v3422_v34, %v3285_v58  ;;  %v10177_v58 = vld [vmem:[%s10020_s19 + $0x30] sm:$0xff]   ;;  %s7512_s19 = sld [smem:[%s10961_s0 + %s9290_s16]]  }
 0xf4a   :  { %v3424_v40 = vpop.f32.mrf.mxu1 }
 0xf4b   :  { %v9983_v41 = vadd.f32 %v7630_v6, %v3424_v40  ;;  %v3430_v45 = vsel %vm638_vm6, %v3428_v39, 0.0 }
 0xf4c   :  { %3431 = vadd.xlane.f32.xlu0 %v3430_v45  ;;  %v8533_v56 = vpop.f32.mrf.mxu1 }
 0xf4d   :  { %v10207_v56 = vld [vmem:[%s10191_s1 + $0x2] ss:$0 sm:$0xff] }
 0xfd5   :  { %v3432_v1 = vpop.xlane.xlu0 %3431 }
 0xfd6   :  { %v3436_v43 = vmul.f32 0.03125, %v3432_v1 }
 0xfd8   :  { %v3438_v2 = vsub.f32 %v3428_v39, %v3436_v43 }
 0xfda   :  { %v3440_v3 = vmul.f32 %v3438_v2, %v3438_v2 }
 0xfdc   :  { %v3442_v53 = vsel %vm638_vm6, %v3440_v3, 0.0 }
 0xfdd   :  { %3443 = vadd.xlane.f32.xlu1 %v3442_v53 }
0x1066   :  { %v3444_v32 = vpop.xlane.xlu1 %3443 }
0x1067   :  { %v3448_v50 = vmul.f32 0.03125, %v3444_v32 }
0x1069   :  { %v3450_v7 = vadd.f32 1e-05, %v3448_v50 }
0x106b   :  { %9184 = vrsqrt.f32 %v3450_v7 }
0x1078   :  { %v9185_v49 = vpop.eup %9184 }
0x1079   :  { %v3454_v52 = vmul.f32 %v9185_v49, %v3438_v2  ;;  %v10218_v49 = vld [vmem:[%s10196_s5 + $0x2] ss:$0 sm:$0xff] }
0x107b   :  { %v3462_v9 = vmul.f32 %v10028_v51, %v3454_v52 }
0x107d   :  { %v10034_v12 = vadd.f32 %v10030_v8, %v3462_v9 }
0x107f   :  { %v10044_v46 = vpack.c.bf16 %v10034_v12, %v10034_v12 }
0x1081   :  { %8539 = vmatmul.mubr.msk.bf16.vlgmr.msra.gmra.mxu0 %vm638_vm6, %v10044_v46  ;;  %8555 = vmatmul.mubr.msk.bf16.vlgmr.msra.gmra.mxu1 %vm638_vm6, %v10044_v46 }
0x1082   :  { %8543 = vmatpush3.bf16.msra.mxu0 %v10037_v13  ;;  %8567 = vmatpush3.bf16.msra.mxu1 %v10040_v14 }
0x1083   :  { %8544 = vmatprep.subr.bf16.mxu0 %v9248_v0  ;;  %8568 = vmatprep.subr.bf16.mxu1 %v9248_v0 }
0x1084   :  { %8546 = vmatprep.mubr.msk.bf16.mxu0 %vm9250_vm0, %v9248_v0  ;;  %8570 = vmatprep.mubr.msk.bf16.mxu1 %vm9250_vm0, %v9248_v0 }
0x1086   :  { %8545 = vmatpush3.bf16.msra.mxu0 %v10053_v4  ;;  %8569 = vmatpush3.bf16.msra.mxu1 %v10056_v48 }
0x1087   :  { %8558 = vmatprep.subr.bf16.mxu0 %v9248_v0  ;;  %8582 = vmatprep.subr.bf16.mxu1 %v9248_v0 }
0x1089   :  { %8547 = vmatmul.mubr.msk.bf16.vlgmr.msra.gmra.mxu0 %vm638_vm6, %v10044_v46  ;;  %8571 = vmatmul.mubr.msk.bf16.vlgmr.msra.gmra.mxu1 %vm638_vm6, %v10044_v46 }
0x108a   :  { %8559 = vmatpush3.bf16.msra.mxu0 %v10067_v54  ;;  %8583 = vmatpush3.bf16.msra.mxu1 %v10070_v37 }
0x108b   :  { %8560 = vmatprep.subr.bf16.mxu0 %v9248_v0  ;;  %8584 = vmatprep.subr.bf16.mxu1 %v9248_v0 }
0x108c   :  { %8562 = vmatprep.mubr.msk.bf16.mxu0 %vm9250_vm0, %v9248_v0  ;;  %8586 = vmatprep.mubr.msk.bf16.mxu1 %vm9250_vm0, %v9248_v0 }
0x108e   :  { %8561 = vmatpush3.bf16.msra.mxu0 %v10081_v61  ;;  %8585 = vmatpush3.bf16.msra.mxu1 %v10084_v44 }
0x108f   :  { %8574 = vmatprep.subr.bf16.mxu0 %v9248_v0  ;;  %8598 = vmatprep.subr.bf16.mxu1 %v9248_v0 }
0x1091   :  { %8563 = vmatmul.mubr.msk.bf16.vlgmr.msra.gmra.mxu0 %vm638_vm6, %v10044_v46  ;;  %8587 = vmatmul.mubr.msk.bf16.vlgmr.msra.gmra.mxu1 %vm638_vm6, %v10044_v46 }
0x1092   :  { %8575 = vmatpush3.bf16.msra.mxu0 %v10095_v47  ;;  %8599 = vmatpush3.bf16.msra.mxu1 %v10098_v15 }
0x1093   :  { %8576 = vmatprep.subr.bf16.mxu0 %v9248_v0  ;;  %8600 = vmatprep.subr.bf16.mxu1 %v9248_v0 }
0x1094   :  { %8578 = vmatprep.mubr.msk.bf16.mxu0 %vm9250_vm0, %v9248_v0  ;;  %8602 = vmatprep.mubr.msk.bf16.mxu1 %vm9250_vm0, %v9248_v0 }
0x1096   :  { %8577 = vmatpush3.bf16.msra.mxu0 %v10109_v16  ;;  %8601 = vmatpush3.bf16.msra.mxu1 %v10112_v17 }
0x1097   :  { %8590 = vmatprep.subr.bf16.mxu0 %v9248_v0  ;;  %8614 = vmatprep.subr.bf16.mxu1 %v9248_v0 }
0x1099   :  { %8579 = vmatmul.mubr.msk.bf16.vlgmr.msra.gmra.mxu0 %vm638_vm6, %v10044_v46  ;;  %8603 = vmatmul.mubr.msk.bf16.vlgmr.msra.gmra.mxu1 %vm638_vm6, %v10044_v46 }
0x109a   :  { %8591 = vmatpush3.bf16.msra.mxu0 %v10123_v18  ;;  %8615 = vmatpush3.bf16.msra.mxu1 %v10126_v19 }
0x109b   :  { %8592 = vmatprep.subr.bf16.mxu0 %v9248_v0  ;;  %8616 = vmatprep.subr.bf16.mxu1 %v9248_v0 }
0x109c   :  { %8594 = vmatprep.mubr.msk.bf16.mxu0 %vm9250_vm0, %v9248_v0  ;;  %8618 = vmatprep.mubr.msk.bf16.mxu1 %vm9250_vm0, %v9248_v0 }
0x109e   :  { %8593 = vmatpush3.bf16.msra.mxu0 %v10137_v20  ;;  %8617 = vmatpush3.bf16.msra.mxu1 %v10140_v21 }
0x109f   :  { %8606 = vmatprep.subr.bf16.mxu0 %v9248_v0  ;;  %8630 = vmatprep.subr.bf16.mxu1 %v9248_v0 }
0x10a1   :  { %8595 = vmatmul.mubr.msk.bf16.vlgmr.msra.gmra.mxu0 %vm638_vm6, %v10044_v46  ;;  %8619 = vmatmul.mubr.msk.bf16.vlgmr.msra.gmra.mxu1 %vm638_vm6, %v10044_v46 }
0x10a2   :  { %8607 = vmatpush3.bf16.msra.mxu0 %v10151_v22  ;;  %8610 = vmatprep.mubr.msk.bf16.mxu0 %vm9250_vm0, %v9248_v0 }
0x10a3   :  { %8608 = vmatprep.subr.bf16.mxu0 %v9248_v0  ;;  %8632 = vmatprep.mubr.msk.bf16.mxu1 %vm9250_vm0, %v9248_v0 }
0x10a6   :  { %8609 = vmatpush3.bf16.msra.mxu0 %v10161_v63 }
0x10a7   :  { %8622 = vmatprep.subr.bf16.mxu0 %v9248_v0 }
0x10a9   :  { %8611 = vmatmul.mubr.msk.bf16.vlgmr.msra.gmra.mxu0 %vm638_vm6, %v10044_v46 }
0x10aa   :  { %8623 = vmatpush3.bf16.msra.mxu0 %v10170_v23  ;;  %8626 = vmatprep.mubr.msk.bf16.mxu0 %vm9250_vm0, %v9248_v0 }
0x10ab   :  { %8624 = vmatprep.subr.bf16.mxu0 %v9248_v0 }
0x10ae   :  { %8625 = vmatpush3.bf16.msra.mxu0 %v10177_v58 }
0x10af   :  { %8636 = vmatprep.subr.bf16.mxu0 %v9248_v0 }
0x10b1   :  { %8627 = vmatmul.mubr.msk.bf16.vlgmr.msra.gmra.mxu0 %vm638_vm6, %v10044_v46 }
0x10b2   :  { %8638 = vmatprep.mubr.msk.bf16.mxu0 %vm9250_vm0, %v9248_v0 }
0x1141   :  { %v3546_v24 = vpop.f32.mrf.mxu0  ;;  %v3650_v26 = vpop.f32.mrf.mxu1 }
0x1142   :  { %v3547_v1 = vadd.f32 %v10203_v59, %v3546_v24 }
0x1143   :  { %v8540_v11 = vpop.f32.mrf.mxu0  ;;  %v8556_v62 = vpop.f32.mrf.mxu1 }
0x1144   :  { %v4172_v50 = vpack.c.bf16 %v3547_v1, %v3547_v1  ;;  %v10223_v62 = vld [vmem:[%s10191_s1 + $0x1] ss:$0 sm:$0xff] }
0x1145   :  { %v3549_v27 = vpop.f32.mrf.mxu0  ;;  %v3653_v10 = vpop.f32.mrf.mxu1 }
0x1146   :  { %v10226_v27 = vld [vmem:[%s10212_s9] ss:$0 sm:$0xff]  ;;  %v3651_v10 = vadd.f32 %v10218_v49, %v3650_v26 }
0x1147   :  { %v8541_v31 = vpop.f32.mrf.mxu0  ;;  %v8557_v33 = vpop.f32.mrf.mxu1 }
0x1149   :  { %v3598_v57 = vpop.f32.mrf.mxu0  ;;  %v3778_v60 = vpop.f32.mrf.mxu1 }
0x114a   :  { %v3779_v38 = vadd.f32 %v10199_v28, %v3778_v60 }
0x114b   :  { %v8548_v5 = vpop.f32.mrf.mxu0  ;;  %v8572_v30 = vpop.f32.mrf.mxu1 }
0x114c   :  { %v4176_v6 = vpack.c.bf16 %v3779_v38, %v3779_v38 }
0x114d   :  { %v3601_v34 = vpop.f32.mrf.mxu0  ;;  %v3781_v36 = vpop.f32.mrf.mxu1 }
0x114e   :  { %v4184_v39 = vsel %vm1515_vm7, %v4176_v6, 0  ;;  %v4174_v6 = vpack.c.bf16 %v3651_v10, %v3651_v10  ;;  %v10252_v10 = vld [vmem:[%s10196_s5 + $0x3] ss:$0 sm:$0xff] }
0x114f   :  { %v8549_v40 = vpop.f32.mrf.mxu0  ;;  %v8573_v45 = vpop.f32.mrf.mxu1  ;;  %8631 = vmatpush3.bf16.xpose.msra.mxu1 %v4184_v39  ;;  %v10235_v39 = vld [vmem:[%s10196_s5 + $0x1] ss:$0 sm:$0xff]  ;;  %s7515_s5 = sld [smem:[%s10961_s0 + %s9295_s2]]  }
0x1150   :  { %8642 = vmatprep.subr.bf16.mxu1 %v9248_v0 }
0x1151   :  { %v3702_v43 = vpop.f32.mrf.mxu0  ;;  %v3882_v2 = vpop.f32.mrf.mxu1 }
0x1152   :  { %v3883_v3 = vadd.f32 %v10207_v56, %v3882_v2 }
0x1153   :  { %v8564_v53 = vpop.f32.mrf.mxu0  ;;  %v8588_v32 = vpop.f32.mrf.mxu1 }
0x1154   :  { %v4178_v7 = vpack.c.bf16 %v3883_v3, %v3883_v3  ;;  %v10241_v53 = vld [vmem:[%s10191_s1 + $0x3] ss:$0 sm:$0xff]  ;;  %v3599_v32 = vadd.f32 %v10235_v39, %v3598_v57  ;;  %s10633_s1 = sld [smem:[%s10961_s0 + %s9294_s28]]  }
0x1155   :  { %v3705_v52 = vpop.f32.mrf.mxu0  ;;  %v3885_v9 = vpop.f32.mrf.mxu1 }
0x1156   :  { %v4276_v46 = vsel %vm1515_vm7, %v4178_v7, 0  ;;  %8633 = vmatmul.mubr.msk.bf16.vlgmr.msra.gmra.mxu1 %vm1515_vm7, %v4172_v50 }
0x1157   :  { %v8565_v24 = vpop.f32.mrf.mxu0  ;;  %v8589_v11 = vpop.f32.mrf.mxu1  ;;  %8643 = vmatpush3.bf16.xpose.msra.mxu1 %v4276_v46  ;;  %8644 = vmatprep.mubr.msk.bf16.mxu1 %vm9250_vm0, %v9248_v0 }
0x1158   :  { %8654 = vmatprep.subr.bf16.mxu1 %v9248_v0  ;;  %v4173_v24 = vpack.c.bf16 %v3599_v32, %v3599_v32 }
0x1159   :  { %v3830_v31 = vpop.f32.mrf.mxu0  ;;  %v4010_v33 = vpop.f32.mrf.mxu1 }
0x115a   :  { %v3831_v60 = vadd.f32 %v10223_v62, %v3830_v31  ;;  %v4011_v38 = vadd.f32 %v10226_v27, %v4010_v33 }
0x115b   :  { %v8580_v5 = vpop.f32.mrf.mxu0  ;;  %v8604_v30 = vpop.f32.mrf.mxu1 }
0x115c   :  { %v4177_v34 = vpack.c.bf16 %v3831_v60, %v3831_v60  ;;  %v4416_v36 = vpack.c.bf16 %v4011_v38, %v4011_v38  ;;  %v10257_v5 = vld [vmem:[%s10212_s9 + $0x1] ss:$0 sm:$0xff]  ;;  %v3703_v30 = vadd.f32 %v10252_v10, %v3702_v43 }
0x115d   :  { %v3833_v40 = vpop.f32.mrf.mxu0  ;;  %v4013_v45 = vpop.f32.mrf.mxu1 }
0x115e   :  { %v4230_v26 = vsel %vm1515_vm7, %v4177_v34, 0  ;;  %v4424_v1 = vsel %vm1759_vm8, %v4416_v36, 0  ;;  %8645 = vmatmul.mubr.msk.bf16.vlgmr.msra.gmra.mxu1 %vm1515_vm7, %v4174_v6  ;;  %v4175_v40 = vpack.c.bf16 %v3703_v30, %v3703_v30 }
0x115f   :  { %v8581_v2 = vpop.f32.mrf.mxu0  ;;  %v8605_v3 = vpop.f32.mrf.mxu1  ;;  %8637 = vmatpush3.bf16.xpose.msra.mxu0 %v4230_v26  ;;  %8655 = vmatpush3.bf16.msra.mxu1 %v4424_v1 }
0x1160   :  { %8648 = vmatprep.subr.bf16.mxu0 %v9248_v0  ;;  %8656 = vmatprep.mubr.msk.bf16.mxu1 %vm9250_vm0, %v9248_v0 }
0x1161   :  { %v3934_v50 = vpop.f32.mrf.mxu0  ;;  %v10247_v7 = vpop.f32.mrf.mxu1  ;;  %8666 = vmatprep.subr.bf16.mxu1 %v9248_v0 }
0x1162   :  { %v3935_v52 = vadd.f32 %v10241_v53, %v3934_v50 }
0x1163   :  { %v8596_v9 = vpop.f32.mrf.mxu0  ;;  %v8620_v46 = vpop.f32.mrf.mxu1 }
0x1164   :  { %v4179_v11 = vpack.c.bf16 %v3935_v52, %v3935_v52 }
0x1165   :  { %v3937_v57 = vpop.f32.mrf.mxu0  ;;  %v4117_v31 = vpop.f32.mrf.mxu1 }
0x1166   :  { %v4322_v33 = vsel %vm1515_vm7, %v4179_v11, 0  ;;  %8639 = vmatmul.mubr.msk.bf16.vlgmr.msra.gmra.mxu0 %vm1515_vm7, %v4173_v24 }
0x1167   :  { %v8597_v60 = vpop.f32.mrf.mxu0  ;;  %v8621_v38 = vpop.f32.mrf.mxu1  ;;  %8649 = vmatpush3.bf16.xpose.msra.mxu0 %v4322_v33  ;;  %8650 = vmatprep.mubr.msk.bf16.mxu0 %vm9250_vm0, %v9248_v0 }
0x1168   :  { %8660 = vmatprep.subr.bf16.mxu0 %v9248_v0 }
0x1169   :  { %v4062_v6 = vpop.f32.mrf.mxu0 }
0x116a   :  { %v4063_v34 = vadd.f32 %v10257_v5, %v4062_v6 }
0x116b   :  { %v8612_v36 = vpop.f32.mrf.mxu0 }
0x116c   :  { %v4417_v45 = vpack.c.bf16 %v4063_v34, %v4063_v34 }
0x116d   :  { %v4065_v26 = vpop.f32.mrf.mxu0 }
0x116e   :  { %v4470_v1 = vsel %vm1759_vm8, %v4417_v45, 0  ;;  %8651 = vmatmul.mubr.msk.bf16.vlgmr.msra.gmra.mxu0 %vm1515_vm7, %v4175_v40 }
0x116f   :  { %v8613_v2 = vpop.f32.mrf.mxu0  ;;  %8661 = vmatpush3.bf16.msra.mxu0 %v4470_v1  ;;  %8662 = vmatprep.mubr.msk.bf16.mxu0 %vm9250_vm0, %v9248_v0 }
0x1170   :  { %8672 = vmatprep.subr.bf16.mxu0 %v9248_v0 }
0x1171   :  { %v10269_v43 = vpop.f32.mrf.mxu0 }
0x1173   :  { %v8628_v3 = vpop.f32.mrf.mxu0 }
0x1175   :  { %v4169_v32 = vpop.f32.mrf.mxu0 }
0x1177   :  { %v8629_v50 = vpop.f32.mrf.mxu0 }
0x1216   :  { %v4220_v52 = vpop.f32.mrf.mxu1 }
0x1217   :  { %v4364_v9 = vmul.f32 0.35355338, %v4220_v52 }
0x1218   :  { %v8634_v46 = vpop.f32.mrf.mxu1 }
0x1219   :  { %v4368_v24 = vsel %vm1515_vm7, %v4364_v9, -inf }
0x121a   :  { %4369 = vmax.xlane.f32.xlu0 %v4368_v24  ;;  %v4223_v11 = vpop.f32.mrf.mxu1 }
0x121c   :  { %v8635_v57 = vpop.f32.mrf.mxu1 }
0x121e   :  { %v4312_v31 = vpop.f32.mrf.mxu1 }
0x121f   :  { %v4366_v33 = vmul.f32 0.35355338, %v4312_v31 }
0x1220   :  { %v8646_v60 = vpop.f32.mrf.mxu1 }
0x1221   :  { %v4374_v38 = vsel %vm1515_vm7, %v4366_v33, -inf }
0x1222   :  { %4375 = vmax.xlane.f32.xlu0 %v4374_v38  ;;  %v4315_v30 = vpop.f32.mrf.mxu1 }
0x1224   :  { %v8647_v6 = vpop.f32.mrf.mxu1 }
0x1226   :  { %v4266_v34 = vpop.f32.mrf.mxu0 }
0x1227   :  { %v4365_v36 = vmul.f32 0.35355338, %v4266_v34 }
0x1228   :  { %v8640_v40 = vpop.f32.mrf.mxu0 }
0x1229   :  { %v4371_v45 = vsel %vm1515_vm7, %v4365_v36, -inf }
0x122a   :  { %4372 = vmax.xlane.f32.xlu1 %v4371_v45  ;;  %v4269_v26 = vpop.f32.mrf.mxu0 }
0x122c   :  { %v8641_v1 = vpop.f32.mrf.mxu0 }
0x122e   :  { %v4358_v2 = vpop.f32.mrf.mxu0 }
0x122f   :  { %v4367_v3 = vmul.f32 0.35355338, %v4358_v2 }
0x1230   :  { %v8652_v32 = vpop.f32.mrf.mxu0 }
0x1231   :  { %v4377_v50 = vsel %vm1515_vm7, %v4367_v3, -inf }
0x1232   :  { %4378 = vmax.xlane.f32.xlu1 %v4377_v50  ;;  %v4361_v52 = vpop.f32.mrf.mxu0 }
0x1234   :  { %v8653_v46 = vpop.f32.mrf.mxu0 }
0x12a3   :  { %v4370_v24 = vpop.xlane.xlu0 %4369 }
0x12a4   :  { %v4380_v11 = vsub.f32 %v4364_v9, %v4370_v24 }
0x12a6   :  { %v4384_v57 = vmul.f32 1.442695, %v4380_v11  ;;  %v10283_v11 = vld [vmem:[%s10212_s9 + $0x2] ss:$0 sm:$0xff] }
0x12a8   :  { %9186 = vpow2.f32 %v4384_v57 }
0x12ab   :  { %v4376_v31 = vpop.xlane.xlu0 %4375 }
0x12ac   :  { %v4382_v60 = vsub.f32 %v4366_v33, %v4376_v31  ;;  %v3429_v33 = vadd.f32 %v9983_v41, %v9962_v35  ;;  %v4115_v35 = vadd.f32 %v10283_v11, %v10247_v7 }
0x12ae   :  { %v4388_v38 = vmul.f32 1.442695, %v4382_v60 }
0x12b0   :  { %9188 = vpow2.f32 %v4388_v38  ;;  %v4418_v38 = vpack.c.bf16 %v4115_v35, %v4115_v35 }
0x12b3   :  { %v4373_v30 = vpop.xlane.xlu1 %4372 }
0x12b4   :  { %v4381_v6 = vsub.f32 %v4365_v36, %v4373_v30  ;;  %v3433_v36 = vsel %vm638_vm6, %v3429_v33, 0.0 }
0x12b5   :  { %v9187_v34 = vpop.eup %9186 }
0x12b6   :  { %v4386_v40 = vmul.f32 1.442695, %v4381_v6  ;;  %v4392_v45 = vsel %vm1515_vm7, %v9187_v34, 0.0 }
0x12b7   :  { %4393 = vadd.xlane.f32.xlu0 %v4392_v45 }
0x12b8   :  { %9190 = vpow2.f32 %v4386_v40 }
0x12bb   :  { %v4379_v26 = vpop.xlane.xlu1 %4378 }
0x12bc   :  { %v4383_v1 = vsub.f32 %v4367_v3, %v4379_v26 }
0x12bd   :  { %v9189_v2 = vpop.eup %9188 }
0x12be   :  { %v4390_v32 = vmul.f32 1.442695, %v4383_v1  ;;  %v4398_v9 = vsel %vm1515_vm7, %v9189_v2, 0.0  ;;  %v4516_v1 = vsel %vm1759_vm8, %v4418_v38, 0 }
0x12bf   :  { %4399 = vadd.xlane.f32.xlu0 %v4398_v9  ;;  %v10294_v9 = vld [vmem:[%s10212_s9 + $0x3] ss:$0 sm:$0xff]  ;;  %s7517_s9 = sld [smem:[%s10961_s0 + %s9296_s6]]  }
0x12c0   :  { %9192 = vpow2.f32 %v4390_v32 }
0x12c3   :  { %3434 = vadd.xlane.f32.xlu0 %v3433_v36 }
0x12c5   :  { %v9191_v50 = vpop.eup %9190 }
0x12c6   :  { %v4395_v52 = vsel %vm1515_vm7, %v9191_v50, 0.0 }
0x12c7   :  { %4396 = vadd.xlane.f32.xlu1 %v4395_v52  ;;  %v4167_v52 = vadd.f32 %v10294_v9, %v10269_v43 }
0x12cd   :  { %v9193_v46 = vpop.eup %9192 }
0x12ce   :  { %v4401_v3 = vsel %vm1515_vm7, %v9193_v46, 0.0 }
0x12cf   :  { %4402 = vadd.xlane.f32.xlu1 %v4401_v3 }
0x1340   :  { %v4394_v24 = vpop.xlane.xlu0 %4393 }
0x1341   :  { %9194 = vrcp.f32 %v4394_v24  ;;  %v4419_v24 = vpack.c.bf16 %v4167_v52, %v4167_v52 }
0x1348   :  { %v4400_v57 = vpop.xlane.xlu0 %4399 }
0x1349   :  { %9196 = vrcp.f32 %v4400_v57 }
0x134c   :  { %v3435_v41 = vpop.xlane.xlu0 %3434 }
0x134d   :  { %v3437_v31 = vmul.f32 0.03125, %v3435_v41  ;;  %v4562_v41 = vsel %vm1759_vm8, %v4419_v24, 0 }
0x134e   :  { %v9195_v60 = vpop.eup %9194 }
0x134f   :  { %v4405_v30 = vmul.f32 %v9195_v60, %v9187_v34  ;;  %v3439_v6 = vsub.f32 %v3429_v33, %v3437_v31 }
0x1350   :  { %v4397_v40 = vpop.xlane.xlu1 %4396 }
0x1351   :  { %v4412_v45 = vpack.c.bf16 %v4405_v30, %v4405_v30  ;;  %9198 = vrcp.f32 %v4397_v40  ;;  %v3441_v26 = vmul.f32 %v3439_v6, %v3439_v6 }
0x1353   :  { %8657 = vmatmul.mubr.msk.bf16.vlgmr.msra.gmra.mxu1 %vm1515_vm7, %v4412_v45  ;;  %v3445_v32 = vsel %vm638_vm6, %v3441_v26, 0.0  ;;  %v388_v26 = vld [vmem:[%s10312_s13 + $0x8] sm:$0xf] }
0x1354   :  { %8667 = vmatpush3.bf16.msra.mxu1 %v4516_v1  ;;  %3446 = vadd.xlane.f32.xlu1 %v3445_v32 }
0x1355   :  { %8668 = vmatprep.mubr.msk.bf16.mxu1 %vm9250_vm0, %v9248_v0  ;;  %8678 = vmatprep.subr.bf16.mxu1 %v9248_v0 }
0x1356   :  { %v9197_v7 = vpop.eup %9196 }
0x1357   :  { %v4409_v34 = vmul.f32 %v9197_v7, %v9189_v2  ;;  %v10328_v7 = vsel %vm1759_vm8, %v388_v26, 0 }
0x1358   :  { %v4403_v33 = vpop.xlane.xlu1 %4402 }
0x1359   :  { %v4414_v36 = vpack.c.bf16 %v4409_v34, %v4409_v34  ;;  %9200 = vrcp.f32 %v4403_v33 }
0x135b   :  { %8669 = vmatmul.mubr.msk.bf16.vlgmr.msra.gmra.mxu1 %vm1515_vm7, %v4414_v36 }
0x135c   :  { %8680 = vmatprep.mubr.msk.bf16.mxu1 %vm9250_vm0, %v9248_v0 }
0x135e   :  { %v9199_v3 = vpop.eup %9198 }
0x135f   :  { %v4407_v57 = vmul.f32 %v9199_v3, %v9191_v50  ;;  %v386_v50 = vld [vmem:[%s10312_s13] sm:$0xf] }
0x1360   :  { %v10316_v60 = vsel %vm1759_vm8, %v386_v50, 0 }
0x1361   :  { %v4413_v35 = vpack.c.bf16 %v4407_v57, %v4407_v57  ;;  %8679 = vmatpush3.bf16.msra.mxu1 %v10316_v60 }
0x1362   :  { %8690 = vmatprep.subr.bf16.mxu1 %v9248_v0 }
0x1363   :  { %8663 = vmatmul.mubr.msk.bf16.vlgmr.msra.gmra.mxu0 %vm1515_vm7, %v4413_v35 }
0x1364   :  { %8673 = vmatpush3.bf16.msra.mxu0 %v4562_v41  ;;  %8674 = vmatprep.mubr.msk.bf16.mxu0 %vm9250_vm0, %v9248_v0 }
0x1365   :  { %8684 = vmatprep.subr.bf16.mxu0 %v9248_v0 }
0x1366   :  { %v9201_v43 = vpop.eup %9200 }
0x1367   :  { %v4411_v2 = vmul.f32 %v9201_v43, %v9193_v46  ;;  %v387_v46 = vld [vmem:[%s10312_s13 + $0x4] sm:$0xf] }
0x1368   :  { %v10322_v38 = vsel %vm1759_vm8, %v387_v46, 0 }
0x1369   :  { %v4415_v31 = vpack.c.bf16 %v4411_v2, %v4411_v2 }
0x136b   :  { %8675 = vmatmul.mubr.msk.bf16.vlgmr.msra.gmra.mxu0 %vm1515_vm7, %v4415_v31  ;;  %v389_v31 = vld [vmem:[%s10312_s13 + $0xc] sm:$0xf]  ;;  %s7521_s13 = sld [smem:[%s10961_s0 + %s9297_s10]]  }
0x136c   :  { %8686 = vmatprep.mubr.msk.bf16.mxu0 %vm9250_vm0, %v9248_v0  ;;  %8685 = vmatpush3.bf16.msra.mxu0 %v10322_v38 }
0x136d   :  { %8696 = vmatprep.subr.bf16.mxu0 %v9248_v0 }
0x13dd   :  { %v3447_v30 = vpop.xlane.xlu1 %3446 }
0x13de   :  { %v3449_v40 = vmul.f32 0.03125, %v3447_v30 }
0x13e0   :  { %v3451_v45 = vadd.f32 1e-05, %v3449_v40 }
0x13e2   :  { %9202 = vrsqrt.f32 %v3451_v45 }
0x13ef   :  { %v9203_v34 = vpop.eup %9202 }
0x13f0   :  { %v3455_v52 = vmul.f32 %v9203_v34, %v3439_v6 }
0x13f2   :  { %v3463_v57 = vmul.f32 %v10028_v51, %v3455_v52 }
0x13f4   :  { %v10341_v2 = vadd.f32 %v10030_v8, %v3463_v57 }
0x13f6   :  { %v10348_v51 = vpack.c.bf16 %v10341_v2, %v10341_v2 }
0x1413   :  { %v4460_v1 = vpop.f32.mrf.mxu1 }
0x1414   :  { %v4604_v32 = vpack.c.bf16 %v4460_v1, %v4460_v1 }
0x1415   :  { %v8658_v33 = vpop.f32.mrf.mxu1 }
0x1416   :  { %8681 = vmatmul.mubr.msk.bf16.vlgmr.msra.gmra.mxu1 %vm1515_vm7, %v4604_v32 }
0x1417   :  { %v4463_v36 = vpop.f32.mrf.mxu1  ;;  %8691 = vmatpush3.bf16.msra.mxu1 %v10328_v7  ;;  %8692 = vmatprep.mubr.msk.bf16.mxu1 %vm9250_vm0, %v9248_v0 }
0x1418   :  { %8702 = vmatprep.subr.bf16.mxu1 %v9248_v0 }
0x1419   :  { %v8659_v3 = vpop.f32.mrf.mxu1 }
0x141b   :  { %v4552_v24 = vpop.f32.mrf.mxu1 }
0x141c   :  { %v4606_v35 = vpack.c.bf16 %v4552_v24, %v4552_v24 }
0x141d   :  { %v8670_v41 = vpop.f32.mrf.mxu1 }
0x141e   :  { %8693 = vmatmul.mubr.msk.bf16.vlgmr.msra.gmra.mxu1 %vm1515_vm7, %v4606_v35 }
0x141f   :  { %v4555_v43 = vpop.f32.mrf.mxu1  ;;  %8703 = vmatpush3.bf16.msra.mxu1 %v9993_v29  ;;  %8706 = vmatprep.mubr.msk.bf16.mxu1 %vm9250_vm0, %v9248_v0  ;;  %v10352_v29 = vsel %vm1759_vm8, %v389_v31, 0 }
0x1420   :  { %8704 = vmatprep.subr.bf16.mxu1 %v9248_v0 }
0x1421   :  { %v8671_v6 = vpop.f32.mrf.mxu1 }
0x1423   :  { %v4506_v50 = vpop.f32.mrf.mxu0  ;;  %8705 = vmatpush3.bf16.msra.mxu1 %v10008_v25 }
0x1424   :  { %v4605_v46 = vpack.c.bf16 %v4506_v50, %v4506_v50  ;;  %8718 = vmatprep.subr.bf16.mxu1 %v9248_v0 }
0x1425   :  { %v8664_v30 = vpop.f32.mrf.mxu0 }
0x1426   :  { %8687 = vmatmul.mubr.msk.bf16.vlgmr.msra.gmra.mxu0 %vm1515_vm7, %v4605_v46  ;;  %8707 = vmatmul.mubr.msk.bf16.vlgmr.msra.gmra.mxu1 %vm638_vm6, %v10348_v51 }
0x1427   :  { %v4509_v8 = vpop.f32.mrf.mxu0  ;;  %8697 = vmatpush3.bf16.msra.mxu0 %v10352_v29  ;;  %8719 = vmatpush3.bf16.msra.mxu1 %v9996_v42 }
0x1428   :  { %8720 = vmatprep.subr.bf16.mxu1 %v9248_v0  ;;  %8698 = vmatprep.mubr.msk.bf16.mxu0 %vm9250_vm0, %v9248_v0 }
0x1429   :  { %v8665_v25 = vpop.f32.mrf.mxu0  ;;  %8722 = vmatprep.mubr.msk.bf16.mxu1 %vm9250_vm0, %v9248_v0  ;;  %8710 = vmatprep.subr.bf16.mxu0 %v9248_v0 }
0x142b   :  { %v4598_v40 = vpop.f32.mrf.mxu0  ;;  %8721 = vmatpush3.bf16.msra.mxu1 %v10011_v55 }
0x142c   :  { %v4607_v45 = vpack.c.bf16 %v4598_v40, %v4598_v40  ;;  %8734 = vmatprep.subr.bf16.mxu1 %v9248_v0 }
0x142d   :  { %v8676_v26 = vpop.f32.mrf.mxu0 }
0x142e   :  { %8699 = vmatmul.mubr.msk.bf16.vlgmr.msra.gmra.mxu0 %vm1515_vm7, %v4607_v45  ;;  %8723 = vmatmul.mubr.msk.bf16.vlgmr.msra.gmra.mxu1 %vm638_vm6, %v10348_v51 }
0x142f   :  { %v4601_v42 = vpop.f32.mrf.mxu0  ;;  %8711 = vmatpush3.bf16.msra.mxu0 %v10037_v13  ;;  %8735 = vmatpush3.bf16.msra.mxu1 %v10040_v14 }
0x1430   :  { %8712 = vmatprep.subr.bf16.mxu0 %v9248_v0  ;;  %8736 = vmatprep.subr.bf16.mxu1 %v9248_v0 }
0x1431   :  { %v8677_v1 = vpop.f32.mrf.mxu0  ;;  %8714 = vmatprep.mubr.msk.bf16.mxu0 %vm9250_vm0, %v9248_v0  ;;  %8738 = vmatprep.mubr.msk.bf16.mxu1 %vm9250_vm0, %v9248_v0 }
0x1433   :  { %8713 = vmatpush3.bf16.msra.mxu0 %v10053_v4  ;;  %8737 = vmatpush3.bf16.msra.mxu1 %v10056_v48 }
0x1434   :  { %8726 = vmatprep.subr.bf16.mxu0 %v9248_v0  ;;  %8750 = vmatprep.subr.bf16.mxu1 %v9248_v0 }
0x1436   :  { %8715 = vmatmul.mubr.msk.bf16.vlgmr.msra.gmra.mxu0 %vm638_vm6, %v10348_v51  ;;  %8739 = vmatmul.mubr.msk.bf16.vlgmr.msra.gmra.mxu1 %vm638_vm6, %v10348_v51 }
0x1437   :  { %8727 = vmatpush3.bf16.msra.mxu0 %v10067_v54  ;;  %8751 = vmatpush3.bf16.msra.mxu1 %v10070_v37 }
0x1438   :  { %8728 = vmatprep.subr.bf16.mxu0 %v9248_v0  ;;  %8752 = vmatprep.subr.bf16.mxu1 %v9248_v0 }
0x1439   :  { %8730 = vmatprep.mubr.msk.bf16.mxu0 %vm9250_vm0, %v9248_v0  ;;  %8754 = vmatprep.mubr.msk.bf16.mxu1 %vm9250_vm0, %v9248_v0 }
0x143b   :  { %8729 = vmatpush3.bf16.msra.mxu0 %v10081_v61  ;;  %8753 = vmatpush3.bf16.msra.mxu1 %v10084_v44 }
0x143c   :  { %8742 = vmatprep.subr.bf16.mxu0 %v9248_v0  ;;  %8766 = vmatprep.subr.bf16.mxu1 %v9248_v0 }
0x143e   :  { %8731 = vmatmul.mubr.msk.bf16.vlgmr.msra.gmra.mxu0 %vm638_vm6, %v10348_v51  ;;  %8755 = vmatmul.mubr.msk.bf16.vlgmr.msra.gmra.mxu1 %vm638_vm6, %v10348_v51 }
0x143f   :  { %8743 = vmatpush3.bf16.msra.mxu0 %v10095_v47  ;;  %8767 = vmatpush3.bf16.msra.mxu1 %v10098_v15 }
0x1440   :  { %8744 = vmatprep.subr.bf16.mxu0 %v9248_v0  ;;  %8768 = vmatprep.subr.bf16.mxu1 %v9248_v0 }
0x1441   :  { %8746 = vmatprep.mubr.msk.bf16.mxu0 %vm9250_vm0, %v9248_v0  ;;  %8770 = vmatprep.mubr.msk.bf16.mxu1 %vm9250_vm0, %v9248_v0 }
0x1443   :  { %8745 = vmatpush3.bf16.msra.mxu0 %v10109_v16  ;;  %8769 = vmatpush3.bf16.msra.mxu1 %v10112_v17 }
0x1444   :  { %8758 = vmatprep.subr.bf16.mxu0 %v9248_v0  ;;  %8782 = vmatprep.subr.bf16.mxu1 %v9248_v0 }
0x1446   :  { %8747 = vmatmul.mubr.msk.bf16.vlgmr.msra.gmra.mxu0 %vm638_vm6, %v10348_v51  ;;  %8771 = vmatmul.mubr.msk.bf16.vlgmr.msra.gmra.mxu1 %vm638_vm6, %v10348_v51 }
0x1447   :  { %8759 = vmatpush3.bf16.msra.mxu0 %v10123_v18  ;;  %8783 = vmatpush3.bf16.msra.mxu1 %v10126_v19 }
0x1448   :  { %8760 = vmatprep.subr.bf16.mxu0 %v9248_v0  ;;  %8784 = vmatprep.subr.bf16.mxu1 %v9248_v0 }
0x1449   :  { %8762 = vmatprep.mubr.msk.bf16.mxu0 %vm9250_vm0, %v9248_v0  ;;  %8786 = vmatprep.mubr.msk.bf16.mxu1 %vm9250_vm0, %v9248_v0 }
0x144b   :  { %8761 = vmatpush3.bf16.msra.mxu0 %v10137_v20  ;;  %8785 = vmatpush3.bf16.msra.mxu1 %v10140_v21 }
0x144c   :  { %8774 = vmatprep.subr.bf16.mxu0 %v9248_v0  ;;  %8798 = vmatprep.subr.bf16.mxu1 %v9248_v0 }
0x144e   :  { %8763 = vmatmul.mubr.msk.bf16.vlgmr.msra.gmra.mxu0 %vm638_vm6, %v10348_v51  ;;  %8787 = vmatmul.mubr.msk.bf16.vlgmr.msra.gmra.mxu1 %vm638_vm6, %v10348_v51 }
0x144f   :  { %8775 = vmatpush3.bf16.msra.mxu0 %v10151_v22  ;;  %8778 = vmatprep.mubr.msk.bf16.mxu0 %vm9250_vm0, %v9248_v0 }
0x1450   :  { %8776 = vmatprep.subr.bf16.mxu0 %v9248_v0  ;;  %8800 = vmatprep.mubr.msk.bf16.mxu1 %vm9250_vm0, %v9248_v0 }
0x1453   :  { %8777 = vmatpush3.bf16.msra.mxu0 %v10161_v63 }
0x1454   :  { %8790 = vmatprep.subr.bf16.mxu0 %v9248_v0 }
0x1456   :  { %8779 = vmatmul.mubr.msk.bf16.vlgmr.msra.gmra.mxu0 %vm638_vm6, %v10348_v51 }
0x1457   :  { %8791 = vmatpush3.bf16.msra.mxu0 %v10170_v23  ;;  %8794 = vmatprep.mubr.msk.bf16.mxu0 %vm9250_vm0, %v9248_v0 }
0x1458   :  { %8792 = vmatprep.subr.bf16.mxu0 %v9248_v0 }
0x145b   :  { %8793 = vmatpush3.bf16.msra.mxu0 %v10177_v58 }
0x145c   :  { %8804 = vmatprep.subr.bf16.mxu0 %v9248_v0 }
0x145e   :  { %8795 = vmatmul.mubr.msk.bf16.vlgmr.msra.gmra.mxu0 %vm638_vm6, %v10348_v51 }
0x145f   :  { %8806 = vmatprep.mubr.msk.bf16.mxu0 %vm9250_vm0, %v9248_v0 }
0x14d6   :  { %v4648_v55 = vpop.f32.mrf.mxu1 }
0x14d7   :  { %v4792_v15 = vsel %vm638_vm6, %v4648_v55, 0.0 }
0x14d8   :  { %v8682_v13 = vpop.f32.mrf.mxu1 }
0x14da   :  { %v4651_v14 = vpop.f32.mrf.mxu1 }
0x14dc   :  { %v8683_v4 = vpop.f32.mrf.mxu1 }
0x14de   :  { %v4740_v48 = vpop.f32.mrf.mxu1 }
0x14df   :  { %v4795_v20 = vsel %vm638_vm6, %v4740_v48, 0.0 }
0x14e0   :  { %v8694_v54 = vpop.f32.mrf.mxu1 }
0x14e2   :  { %v4743_v37 = vpop.f32.mrf.mxu1 }
0x14e4   :  { %v8695_v61 = vpop.f32.mrf.mxu1 }
0x14e6   :  { %v4694_v44 = vpop.f32.mrf.mxu0  ;;  %v4837_v47 = vpop.f32.mrf.mxu1 }
0x14e7   :  { %v4793_v16 = vsel %vm638_vm6, %v4694_v44, 0.0  ;;  %v4838_v26 = vadd.f32 %v10203_v59, %v4837_v47 }
0x14e8   :  { %v4794_v17 = vadd.f32 %v4793_v16, %v4792_v15  ;;  %v8688_v18 = vpop.f32.mrf.mxu0  ;;  %v8708_v19 = vpop.f32.mrf.mxu1 }
0x14e9   :  { %v5283_v14 = vpack.c.bf16 %v4838_v26, %v4838_v26 }
0x14ea   :  { %v4697_v21 = vpop.f32.mrf.mxu0  ;;  %v4840_v22 = vpop.f32.mrf.mxu1  ;;  %v4796_v63 = vadd.f32 %v4795_v20, %v4794_v17 }
0x14ec   :  { %v8689_v23 = vpop.f32.mrf.mxu0  ;;  %v8709_v58 = vpop.f32.mrf.mxu1 }
0x14ee   :  { %v4786_v32 = vpop.f32.mrf.mxu0  ;;  %v4917_v34 = vpop.f32.mrf.mxu1 }
0x14ef   :  { %v4797_v33 = vsel %vm638_vm6, %v4786_v32, 0.0  ;;  %v4918_v59 = vadd.f32 %v10218_v49, %v4917_v34 }
0x14f0   :  { %v10458_v36 = vadd.f32 %v4797_v33, %v4796_v63  ;;  %v8700_v52 = vpop.f32.mrf.mxu0  ;;  %v8724_v3 = vpop.f32.mrf.mxu1 }
0x14f1   :  { %v5285_v19 = vpack.c.bf16 %v4918_v59, %v4918_v59 }
0x14f2   :  { %v4789_v24 = vpop.f32.mrf.mxu0  ;;  %v4920_v57 = vpop.f32.mrf.mxu1 }
0x14f4   :  { %v8701_v35 = vpop.f32.mrf.mxu0  ;;  %v8725_v41 = vpop.f32.mrf.mxu1 }
0x14f6   :  { %v4877_v43 = vpop.f32.mrf.mxu0  ;;  %v4997_v6 = vpop.f32.mrf.mxu1 }
0x14f7   :  { %v4998_v31 = vadd.f32 %v10199_v28, %v4997_v6 }
0x14f8   :  { %v8716_v50 = vpop.f32.mrf.mxu0  ;;  %v8740_v51 = vpop.f32.mrf.mxu1 }
0x14f9   :  { %v5287_v46 = vpack.c.bf16 %v4998_v31, %v4998_v31 }
0x14fa   :  { %v4880_v30 = vpop.f32.mrf.mxu0  ;;  %v5000_v8 = vpop.f32.mrf.mxu1 }
0x14fb   :  { %v5295_v25 = vsel %vm1515_vm7, %v5287_v46, 0 }
0x14fc   :  { %v8717_v40 = vpop.f32.mrf.mxu0  ;;  %v8741_v45 = vpop.f32.mrf.mxu1  ;;  %8799 = vmatpush3.bf16.xpose.msra.mxu1 %v5295_v25 }
0x14fd   :  { %8810 = vmatprep.subr.bf16.mxu1 %v9248_v0 }
0x14fe   :  { %v4957_v42 = vpop.f32.mrf.mxu0  ;;  %v5077_v1 = vpop.f32.mrf.mxu1 }
0x14ff   :  { %v5078_v55 = vadd.f32 %v10207_v56, %v5077_v1  ;;  %v4958_v31 = vadd.f32 %v10252_v10, %v4957_v42 }
0x1500   :  { %v8732_v13 = vpop.f32.mrf.mxu0  ;;  %v8756_v28 = vpop.f32.mrf.mxu1 }
0x1501   :  { %v5289_v4 = vpack.c.bf16 %v5078_v55, %v5078_v55  ;;  %v5286_v46 = vpack.c.bf16 %v4958_v31, %v4958_v31 }
0x1502   :  { %v4960_v48 = vpop.f32.mrf.mxu0  ;;  %v5080_v54 = vpop.f32.mrf.mxu1 }
0x1503   :  { %v5387_v37 = vsel %vm1515_vm7, %v5289_v4, 0  ;;  %8801 = vmatmul.mubr.msk.bf16.vlgmr.msra.gmra.mxu1 %vm1515_vm7, %v5283_v14 }
0x1504   :  { %v8733_v61 = vpop.f32.mrf.mxu0  ;;  %v8757_v44 = vpop.f32.mrf.mxu1  ;;  %8811 = vmatpush3.bf16.xpose.msra.mxu1 %v5387_v37  ;;  %8812 = vmatprep.mubr.msk.bf16.mxu1 %vm9250_vm0, %v9248_v0 }
0x1505   :  { %8822 = vmatprep.subr.bf16.mxu1 %v9248_v0 }
0x1506   :  { %v5037_v56 = vpop.f32.mrf.mxu0  ;;  %v5157_v47 = vpop.f32.mrf.mxu1 }
0x1507   :  { %v5038_v15 = vadd.f32 %v10223_v62, %v5037_v56  ;;  %v5158_v16 = vadd.f32 %v10226_v27, %v5157_v47  ;;  %v4878_v62 = vadd.f32 %v10235_v39, %v4877_v43 }
0x1508   :  { %v8748_v17 = vpop.f32.mrf.mxu0  ;;  %v8772_v18 = vpop.f32.mrf.mxu1 }
0x1509   :  { %v5288_v20 = vpack.c.bf16 %v5038_v15, %v5038_v15  ;;  %v5527_v21 = vpack.c.bf16 %v5158_v16, %v5158_v16  ;;  %v5284_v24 = vpack.c.bf16 %v4878_v62, %v4878_v62 }
0x150a   :  { %v5040_v22 = vpop.f32.mrf.mxu0  ;;  %v5160_v63 = vpop.f32.mrf.mxu1 }
0x150b   :  { %v5341_v23 = vsel %vm1515_vm7, %v5288_v20, 0  ;;  %v5535_v58 = vsel %vm1759_vm8, %v5527_v21, 0  ;;  %8813 = vmatmul.mubr.msk.bf16.vlgmr.msra.gmra.mxu1 %vm1515_vm7, %v5285_v19 }
0x150c   :  { %v8749_v49 = vpop.f32.mrf.mxu0  ;;  %v8773_v32 = vpop.f32.mrf.mxu1  ;;  %8805 = vmatpush3.bf16.xpose.msra.mxu0 %v5341_v23  ;;  %8823 = vmatpush3.bf16.msra.mxu1 %v5535_v58 }
0x150d   :  { %8816 = vmatprep.subr.bf16.mxu0 %v9248_v0  ;;  %8824 = vmatprep.mubr.msk.bf16.mxu1 %vm9250_vm0, %v9248_v0 }
0x150e   :  { %v5117_v27 = vpop.f32.mrf.mxu0  ;;  %v10480_v34 = vpop.f32.mrf.mxu1  ;;  %8834 = vmatprep.subr.bf16.mxu1 %v9248_v0 }
0x150f   :  { %v5118_v33 = vadd.f32 %v10241_v53, %v5117_v27 }
0x1510   :  { %v8764_v52 = vpop.f32.mrf.mxu0  ;;  %v8788_v3 = vpop.f32.mrf.mxu1 }
0x1511   :  { %v5290_v57 = vpack.c.bf16 %v5118_v33, %v5118_v33 }
0x1512   :  { %v5120_v35 = vpop.f32.mrf.mxu0  ;;  %v5240_v41 = vpop.f32.mrf.mxu1 }
0x1513   :  { %v5433_v39 = vsel %vm1515_vm7, %v5290_v57, 0  ;;  %8807 = vmatmul.mubr.msk.bf16.vlgmr.msra.gmra.mxu0 %vm1515_vm7, %v5284_v24  ;;  %v10506_v35 = vld [vmem:[%s7505_s17] ss:$0 sm:$0xff]  ;;  %s7522_s17 = sld [smem:[%s10961_s0 + %s9298_s14]]  }
0x1514   :  { %v8765_v43 = vpop.f32.mrf.mxu0  ;;  %v8789_v6 = vpop.f32.mrf.mxu1  ;;  %8817 = vmatpush3.bf16.xpose.msra.mxu0 %v5433_v39  ;;  %8818 = vmatprep.mubr.msk.bf16.mxu0 %vm9250_vm0, %v9248_v0  ;;  %v5904_v41 = vadd.f32 %v10506_v35, %v10458_v36 }
0x1515   :  { %8828 = vmatprep.subr.bf16.mxu0 %v9248_v0 }
0x1516   :  { %v5197_v53 = vpop.f32.mrf.mxu0 }
0x1517   :  { %v5198_v50 = vadd.f32 %v10257_v5, %v5197_v53 }
0x1518   :  { %v8780_v51 = vpop.f32.mrf.mxu0 }
0x1519   :  { %v5528_v30 = vpack.c.bf16 %v5198_v50, %v5198_v50  ;;  %v5906_v50 = vadd.f32 %v5904_v41, %v10034_v12  ;;  %v5238_v12 = vadd.f32 %v10283_v11, %v10480_v34 }
0x151a   :  { %v5200_v8 = vpop.f32.mrf.mxu0 }
0x151b   :  { %v5581_v25 = vsel %vm1759_vm8, %v5528_v30, 0  ;;  %8819 = vmatmul.mubr.msk.bf16.vlgmr.msra.gmra.mxu0 %vm1515_vm7, %v5286_v46  ;;  %v5908_v51 = vsel %vm638_vm6, %v5906_v50, 0.0 }
0x151c   :  { %v8781_v40 = vpop.f32.mrf.mxu0  ;;  %8829 = vmatpush3.bf16.msra.mxu0 %v5581_v25  ;;  %8830 = vmatprep.mubr.msk.bf16.mxu0 %vm9250_vm0, %v9248_v0 }
0x151d   :  { %8840 = vmatprep.subr.bf16.mxu0 %v9248_v0 }
0x151e   :  { %v10496_v10 = vpop.f32.mrf.mxu0 }
0x1520   :  { %v8796_v45 = vpop.f32.mrf.mxu0 }
0x1522   :  { %v5280_v26 = vpop.f32.mrf.mxu0 }
0x1524   :  { %v8797_v5 = vpop.f32.mrf.mxu0 }
0x15c3   :  { %v5331_v42 = vpop.f32.mrf.mxu1 }
0x15c4   :  { %v5475_v1 = vmul.f32 0.35355338, %v5331_v42  ;;  %v5529_v42 = vpack.c.bf16 %v5238_v12, %v5238_v12 }
0x15c5   :  { %v8802_v55 = vpop.f32.mrf.mxu1 }
0x15c6   :  { %v5479_v13 = vsel %vm1515_vm7, %v5475_v1, -inf }
0x15c7   :  { %5480 = vmax.xlane.f32.xlu0 %v5479_v13  ;;  %v5334_v28 = vpop.f32.mrf.mxu1 }
0x15c9   :  { %v8803_v14 = vpop.f32.mrf.mxu1 }
0x15cb   :  { %v5423_v4 = vpop.f32.mrf.mxu1 }
0x15cc   :  { %v5477_v48 = vmul.f32 0.35355338, %v5423_v4  ;;  %v5627_v4 = vsel %vm1759_vm8, %v5529_v42, 0 }
0x15cd   :  { %v8814_v54 = vpop.f32.mrf.mxu1 }
0x15ce   :  { %v5485_v37 = vsel %vm1515_vm7, %v5477_v48, -inf }
0x15cf   :  { %5486 = vmax.xlane.f32.xlu0 %v5485_v37  ;;  %v5426_v61 = vpop.f32.mrf.mxu1 }
0x15d0   :  { %v5278_v61 = vadd.f32 %v10294_v9, %v10496_v10 }
0x15d1   :  { %v8815_v44 = vpop.f32.mrf.mxu1 }
0x15d3   :  { %v5377_v59 = vpop.f32.mrf.mxu0 }
0x15d4   :  { %v5476_v56 = vmul.f32 0.35355338, %v5377_v59  ;;  %v5530_v59 = vpack.c.bf16 %v5278_v61, %v5278_v61  ;;  %v9046_v61 = vld [vmem:[%s7508_s21] sm:$0xff]  }
0x15d5   :  { %v8808_v47 = vpop.f32.mrf.mxu0 }
0x15d6   :  { %v5482_v15 = vsel %vm1515_vm7, %v5476_v56, -inf }
0x15d7   :  { %5483 = vmax.xlane.f32.xlu1 %v5482_v15  ;;  %v5380_v16 = vpop.f32.mrf.mxu0  ;;  %v5673_v15 = vsel %vm1759_vm8, %v5530_v59, 0 }
0x15d9   :  { %v8809_v17 = vpop.f32.mrf.mxu0 }
0x15db   :  { %v5469_v18 = vpop.f32.mrf.mxu0 }
0x15dc   :  { %v5478_v19 = vmul.f32 0.35355338, %v5469_v18 }
0x15dd   :  { %v8820_v20 = vpop.f32.mrf.mxu0 }
0x15de   :  { %v5488_v21 = vsel %vm1515_vm7, %v5478_v19, -inf }
0x15df   :  { %5489 = vmax.xlane.f32.xlu1 %v5488_v21  ;;  %v5472_v22 = vpop.f32.mrf.mxu0 }
0x15e1   :  { %v8821_v63 = vpop.f32.mrf.mxu0 }
0x1650   :  { %v5481_v23 = vpop.xlane.xlu0 %5480 }
0x1651   :  { %v5491_v58 = vsub.f32 %v5475_v1, %v5481_v23 }
0x1653   :  { %v5495_v49 = vmul.f32 1.442695, %v5491_v58 }
0x1655   :  { %9204 = vpow2.f32 %v5495_v49 }
0x1658   :  { %v5487_v32 = vpop.xlane.xlu0 %5486 }
0x1659   :  { %v5493_v62 = vsub.f32 %v5477_v48, %v5487_v32 }
0x165b   :  { %v5499_v27 = vmul.f32 1.442695, %v5493_v62 }
0x165d   :  { %9206 = vpow2.f32 %v5499_v27 }
0x1660   :  { %v5484_v33 = vpop.xlane.xlu1 %5483 }
0x1661   :  { %v5492_v52 = vsub.f32 %v5476_v56, %v5484_v33 }
0x1662   :  { %v9205_v3 = vpop.eup %9204 }
0x1663   :  { %v5497_v24 = vmul.f32 1.442695, %v5492_v52  ;;  %v5503_v57 = vsel %vm1515_vm7, %v9205_v3, 0.0 }
0x1664   :  { %5504 = vadd.xlane.f32.xlu0 %v5503_v57 }
0x1665   :  { %9208 = vpow2.f32 %v5497_v24 }
0x1668   :  { %v5490_v39 = vpop.xlane.xlu1 %5489 }
0x1669   :  { %v5494_v43 = vsub.f32 %v5478_v19, %v5490_v39 }
0x166a   :  { %v9207_v6 = vpop.eup %9206 }
0x166b   :  { %v5501_v31 = vmul.f32 1.442695, %v5494_v43  ;;  %v5509_v53 = vsel %vm1515_vm7, %v9207_v6, 0.0 }
0x166c   :  { %5510 = vadd.xlane.f32.xlu0 %v5509_v53 }
0x166d   :  { %9210 = vpow2.f32 %v5501_v31 }
0x1670   :  { %5909 = vadd.xlane.f32.xlu0 %v5908_v51 }
0x1672   :  { %v9209_v46 = vpop.eup %9208 }
0x1673   :  { %v5506_v30 = vsel %vm1515_vm7, %v9209_v46, 0.0 }
0x1674   :  { %5507 = vadd.xlane.f32.xlu1 %v5506_v30 }
0x167a   :  { %v9211_v8 = vpop.eup %9210 }
0x167b   :  { %v5512_v36 = vsel %vm1515_vm7, %v9211_v8, 0.0 }
0x167c   :  { %5513 = vadd.xlane.f32.xlu1 %v5512_v36 }
0x16ed   :  { %v5505_v25 = vpop.xlane.xlu0 %5504 }
0x16ee   :  { %9212 = vrcp.f32 %v5505_v25 }
0x16f5   :  { %v5511_v40 = vpop.xlane.xlu0 %5510 }
0x16f6   :  { %9214 = vrcp.f32 %v5511_v40 }
0x16f9   :  { %v5910_v45 = vpop.xlane.xlu0 %5909 }
0x16fa   :  { %v5914_v26 = vmul.f32 0.03125, %v5910_v45 }
0x16fb   :  { %v9213_v5 = vpop.eup %9212 }
0x16fc   :  { %v5516_v1 = vmul.f32 %v9213_v5, %v9205_v3  ;;  %v10517_v55 = vsub.f32 %v5906_v50, %v5914_v26 }
0x16fd   :  { %v5508_v13 = vpop.xlane.xlu1 %5507 }
0x16fe   :  { %v5523_v28 = vpack.c.bf16 %v5516_v1, %v5516_v1  ;;  %9216 = vrcp.f32 %v5508_v13  ;;  %v5918_v14 = vmul.f32 %v10517_v55, %v10517_v55 }
0x1700   :  { %8825 = vmatmul.mubr.msk.bf16.vlgmr.msra.gmra.mxu1 %vm1515_vm7, %v5523_v28  ;;  %v5920_v48 = vsel %vm638_vm6, %v5918_v14, 0.0 }
0x1701   :  { %8835 = vmatpush3.bf16.msra.mxu1 %v5627_v4  ;;  %5921 = vadd.xlane.f32.xlu0 %v5920_v48 }
0x1702   :  { %8836 = vmatprep.mubr.msk.bf16.mxu1 %vm9250_vm0, %v9248_v0  ;;  %8846 = vmatprep.subr.bf16.mxu1 %v9248_v0 }
0x1703   :  { %v9215_v11 = vpop.eup %9214 }
0x1704   :  { %v5520_v34 = vmul.f32 %v9215_v11, %v9207_v6 }
0x1705   :  { %v5514_v54 = vpop.xlane.xlu1 %5513 }
0x1706   :  { %v5525_v37 = vpack.c.bf16 %v5520_v34, %v5520_v34  ;;  %9218 = vrcp.f32 %v5514_v54 }
0x1708   :  { %8837 = vmatmul.mubr.msk.bf16.vlgmr.msra.gmra.mxu1 %vm1515_vm7, %v5525_v37 }
0x1709   :  { %8847 = vmatpush3.bf16.msra.mxu1 %v10316_v60  ;;  %8848 = vmatprep.mubr.msk.bf16.mxu1 %vm9250_vm0, %v9248_v0 }
0x170a   :  { %8858 = vmatprep.subr.bf16.mxu1 %v9248_v0 }
0x170b   :  { %v9217_v44 = vpop.eup %9216 }
0x170c   :  { %v5518_v56 = vmul.f32 %v9217_v44, %v9209_v46 }
0x170e   :  { %v5524_v47 = vpack.c.bf16 %v5518_v56, %v5518_v56 }
0x1710   :  { %8831 = vmatmul.mubr.msk.bf16.vlgmr.msra.gmra.mxu0 %vm1515_vm7, %v5524_v47 }
0x1711   :  { %8841 = vmatpush3.bf16.msra.mxu0 %v5673_v15  ;;  %8842 = vmatprep.mubr.msk.bf16.mxu0 %vm9250_vm0, %v9248_v0 }
0x1712   :  { %8852 = vmatprep.subr.bf16.mxu0 %v9248_v0 }
0x1713   :  { %v9219_v9 = vpop.eup %9218 }
0x1714   :  { %v5522_v60 = vmul.f32 %v9219_v9, %v9211_v8 }
0x1716   :  { %v5526_v10 = vpack.c.bf16 %v5522_v60, %v5522_v60 }
0x1718   :  { %8843 = vmatmul.mubr.msk.bf16.vlgmr.msra.gmra.mxu0 %vm1515_vm7, %v5526_v10 }
0x1719   :  { %8853 = vmatpush3.bf16.msra.mxu0 %v10322_v38  ;;  %8854 = vmatprep.mubr.msk.bf16.mxu0 %vm9250_vm0, %v9248_v0 }
0x171a   :  { %8864 = vmatprep.subr.bf16.mxu0 %v9248_v0 }
0x178a   :  { %v5922_v44 = vpop.xlane.xlu0 %5921 }
0x178b   :  { %v5926_v59 = vmul.f32 0.03125, %v5922_v44 }
0x178d   :  { %v5928_v56 = vadd.f32 1e-05, %v5926_v59 }
0x178f   :  { %9220 = vrsqrt.f32 %v5928_v56 }
0x179c   :  { %v9221_v60 = vpop.eup %9220 }
0x179d   :  { %v5932_v10 = vmul.f32 %v9221_v60, %v10517_v55  ;;  %v9049_v55 = vld [vmem:[%s10576_s25 + $0x8] sm:$0xff]  }
0x17c0   :  { %v5571_v16 = vpop.f32.mrf.mxu1 }
0x17c1   :  { %v5715_v17 = vpack.c.bf16 %v5571_v16, %v5571_v16  ;;  %v7723_v16 = vld [vmem:[%s7506_s29] ss:$0 sm:$0xff]  ;;  %s7519_s29 = sld [smem:[%s10961_s0 + %s9301_s26]]  }
0x17c2   :  { %v8826_v18 = vpop.f32.mrf.mxu1 }
0x17c3   :  { %8849 = vmatmul.mubr.msk.bf16.vlgmr.msra.gmra.mxu1 %vm1515_vm7, %v5715_v17  ;;  %v5940_v18 = vmul.f32 %v7723_v16, %v5932_v10 }
0x17c4   :  { %v5574_v19 = vpop.f32.mrf.mxu1  ;;  %8859 = vmatpush3.bf16.msra.mxu1 %v10328_v7  ;;  %8860 = vmatprep.mubr.msk.bf16.mxu1 %vm9250_vm0, %v9248_v0 }
0x17c5   :  { %8870 = vmatprep.subr.bf16.mxu1 %v9248_v0 }
0x17c6   :  { %v8827_v20 = vpop.f32.mrf.mxu1 }
0x17c7   :  { %v7724_v20 = vld [vmem:[%s7507_s3] ss:$0 sm:$0xff]  ;;  %s7525_s3 = sld [smem:[%s10961_s0 + %s9302_s30]]  }
0x17c8   :  { %v5663_v38 = vpop.f32.mrf.mxu1 }
0x17c9   :  { %v5717_v21 = vpack.c.bf16 %v5663_v38, %v5663_v38 }
0x17ca   :  { %v8838_v22 = vpop.f32.mrf.mxu1 }
0x17cb   :  { %8861 = vmatmul.mubr.msk.bf16.vlgmr.msra.gmra.mxu1 %vm1515_vm7, %v5717_v21  ;;  %v5948_v21 = vadd.f32 %v7724_v20, %v5940_v18 }
0x17cc   :  { %v5666_v63 = vpop.f32.mrf.mxu1  ;;  %8874 = vmatprep.mubr.msk.bf16.mxu1 %vm9250_vm0, %v9248_v0 }
0x17ce   :  { %v8839_v23 = vpop.f32.mrf.mxu1 }
0x17cf   :  { %v9048_v23 = vld [vmem:[%s10576_s25 + $0x10] sm:$0xff]  }
0x17d0   :  { %v5617_v58 = vpop.f32.mrf.mxu0 }
0x17d1   :  { %v5716_v49 = vpack.c.bf16 %v5617_v58, %v5617_v58  ;;  %v9050_v58 = vld [vmem:[%s10576_s25] sm:$0xff]  }
0x17d2   :  { %v8832_v32 = vpop.f32.mrf.mxu0 }
0x17d3   :  { %8855 = vmatmul.mubr.msk.bf16.vlgmr.msra.gmra.mxu0 %vm1515_vm7, %v5716_v49  ;;  %v7725_v49 = vld [vmem:[%s7509_s7] ss:$0 sm:$0xff]  ;;  %s7524_s7 = sld [smem:[%s10961_s0 + %s9303_s4]]  }
0x17d4   :  { %v5620_v7 = vpop.f32.mrf.mxu0  ;;  %8865 = vmatpush3.bf16.msra.mxu0 %v10352_v29  ;;  %8866 = vmatprep.mubr.msk.bf16.mxu0 %vm9250_vm0, %v9248_v0 }
0x17d5   :  { %8878 = vmatprep.subr.bf16.mxu0 %v9248_v0 }
0x17d6   :  { %v8833_v62 = vpop.f32.mrf.mxu0 }
0x17d8   :  { %v5709_v27 = vpop.f32.mrf.mxu0 }
0x17d9   :  { %v5718_v33 = vpack.c.bf16 %v5709_v27, %v5709_v27 }
0x17da   :  { %v8844_v52 = vpop.f32.mrf.mxu0 }
0x17db   :  { %8867 = vmatmul.mubr.msk.bf16.vlgmr.msra.gmra.mxu0 %vm1515_vm7, %v5718_v33 }
0x17dc   :  { %v5712_v3 = vpop.f32.mrf.mxu0  ;;  %8886 = vmatprep.mubr.msk.bf16.mxu0 %vm9250_vm0, %v9248_v0 }
0x17de   :  { %v8845_v24 = vpop.f32.mrf.mxu0 }
0x1883   :  { %v5756_v57 = vpop.f32.mrf.mxu1 }
0x1884   :  { %v5891_v30 = vsel %vm638_vm6, %v5756_v57, 0.0 }
0x1885   :  { %v8850_v41 = vpop.f32.mrf.mxu1 }
0x1886   :  { %v7729_v41 = vld [vmem:[%s7511_s11] ss:$0 sm:$0xff]  ;;  %s7526_s11 = sld [smem:[%s10961_s0 + %s9304_s8]]  }
0x1887   :  { %v5759_v39 = vpop.f32.mrf.mxu1 }
0x1889   :  { %v8851_v29 = vpop.f32.mrf.mxu1 }
0x188b   :  { %v5842_v43 = vpop.f32.mrf.mxu1 }
0x188c   :  { %v5894_v40 = vsel %vm638_vm6, %v5842_v43, 0.0 }
0x188d   :  { %v8862_v6 = vpop.f32.mrf.mxu1 }
0x188f   :  { %v5845_v31 = vpop.f32.mrf.mxu1 }
0x1891   :  { %v8863_v53 = vpop.f32.mrf.mxu1 }
0x1893   :  { %v5799_v50 = vpop.f32.mrf.mxu0 }
0x1894   :  { %v5892_v51 = vsel %vm638_vm6, %v5799_v50, 0.0 }
0x1895   :  { %v8856_v46 = vpop.f32.mrf.mxu0  ;;  %v5893_v8 = vadd.f32 %v5892_v51, %v5891_v30 }
0x1897   :  { %v5802_v36 = vpop.f32.mrf.mxu0  ;;  %v5895_v45 = vadd.f32 %v5894_v40, %v5893_v8 }
0x1899   :  { %v8857_v25 = vpop.f32.mrf.mxu0 }
0x189b   :  { %v5885_v12 = vpop.f32.mrf.mxu0 }
0x189c   :  { %v5896_v26 = vsel %vm638_vm6, %v5885_v12, 0.0 }
0x189d   :  { %v5897_v5 = vadd.f32 %v5896_v26, %v5895_v45  ;;  %v8868_v42 = vpop.f32.mrf.mxu0 }
0x189f   :  { %v5905_v1 = vadd.f32 %v10506_v35, %v5897_v5  ;;  %v5888_v13 = vpop.f32.mrf.mxu0  ;;  %v9045_v35 = vld [vmem:[%s7508_s21 + $0x8] sm:$0xff]   ;;  %s10879_s21 = sld [smem:[%s10961_s0 + %s9299_s18]]  }
0x18a0   :  { %8871 = vmatpush3.bf16.msra.mxu1 %v9045_v35  ;;  %v9051_v13 = vld [vmem:[%s7514_s15 + $0x8] sm:$0xff]   ;;  %v7735_v35 = vld [vmem:[%s7512_s19] ss:$0 sm:$0xff] }
0x18a1   :  { %v8869_v28 = vpop.f32.mrf.mxu0  ;;  %v5907_v14 = vadd.f32 %v5905_v1, %v10341_v2  ;;  %8872 = vmatprep.subr.bf16.mxu1 %v9248_v0  ;;  %v9047_v2 = vld [vmem:[%s10576_s25 + $0x18] sm:$0xff]   ;;  %s7518_s25 = sld [smem:[%s10961_s0 + %s9300_s22]]  }
0x18a2   :  { %8879 = vmatpush3.bf16.msra.mxu0 %v9047_v2  ;;  %v9052_v28 = vld [vmem:[%s7514_s15] sm:$0xff]   ;;  %s7527_s15 = sld [smem:[%s10961_s0 + %s9305_s12]]  }
0x18a3   :  { %v5911_v4 = vsel %vm638_vm6, %v5907_v14, 0.0  ;;  %8880 = vmatprep.subr.bf16.mxu0 %v9248_v0  ;;  %v7736_v2 = vld [vmem:[%s7513_s23] ss:$0 sm:$0xff] }
0x18a4   :  { %5912 = vadd.xlane.f32.xlu1 %v5911_v4  ;;  %8873 = vmatpush3.bf16.msra.mxu1 %v9046_v61 }
0x18a5   :  { %8890 = vmatprep.subr.bf16.mxu1 %v9248_v0 }
0x18a6   :  { %8881 = vmatpush3.bf16.msra.mxu0 %v9048_v23 }
0x18a7   :  { %8882 = vmatprep.subr.bf16.mxu0 %v9248_v0 }
0x18aa   :  { %8883 = vmatpush3.bf16.msra.mxu0 %v9049_v55 }
0x18ab   :  { %8884 = vmatprep.subr.bf16.mxu0 %v9248_v0 }
0x18ae   :  { %8885 = vmatpush3.bf16.msra.mxu0 %v9050_v58 }
0x18af   :  { %8898 = vmatprep.subr.bf16.mxu0 %v9248_v0 }
0x192d   :  { %v5913_v48 = vpop.xlane.xlu1 %5912 }
0x192e   :  { %v5915_v11 = vmul.f32 0.03125, %v5913_v48 }
0x1930   :  { %v5917_v34 = vsub.f32 %v5907_v14, %v5915_v11 }
0x1932   :  { %v5919_v54 = vmul.f32 %v5917_v34, %v5917_v34 }
0x1934   :  { %v5923_v37 = vsel %vm638_vm6, %v5919_v54, 0.0 }
0x1935   :  { %5924 = vadd.xlane.f32.xlu1 %v5923_v37 }
0x19be   :  { %v5925_v47 = vpop.xlane.xlu1 %5924 }
0x19bf   :  { %v5927_v15 = vmul.f32 0.03125, %v5925_v47 }
0x19c1   :  { %v5929_v9 = vadd.f32 1e-05, %v5927_v15 }
0x19c3   :  { %9222 = vrsqrt.f32 %v5929_v9 }
0x19d0   :  { %v9223_v17 = vpop.eup %9222 }
0x19d1   :  { %v5933_v19 = vmul.f32 %v9223_v17, %v5917_v34 }
0x19d3   :  { %v5941_v38 = vmul.f32 %v7723_v16, %v5933_v19 }
0x19d5   :  { %v5949_v22 = vadd.f32 %v7724_v20, %v5941_v38 }
0x19d7   :  { %v5950_v63 = vpack.c.bf16 %v5949_v22, %v5948_v21 }
0x19d9   :  { %8875 = vmatmul.mubr.msk.bf16.vlgmr.msra.gmra.mxu1 %vm638_vm6, %v5950_v63 }
0x19da   :  { %8894 = vmatprep.mubr.msk.bf16.mxu1 %vm9250_vm0, %v9248_v0  ;;  %8891 = vmatpush3.bf16.msra.mxu1 %v9051_v13 }
0x19db   :  { %8892 = vmatprep.subr.bf16.mxu1 %v9248_v0 }
0x19de   :  { %8893 = vmatpush3.bf16.msra.mxu1 %v9052_v28 }
0x1a99   :  { %v6006_v32 = vpop.f32.mrf.mxu1 }
0x1a9a   :  { %v6007_v62 = vadd.f32 %v7725_v49, %v6006_v32 }
0x1a9b   :  { %v8876_v7 = vpop.f32.mrf.mxu1 }
0x1a9c   :  { %v6013_v3 = vmax.f32 %v6007_v62, 0.0 }
0x1a9d   :  { %v6009_v27 = vpop.f32.mrf.mxu1 }
0x1a9e   :  { %v6010_v33 = vadd.f32 %v7725_v49, %v6009_v27 }
0x1a9f   :  { %v8877_v52 = vpop.f32.mrf.mxu1 }
0x1aa0   :  { %v6014_v24 = vmax.f32 %v6010_v33, 0.0 }
0x1aa2   :  { %v6015_v57 = vpack.c.bf16 %v6014_v24, %v6013_v3  ;;  %v9055_v24 = vld [vmem:[%s7516_s27 + $0x4c] ss:$12 sps:$4 sm:$0xff]  }
0x1aa3   :  { %6321 = vmatprep.subr.bf16.mxu1 %v9055_v24 }
0x1aa4   :  { %8887 = vmatmul.mubr.msk.bf16.vlgmr.msra.gmra.mxu0 %vm3383_vm9, %v6015_v57  ;;  %v9053_v57 = vld [vmem:[%s7516_s27 + $0x48] ss:$12 sps:$4 sm:$0xff]  }
0x1aa5   :  { %8906 = vmatprep.mubr.msk.bf16.mxu0 %vm9250_vm0, %v9248_v0 }
0x1b64   :  { %v6083_v39 = vpop.f32.mrf.mxu0 }
0x1b65   :  { %v6084_v29 = vadd.f32 %v7729_v41, %v6083_v39  ;;  %v9059_v39 = vld [vmem:[%s7516_s27 + $0x34] ss:$12 sps:$4 sm:$0xff]  }
0x1b66   :  { %v8888_v43 = vpop.f32.mrf.mxu0 }
0x1b67   :  { %v6090_v6 = vadd.f32 %v6084_v29, %v5948_v21  ;;  %v9057_v29 = vld [vmem:[%s7516_s27 + $0x30] ss:$12 sps:$4 sm:$0xff]   ;;  %v9060_v43 = vld [vmem:[%s7516_s27 + $0x38] ss:$12 sps:$4 sm:$0xff]  }
0x1b68   :  { %v6086_v31 = vpop.f32.mrf.mxu0 }
0x1b69   :  { %v6087_v53 = vadd.f32 %v7729_v41, %v6086_v31  ;;  %v6092_v50 = vsel %vm638_vm6, %v6090_v6, 0.0  ;;  %v9056_v41 = vld [vmem:[%s7516_s27 + $0x50] ss:$12 sps:$4 sm:$0xff]   ;;  %v9061_v31 = vld [vmem:[%s7516_s27 + $0x18] ss:$12 sps:$4 sm:$0xff]  }
0x1b6a   :  { %6093 = vadd.xlane.f32.xlu0 %v6092_v50  ;;  %v8889_v51 = vpop.f32.mrf.mxu0  ;;  %8899 = vmatpush3.bf16.msra.mxu0 %v9056_v41  ;;  %v9067_v50 = vld [vmem:[%s7516_s27 + $0x4] ss:$12 sps:$4 sm:$0xff]   ;;  %v430_v41 = vld [vmem:[%s7517_s9] sm:$0x7] }
0x1b6b   :  { %v6091_v46 = vadd.f32 %v6087_v53, %v5949_v22  ;;  %8900 = vmatprep.subr.bf16.mxu0 %v9248_v0  ;;  %v9064_v53 = vld [vmem:[%s7516_s27 + $0x20] ss:$12 sps:$4 sm:$0xff]  }
0x1b6c   :  { %v9065_v51 = vld [vmem:[%s7516_s27] ss:$12 sps:$4 sm:$0xff]  }
0x1b6d   :  { %v6095_v30 = vsel %vm638_vm6, %v6091_v46, 0.0 }
0x1b6e   :  { %6096 = vadd.xlane.f32.xlu1 %v6095_v30  ;;  %8901 = vmatpush3.bf16.msra.mxu0 %v9060_v43  ;;  %v9293_v30 = vmov 0  }
0x1b6f   :  { %8902 = vmatprep.subr.bf16.mxu0 %v9248_v0 }
0x1b72   :  { %8903 = vmatpush3.bf16.msra.mxu0 %v9064_v53 }
0x1b73   :  { %8904 = vmatprep.subr.bf16.mxu0 %v9248_v0 }
0x1bf3   :  { %v6094_v8 = vpop.xlane.xlu0 %6093 }
0x1bf4   :  { %v6098_v36 = vmul.f32 0.03125, %v6094_v8  ;;  %v10636_v8 = vld [vmem:[%s10633_s1 + $0xf8] sm:$0xff] }
0x1bf6   :  { %v6100_v25 = vsub.f32 %v6090_v6, %v6098_v36  ;;  %v9063_v6 = vld [vmem:[%s7516_s27 + $0x1c] ss:$12 sps:$4 sm:$0xff]   ;;  %v7737_v36 = vld [vmem:[%s7515_s5] ss:$0 sm:$0xff] }
0x1bf7   :  { %v6097_v40 = vpop.xlane.xlu1 %6096 }
0x1bf8   :  { %v6099_v12 = vmul.f32 0.03125, %v6097_v40  ;;  %v6102_v45 = vmul.f32 %v6100_v25, %v6100_v25 }
0x1bfa   :  { %v6101_v26 = vsub.f32 %v6091_v46, %v6099_v12  ;;  %v6104_v5 = vsel %vm638_vm6, %v6102_v45, 0.0  ;;  %v9068_v46 = vld [vmem:[%s7516_s27 + $0x8] ss:$12 sps:$4 sm:$0xff]  }
0x1bfb   :  { %6105 = vadd.xlane.f32.xlu0 %v6104_v5  ;;  %8905 = vmatpush3.bf16.msra.mxu0 %v9068_v46 }
0x1bfc   :  { %v6103_v42 = vmul.f32 %v6101_v26, %v6101_v26  ;;  %8910 = vmatprep.subr.mxu0 %v9248_v0 }
0x1bfe   :  { %v6107_v1 = vsel %vm638_vm6, %v6103_v42, 0.0 }
0x1bff   :  { %6108 = vadd.xlane.f32.xlu1 %v6107_v1 }
0x1c84   :  { %v6106_v14 = vpop.xlane.xlu0 %6105 }
0x1c85   :  { %v6110_v4 = vmul.f32 0.03125, %v6106_v14 }
0x1c87   :  { %v6112_v48 = vadd.f32 1e-05, %v6110_v4 }
0x1c88   :  { %v6109_v11 = vpop.xlane.xlu1 %6108 }
0x1c89   :  { %9224 = vrsqrt.f32 %v6112_v48  ;;  %v6111_v34 = vmul.f32 0.03125, %v6109_v11 }
0x1c8b   :  { %v6113_v54 = vadd.f32 1e-05, %v6111_v34 }
0x1c8d   :  { %9226 = vrsqrt.f32 %v6113_v54  ;;  %v10643_v54 = vld [vmem:[%s10633_s1 + $0x78] sm:$0xff] }
0x1c96   :  { %v9225_v37 = vpop.eup %9224 }
0x1c97   :  { %v6116_v61 = vmul.f32 %v9225_v37, %v6100_v25  ;;  %v10646_v37 = vld [vmem:[%s10633_s1 + $0xf0] sm:$0xff] }
0x1c99   :  { %v6124_v44 = vmul.f32 %v7735_v35, %v6116_v61  ;;  %v10655_v61 = vld [vmem:[%s10633_s1 + $0xe8] sm:$0xff] }
0x1c9a   :  { %v9227_v59 = vpop.eup %9226 }
0x1c9b   :  { %v6132_v56 = vadd.f32 %v7736_v2, %v6124_v44  ;;  %v6117_v47 = vmul.f32 %v9227_v59, %v6101_v26  ;;  %v10665_v44 = vld [vmem:[%s10633_s1 + $0xe0] sm:$0xff] }
0x1c9c   :  { %v10669_v59 = vld [vmem:[%s10633_s1 + $0x60] sm:$0xff] }
0x1c9d   :  { %v6134_v15 = vsel %vm638_vm6, %v6132_v56, 0.0  ;;  %v6125_v9 = vmul.f32 %v7735_v35, %v6117_v47  ;;  %v10651_v35 = vld [vmem:[%s10633_s1 + $0x70] sm:$0xff]  ;;  %v10673_v56 = vld [vmem:[%s10633_s1 + $0xd8] sm:$0xff] }
0x1c9e   :  { %v6135_v60 = vrot.slane %v6134_v15, 4  ;;  %v10677_v47 = vld [vmem:[%s10633_s1 + $0x58] sm:$0xff] }
0x1c9f   :  { %v6133_v10 = vadd.f32 %v7736_v2, %v6125_v9  ;;  %v10661_v2 = vld [vmem:[%s10633_s1 + $0x68] sm:$0xff]  ;;  %v10685_v9 = vld [vmem:[%s10633_s1 + $0x50] sm:$0xff] }
0x1ca0   :  { %v6136_v16 = vadd.f32 %v6135_v60, %v6134_v15  ;;  %v10681_v15 = vld [vmem:[%s10633_s1 + $0xd0] sm:$0xff]  ;;  %v10689_v60 = vld [vmem:[%s10633_s1 + $0xc8] sm:$0xff] }
0x1ca1   :  { %v6141_v17 = vsel %vm638_vm6, %v6133_v10, 0.0  ;;  %v10693_v10 = vld [vmem:[%s10633_s1 + $0x48] sm:$0xff] }
0x1ca2   :  { %v6137_v18 = vrot.slane %v6136_v16, 2  ;;  %v6142_v19 = vrot.slane %v6141_v17, 4 }
0x1ca4   :  { %v6138_v20 = vadd.f32 %v6137_v18, %v6136_v16  ;;  %v6143_v38 = vadd.f32 %v6142_v19, %v6141_v17  ;;  %v10697_v16 = vld [vmem:[%s10633_s1 + $0xc0] sm:$0xff]  ;;  %v10705_v18 = vld [vmem:[%s10633_s1 + $0xb8] sm:$0xff] }
0x1ca5   :  { %v10701_v17 = vld [vmem:[%s10633_s1 + $0x40] sm:$0xff]  ;;  %v10709_v19 = vld [vmem:[%s10633_s1 + $0x38] sm:$0xff] }
0x1ca6   :  { %v6144_v21 = vrot.slane %v6143_v38, 2  ;;  %v6139_v22 = vrot.slane %v6138_v20, 1 }
0x1ca8   :  { %v6145_v63 = vadd.f32 %v6144_v21, %v6143_v38  ;;  %v6140_v23 = vadd.f32 %v6139_v22, %v6138_v20  ;;  %v10713_v20 = vld [vmem:[%s10633_s1 + $0xb0] sm:$0xff]  ;;  %v10721_v21 = vld [vmem:[%s10633_s1 + $0xa8] sm:$0xff] }
0x1ca9   :  { %v10717_v38 = vld [vmem:[%s10633_s1 + $0x30] sm:$0xff]  ;;  %v10725_v22 = vld [vmem:[%s10633_s1 + $0x28] sm:$0xff] }
0x1caa   :  { %v6146_v55 = vrot.slane %v6145_v63, 1  ;;  %v6148_v58 = vmul.f32 0.125, %v6140_v23  ;;  %v10733_v23 = vld [vmem:[%s10633_s1 + $0x20] sm:$0xff] }
0x1cac   :  { %v6147_v49 = vadd.f32 %v6146_v55, %v6145_v63  ;;  %v6150_v7 = vpack.c.bf16 %v6148_v58, %v6148_v58  ;;  %v10729_v63 = vld [vmem:[%s10633_s1 + $0xa0] sm:$0xff]  ;;  %v10737_v55 = vld [vmem:[%s10633_s1 + $0x98] sm:$0xff] }
0x1cad   :  { %v10741_v58 = vld [vmem:[%s10633_s1 + $0x18] sm:$0xff] }
0x1cae   :  { %v6149_v32 = vmul.f32 0.125, %v6147_v49  ;;  %v6160_v27 = vunpack.c.l.b16 %v6150_v7  ;;  %v10747_v49 = vld [vmem:[%s10633_s1 + $0x90] sm:$0xff]  ;;  %v10755_v7 = vld [vmem:[%s10633_s1 + $0x88] sm:$0xff] }
0x1cb0   :  { %v6151_v62 = vpack.c.bf16 %v6149_v32, %v6149_v32  ;;  %v10751_v32 = vld [vmem:[%s10633_s1 + $0x10] sm:$0xff] }
0x1cb2   :  { %v6161_v33 = vunpack.c.l.b16 %v6151_v62  ;;  %v465_v62 = vld [vmem:[%s10633_s1 + $0x100] sm:$0xf] }
0x1cb4   :  { %v6163_v52 = vsel %vm6162_vm10, %v6161_v33, %v6160_v27  ;;  %v10761_v27 = vld [vmem:[%s10633_s1 + $0x8] sm:$0xff]  ;;  %v10765_v33 = vld [vmem:[%s10633_s1 + $0x80] sm:$0xff] }
0x1cb5   :  { %v6164_v3 = vpack.c.b16 %v6163_v52, %v6163_v52  ;;  %v10768_v52 = vld [vmem:[%s10633_s1] sm:$0xff] }
0x1cb7   :  { %8895 = vmatmul.mubr.msk.bf16.vlgmr.msra.gmra.mxu1 %vm638_vm6, %v6164_v3  ;;  %v6231_v3 = vlaneseq }
0x1cb8   :  { %6322 = vmatpush1.bf16.msra.mxu1 %v9053_v57  ;;  %6345 = vmatprep.mubr.bf16.mxu1 %v9293_v30 }
0x1cb9   :  { %6323 = vmatprep.subr.bf16.mxu1 %v9059_v39  ;;  %v6232_v24 = vshrl.u32 %v6231_v3, 7 }
0x1cbb   :  { %v10776_v57 = vsub.s32 2, %v6232_v24  ;;  %v10778_v39 = vsub.s32 1, %v6232_v24 }
0x1cbc   :  { %6324 = vmatpush1.bf16.msra.mxu1 %v9057_v29  ;;  %v10780_v29 = vsub.s32 0, %v6232_v24  ;;  %v10815_v24 = vld [vmem:[%s7521_s13 + $0x10] sm:$0x1f] }
0x1cbd   :  { %6325 = vmatprep.subr.bf16.mxu1 %v9063_v6  ;;  %v6242_v43 = vrot.slane %v430_v41, %v10776_v57  ;;  %v6238_v6 = vrot.slane %v430_v41, %v10778_v39 }
0x1cc0   :  { %6326 = vmatpush1.bf16.msra.mxu1 %v9061_v31  ;;  %v6234_v31 = vrot.slane %v430_v41, %v10780_v29  ;;  %v9095_v41 = vld [vmem:[%s10879_s21 + $0xf4] ss:$8 sps:$4 sm:$0xff]  }
0x1cc1   :  { %6327 = vmatprep.subr.bf16.mxu1 %v9067_v50 }
0x1cc4   :  { %6328 = vmatpush1.bf16.msra.mxu1 %v9065_v51 }
0x1cc5   :  { %8086 = vmatprep.subr.mxu1 %v10636_v8 }
0x1d77   :  { %v6214_v25 = vpop.f32.mrf.mxu1 }
0x1d78   :  { %v6215_v40 = vadd.f32 %v7737_v36, %v6214_v25 }
0x1d79   :  { %v8896_v12 = vpop.f32.mrf.mxu1 }
0x1d7a   :  { %v6220_v45 = vmul.f32 %v6215_v40, %v6215_v40 }
0x1d7b   :  { %v6217_v26 = vpop.f32.mrf.mxu1 }
0x1d7c   :  { %v6221_v5 = vmul.f32 %v6220_v45, %v6215_v40 }
0x1d7d   :  { %v8897_v42 = vpop.f32.mrf.mxu1 }
0x1d7e   :  { %v6222_v1 = vmul.f32 0.044715, %v6221_v5  ;;  %v467_v42 = vld [vmem:[%s7521_s13 + $0x8] sm:$0x1f] }
0x1d80   :  { %v6223_v13 = vadd.f32 %v6222_v1, %v6215_v40  ;;  %v10802_v1 = vld [vmem:[%s7521_s13] sm:$0x1f] }
0x1d82   :  { %v6224_v28 = vmul.f32 0.7978846, %v6223_v13  ;;  %v7757_v13 = vld [vmem:[%s7522_s17] ss:$0 sm:$0xff] }
0x1d84   :  { %9228 = vtanh.f32 %v6224_v28 }
0x1d85   :  { %9230 = vrcp.f32 %v7757_v13  ;;  %v9111_v13 = vld [vmem:[%s10879_s21 + $0x90] ss:$8 sps:$4 sm:$0xff]  }
0x1d91   :  { %v9229_v14 = vpop.eup %9228 }
0x1d92   :  { %v6226_v4 = vadd.f32 1.0, %v9229_v14 }
0x1d94   :  { %v6227_v48 = vmul.f32 0.5, %v6226_v4 }
0x1d96   :  { %v6228_v11 = vmul.f32 %v6227_v48, %v6215_v40 }
0x1d98   :  { %v6229_v34 = vpack.c.bf16 %v6228_v11, %v6228_v11 }
0x1d9a   :  { %7753 = vmatmul.mubr.msk.bf16.vlgmr.msra.gmra.mxu1 %vm3383_vm9, %v6229_v34  ;;  %8907 = vmatmul.mubr.msk.bf16.vlgmr.msra.gmra.mxu0 %vm3383_vm9, %v6229_v34  ;;  %v10812_v34 = vpop.eup %9230 }
0x1d9b   :  { %8087 = vmatpush3.msra.mxu1 %v10643_v54  ;;  %8912 = vmatprep.mubr.msk.f32.mxu0 %vm9250_vm0, %v9248_v0 }
0x1d9c   :  { %8088 = vmatprep.subr.mxu1 %v10646_v37  ;;  %8911 = vmatpush3.msk.msra.mxu0 %vm1759_vm8, %v465_v62 }
0x1d9d   :  { %8089 = vmatpush3.msra.mxu1 %v10651_v35  ;;  %7758 = vmatprep.subr.msk.mxu0 %vm6553_vm12, %v467_v42 }
0x1d9e   :  { %8090 = vmatprep.subr.mxu1 %v10655_v61 }
0x1d9f   :  { %8091 = vmatpush3.msra.mxu1 %v10661_v2 }
0x1da0   :  { %8092 = vmatprep.subr.mxu1 %v10665_v44 }
0x1da1   :  { %8093 = vmatpush3.msra.mxu1 %v10669_v59 }
0x1da2   :  { %8094 = vmatprep.subr.mxu1 %v10673_v56 }
0x1da3   :  { %8095 = vmatpush3.msra.mxu1 %v10677_v47 }
0x1da4   :  { %8096 = vmatprep.subr.mxu1 %v10681_v15 }
0x1da5   :  { %8097 = vmatpush3.msra.mxu1 %v10685_v9 }
0x1da6   :  { %8098 = vmatprep.subr.mxu1 %v10689_v60 }
0x1da7   :  { %8099 = vmatpush3.msra.mxu1 %v10693_v10 }
0x1da8   :  { %8100 = vmatprep.subr.mxu1 %v10697_v16 }
0x1da9   :  { %8101 = vmatpush3.msra.mxu1 %v10701_v17 }
0x1daa   :  { %8102 = vmatprep.subr.mxu1 %v10705_v18 }
0x1dab   :  { %8103 = vmatpush3.msra.mxu1 %v10709_v19 }
0x1dac   :  { %8104 = vmatprep.subr.mxu1 %v10713_v20 }
0x1dad   :  { %8105 = vmatpush3.msra.mxu1 %v10717_v38 }
0x1dae   :  { %8106 = vmatprep.subr.mxu1 %v10721_v21 }
0x1daf   :  { %8107 = vmatpush3.msra.mxu1 %v10725_v22 }
0x1db0   :  { %8108 = vmatprep.subr.mxu1 %v10729_v63 }
0x1db1   :  { %8109 = vmatpush3.msra.mxu1 %v10733_v23 }
0x1db2   :  { %8110 = vmatprep.subr.mxu1 %v10737_v55 }
0x1db3   :  { %8111 = vmatpush3.msra.mxu1 %v10741_v58 }
0x1db4   :  { %8112 = vmatprep.subr.mxu1 %v10747_v49 }
0x1db5   :  { %8113 = vmatpush3.msra.mxu1 %v10751_v32 }
0x1db6   :  { %8114 = vmatprep.subr.mxu1 %v10755_v7 }
0x1db7   :  { %8115 = vmatpush3.msra.mxu1 %v10761_v27 }
0x1db8   :  { %8116 = vmatprep.subr.mxu1 %v10765_v33 }
0x1db9   :  { %8117 = vmatpush3.msra.mxu1 %v10768_v52 }
0x1dba   :  { %8920 = vmatprep.subr.mxu1 %v9248_v0 }
0x1e5a   :  { %v6347_v53 = vpop.f32.mrf.mxu1  ;;  %v6388_v50 = vpop.f32.mrf.mxu0 }
0x1e5b   :  { %v10785_v51 = vadd.f32 %v6388_v50, %v6242_v43  ;;  %v10791_v40 = vadd.f32 %v6347_v53, %v6234_v31  ;;  %v9093_v43 = vld [vmem:[%s10879_s21 + $0xf0] ss:$8 sps:$4 sm:$0xff]   ;;  %v9098_v31 = vld [vmem:[%s10879_s21 + $0xe4] ss:$8 sps:$4 sm:$0xff]   ;;  %v9101_v53 = vld [vmem:[%s10879_s21 + $0xd4] ss:$8 sps:$4 sm:$0xff]  }
0x1e5c   :  { %v6349_v46 = vpop.f32.mrf.mxu1  ;;  %v8908_v36 = vpop.f32.mrf.mxu0  ;;  %v9099_v50 = vld [vmem:[%s10879_s21 + $0xd0] ss:$8 sps:$4 sm:$0xff]  }
0x1e5d   :  { %v10787_v25 = vadd.f32 %v6349_v46, %v6238_v6  ;;  %8913 = vmatmul.mubr.msk.f32.vlgmr.msra.gmra.mxu0 %vm6394_vm11, %v10785_v51  ;;  %v9096_v6 = vld [vmem:[%s10879_s21 + $0xe0] ss:$8 sps:$4 sm:$0xff]  }
0x1e5e   :  { %v6351_v12 = vpop.f32.mrf.mxu1  ;;  %v6391_v45 = vpop.f32.mrf.mxu0  ;;  %6627 = vmatprep.mubr.f32.mxu0 %v9248_v0  ;;  %7759 = vmatpush1.msk.msra.mxu0 %vm6553_vm12, %v10802_v1  ;;  %v502_v46 = vld [vmem:[%s10879_s21 + $0x100] sm:$0x33] }
0x1e5f   :  { %6465 = vmatprep.mubr.f32.mxu1 %v10787_v25  ;;  %8915 = vmatprep.subr.mxu0 %v9248_v0  ;;  %v7803_v36 = vcombine.high %v502_v46, %v502_v46  ;;  %v9107_v45 = vld [vmem:[%s10879_s21 + $0xb4] ss:$8 sps:$4 sm:$0xff]  }
0x1e60   :  { %v6352_v26 = vpop.f32.mrf.mxu1  ;;  %v8909_v5 = vpop.f32.mrf.mxu0  ;;  %6466 = vmatmul.mubr.f32.vlgmr.msra.gmra.mxu1 %v10791_v40 }
0x1e61   :  { %8921 = vmatpush3.msk.msra.mxu1 %vm1759_vm8, %v465_v62  ;;  %8922 = vmatprep.mubr.msk.f32.mxu1 %vm9250_vm0, %v9248_v0  ;;  %v9105_v26 = vld [vmem:[%s10879_s21 + $0xb0] ss:$8 sps:$4 sm:$0xff]   ;;  %v9110_v5 = vld [vmem:[%s10879_s21 + $0xa4] ss:$8 sps:$4 sm:$0xff]  }
0x1e62   :  { %7765 = vmatprep.subr.msk.mxu1 %vm6553_vm12, %v467_v42  ;;  %v9108_v42 = vld [vmem:[%s10879_s21 + $0xa0] ss:$8 sps:$4 sm:$0xff]  }
0x1f1d   :  { %v6537_v28 = vpop.f32.mrf.mxu0 }
0x1f1f   :  { %v8914_v14 = vpop.f32.mrf.mxu0 }
0x1f20   :  { %v8118_v4 = vpop.f32.mrf.mxu1  ;;  %v9114_v14 = vld [vmem:[%s10879_s21 + $0x80] ss:$8 sps:$4 sm:$0xff]  }
0x1f22   :  { %v8119_v48 = vpop.f32.mrf.mxu1 }
0x1f23   :  { %v8120_v11 = vadd.f32 %v8119_v48, %v8118_v4 }
0x1f25   :  { %v6538_v62 = vadd.f32 %v8120_v11, %v6537_v28  ;;  %v9116_v28 = vld [vmem:[%s10879_s21 + $0x84] ss:$8 sps:$4 sm:$0xff]  }
0x1f27   :  { %v6548_v3 = vmul.f32 %v10812_v34, %v6538_v62 }
0x1f29   :  { %7760 = vmatmul.mubr.msk.f32.vlgmr.msra.gmra.mxu0 %vm6549_vm13, %v6548_v3 }
0x1f2a   :  { %8916 = vmatpush3.msk.msra.mxu0 %vm6553_vm12, %v10815_v24  ;;  %8917 = vmatprep.mubr.msk.f32.mxu0 %vm9250_vm0, %v9248_v0 }
0x1f2b   :  { %8125 = vmatprep.subr.mxu0 %v10636_v8 }
0x1f2d   :  { %8918 = vmatmul.mubr.msk.f32.vlgmr.msra.gmra.mxu0 %vm6549_vm13, %v6548_v3 }
0x1f2e   :  { %8126 = vmatpush3.msra.mxu0 %v10643_v54 }
0x1f2f   :  { %8127 = vmatprep.subr.mxu0 %v10646_v37 }
0x1f30   :  { %8128 = vmatpush3.msra.mxu0 %v10651_v35 }
0x1f31   :  { %8129 = vmatprep.subr.mxu0 %v10655_v61 }
0x1f32   :  { %8130 = vmatpush3.msra.mxu0 %v10661_v2 }
0x1f33   :  { %8131 = vmatprep.subr.mxu0 %v10665_v44 }
0x1f34   :  { %8132 = vmatpush3.msra.mxu0 %v10669_v59 }
0x1f35   :  { %8133 = vmatprep.subr.mxu0 %v10673_v56 }
0x1f36   :  { %8134 = vmatpush3.msra.mxu0 %v10677_v47 }
0x1f37   :  { %8135 = vmatprep.subr.mxu0 %v10681_v15 }
0x1f38   :  { %8136 = vmatpush3.msra.mxu0 %v10685_v9 }
0x1f39   :  { %8137 = vmatprep.subr.mxu0 %v10689_v60 }
0x1f3a   :  { %8138 = vmatpush3.msra.mxu0 %v10693_v10 }
0x1f3b   :  { %8139 = vmatprep.subr.mxu0 %v10697_v16 }
0x1f3c   :  { %8140 = vmatpush3.msra.mxu0 %v10701_v17 }
0x1f3d   :  { %8141 = vmatprep.subr.mxu0 %v10705_v18 }
0x1f3e   :  { %8142 = vmatpush3.msra.mxu0 %v10709_v19  ;;  %v9071_v19 = vld [vmem:[%s10879_s21 + $0x74] ss:$8 sps:$4 sm:$0xff]  }
0x1f3f   :  { %8143 = vmatprep.subr.mxu0 %v10713_v20  ;;  %v9069_v20 = vld [vmem:[%s10879_s21 + $0x70] ss:$8 sps:$4 sm:$0xff]  }
0x1f40   :  { %8144 = vmatpush3.msra.mxu0 %v10717_v38  ;;  %v9074_v38 = vld [vmem:[%s10879_s21 + $0x64] ss:$8 sps:$4 sm:$0xff]  }
0x1f41   :  { %8145 = vmatprep.subr.mxu0 %v10721_v21  ;;  %v9072_v21 = vld [vmem:[%s10879_s21 + $0x60] ss:$8 sps:$4 sm:$0xff]  }
0x1f42   :  { %8146 = vmatpush3.msra.mxu0 %v10725_v22  ;;  %v9077_v22 = vld [vmem:[%s10879_s21 + $0x54] ss:$8 sps:$4 sm:$0xff]  }
0x1f43   :  { %8147 = vmatprep.subr.mxu0 %v10729_v63  ;;  %v9075_v63 = vld [vmem:[%s10879_s21 + $0x50] ss:$8 sps:$4 sm:$0xff]  }
0x1f44   :  { %8148 = vmatpush3.msra.mxu0 %v10733_v23  ;;  %v9078_v23 = vld [vmem:[%s10879_s21 + $0x40] ss:$8 sps:$4 sm:$0xff]  }
0x1f45   :  { %8149 = vmatprep.subr.mxu0 %v10737_v55  ;;  %v9083_v55 = vld [vmem:[%s10879_s21 + $0x34] ss:$8 sps:$4 sm:$0xff]  }
0x1f46   :  { %8150 = vmatpush3.msra.mxu0 %v10741_v58  ;;  %v9081_v58 = vld [vmem:[%s10879_s21 + $0x30] ss:$8 sps:$4 sm:$0xff]  }
0x1f47   :  { %8151 = vmatprep.subr.mxu0 %v10747_v49  ;;  %v9086_v49 = vld [vmem:[%s10879_s21 + $0x24] ss:$8 sps:$4 sm:$0xff]  }
0x1f48   :  { %8152 = vmatpush3.msra.mxu0 %v10751_v32  ;;  %v9084_v32 = vld [vmem:[%s10879_s21 + $0x20] ss:$8 sps:$4 sm:$0xff]  }
0x1f49   :  { %8153 = vmatprep.subr.mxu0 %v10755_v7  ;;  %v9089_v7 = vld [vmem:[%s10879_s21 + $0x14] ss:$8 sps:$4 sm:$0xff]  }
0x1f4a   :  { %8154 = vmatpush3.msra.mxu0 %v10761_v27  ;;  %v9087_v27 = vld [vmem:[%s10879_s21 + $0x10] ss:$8 sps:$4 sm:$0xff]  }
0x1f4b   :  { %8155 = vmatprep.subr.mxu0 %v10765_v33  ;;  %v9092_v33 = vld [vmem:[%s10879_s21 + $0x4] ss:$8 sps:$4 sm:$0xff]  }
0x1f4c   :  { %8156 = vmatpush3.msra.mxu0 %v10768_v52  ;;  %v9090_v52 = vld [vmem:[%s10879_s21] ss:$8 sps:$4 sm:$0xff]  }
0x1f4d   :  { %7804 = vmatprep.subr.msk.bf16.mxu0 %vm7251_vm14, %v7803_v36 }
0x1fe9   :  { %v6629_v8 = vpop.f32.mrf.mxu0 }
0x1fea   :  { %v10856_v54 = vsub.f32 %v10791_v40, %v6629_v8  ;;  %v9102_v40 = vld [vmem:[%s10879_s21 + $0xc0] ss:$8 sps:$4 sm:$0xff]  }
0x1feb   :  { %v6631_v37 = vpop.f32.mrf.mxu0  ;;  %v431_v8 = vld [vmem:[%s7518_s25] sm:$0x7] }
0x1fec   :  { %v10859_v35 = vsub.f32 %v10787_v25, %v6631_v37  ;;  %v6707_v59 = vmul.f32 %v10856_v54, %v10856_v54  ;;  %v7802_v25 = vcombine.low %v502_v46, %v502_v46  ;;  %v432_v37 = vld [vmem:[%s7519_s29] sm:$0x7] }
0x1fed   :  { %v6700_v61 = vpop.f32.mrf.mxu0 }
0x1fee   :  { %v6708_v2 = vmul.f32 %v10859_v35, %v10859_v35  ;;  %v10864_v44 = vsub.f32 %v10785_v51, %v6700_v61  ;;  %v9104_v51 = vld [vmem:[%s10879_s21 + $0xc4] ss:$8 sps:$4 sm:$0xff]   ;;  %v7253_v12 = vsel %vm7251_vm14, %v7802_v25, 0  ;;  %v7008_v61 = vrot.slane %v431_v8, %v10780_v29 }
0x1fef   :  { %v8919_v56 = vpop.f32.mrf.mxu0 }
0x1ff0   :  { %v6709_v47 = vmul.f32 %v10864_v44, %v10864_v44  ;;  %6777 = vmatprep.mubr.f32.mxu0 %v6708_v2 }
0x1ff1   :  { %6778 = vmatmul.mubr.f32.vlgmr.msra.gmra.mxu0 %v6707_v59  ;;  %v7027_v59 = vrot.slane %v432_v37, %v10780_v29 }
0x1ff2   :  { %8923 = vmatmul.mubr.msk.f32.vlgmr.msra.gmra.mxu1 %vm6394_vm11, %v6709_v47  ;;  %7331 = vmatprep.mubr.bf16.mxu0 %v9293_v30  ;;  %v7012_v47 = vrot.slane %v431_v8, %v10778_v39 }
0x1ff3   :  { %7766 = vmatpush1.msk.msra.mxu1 %vm6553_vm12, %v10802_v1  ;;  %6921 = vmatprep.mubr.f32.mxu1 %v9248_v0  ;;  %v9113_v1 = vld [vmem:[%s10879_s21 + $0x94] ss:$8 sps:$4 sm:$0xff]  }
0x1ff4   :  { %8925 = vmatprep.subr.mxu1 %v9248_v0  ;;  %7314 = vmatpush1.bf16.msra.mxu0 %v7253_v12 }
0x1ff5   :  { %7427 = vmatprep.subr.bf16.mxu0 %v9293_v30 }
0x20b1   :  { %v8157_v15 = vpop.f32.mrf.mxu0 }
0x20b2   :  { %v6849_v9 = vpop.f32.mrf.mxu1 }
0x20b3   :  { %v8158_v60 = vpop.f32.mrf.mxu0 }
0x20b4   :  { %v8159_v10 = vadd.f32 %v8158_v60, %v8157_v15  ;;  %v8924_v16 = vpop.f32.mrf.mxu1 }
0x20b5   :  { %v7031_v16 = vrot.slane %v432_v37, %v10778_v39 }
0x20b6   :  { %v6850_v17 = vadd.f32 %v8159_v10, %v6849_v9  ;;  %v7016_v9 = vrot.slane %v431_v8, %v10776_v57  ;;  %v503_v8 = vld [vmem:[%s7524_s7] sm:$0x3] }
0x20b8   :  { %v6853_v18 = vmul.f32 %v10812_v34, %v6850_v17 }
0x20ba   :  { %7767 = vmatmul.mubr.msk.f32.vlgmr.msra.gmra.mxu1 %vm6549_vm13, %v6853_v18 }
0x20bb   :  { %8926 = vmatpush3.msk.msra.mxu1 %vm6553_vm12, %v10815_v24  ;;  %8927 = vmatprep.mubr.msk.f32.mxu1 %vm9250_vm0, %v9248_v0  ;;  %v9080_v0 = vld [vmem:[%s10879_s21 + $0x44] ss:$8 sps:$4 sm:$0xff]   ;;  %vm7417_vm0 = vcmask 7168  }
0x20bc   :  { %7258 = vmatprep.subr.bf16.mxu1 %v9071_v19 }
0x20be   :  { %8928 = vmatmul.mubr.msk.f32.vlgmr.msra.gmra.mxu1 %vm6549_vm13, %v6853_v18  ;;  %v7035_v18 = vrot.slane %v432_v37, %v10776_v57  ;;  %v7076_v37 = vrot.slane %v503_v8, %v10780_v29 }
0x20bf   :  { %7259 = vmatpush1.bf16.msra.mxu1 %v9069_v20 }
0x20c0   :  { %7260 = vmatprep.subr.bf16.mxu1 %v9074_v38 }
0x20c3   :  { %7261 = vmatpush1.bf16.msra.mxu1 %v9072_v21 }
0x20c4   :  { %7262 = vmatprep.subr.bf16.mxu1 %v9077_v22 }
0x20c7   :  { %7263 = vmatpush1.bf16.msra.mxu1 %v9075_v63 }
0x20c8   :  { %7264 = vmatprep.subr.bf16.mxu1 %v9080_v0 }
0x20cb   :  { %7265 = vmatpush1.bf16.msra.mxu1 %v9078_v23 }
0x20cc   :  { %7266 = vmatprep.subr.bf16.mxu1 %v9083_v55 }
0x20cf   :  { %7267 = vmatpush1.bf16.msra.mxu1 %v9081_v58 }
0x20d0   :  { %7268 = vmatprep.subr.bf16.mxu1 %v9086_v49 }
0x20d3   :  { %7269 = vmatpush1.bf16.msra.mxu1 %v9084_v32 }
0x20d4   :  { %7270 = vmatprep.subr.bf16.mxu1 %v9089_v7 }
0x20d7   :  { %7271 = vmatpush1.bf16.msra.mxu1 %v9087_v27 }
0x20d8   :  { %7272 = vmatprep.subr.bf16.mxu1 %v9092_v33 }
0x20db   :  { %7273 = vmatpush1.bf16.msra.mxu1 %v9090_v52 }
0x20dc   :  { %7274 = vmatprep.subr.bf16.mxu1 %v9095_v41 }
0x20df   :  { %7275 = vmatpush2.bf16.msra.mxu1 %v9093_v43 }
0x20e0   :  { %7276 = vmatprep.subr.bf16.mxu1 %v9098_v31 }
0x20e3   :  { %7277 = vmatpush2.bf16.msra.mxu1 %v9096_v6 }
0x20e4   :  { %7278 = vmatprep.subr.bf16.mxu1 %v9101_v53 }
0x20e7   :  { %7279 = vmatpush2.bf16.msra.mxu1 %v9099_v50 }
0x20e8   :  { %7280 = vmatprep.subr.bf16.mxu1 %v9104_v51 }
0x20eb   :  { %7281 = vmatpush2.bf16.msra.mxu1 %v9102_v40 }
0x20ec   :  { %7282 = vmatprep.subr.bf16.mxu1 %v9107_v45 }
0x20ef   :  { %7283 = vmatpush2.bf16.msra.mxu1 %v9105_v26 }
0x20f0   :  { %7284 = vmatprep.subr.bf16.mxu1 %v9110_v5 }
0x20f3   :  { %7285 = vmatpush2.bf16.msra.mxu1 %v9108_v42 }
0x20f4   :  { %7286 = vmatprep.subr.bf16.mxu1 %v9113_v1  ;;  %v9119_v1 = vld [vmem:[%s7525_s3 + $0x38] sm:$0xff]  }
0x20f7   :  { %7287 = vmatpush2.bf16.msra.mxu1 %v9111_v13  ;;  %v9120_v13 = vld [vmem:[%s7525_s3 + $0x30] sm:$0xff]  }
0x20f8   :  { %7288 = vmatprep.subr.bf16.mxu1 %v9116_v28  ;;  %v9121_v28 = vld [vmem:[%s7525_s3 + $0x28] sm:$0xff]  }
0x20fb   :  { %7289 = vmatpush2.bf16.msra.mxu1 %v9114_v14  ;;  %v9122_v14 = vld [vmem:[%s7525_s3 + $0x20] sm:$0xff]  }
0x217a   :  { %v6923_v4 = vpop.f32.mrf.mxu1 }
0x217b   :  { %v6924_v48 = vadd.f32 1e-05, %v6923_v4  ;;  %v9123_v4 = vld [vmem:[%s7525_s3 + $0x18] sm:$0xff]  }
0x217c   :  { %v6925_v11 = vpop.f32.mrf.mxu1 }
0x217d   :  { %9232 = vrsqrt.f32 %v6924_v48  ;;  %v6926_v34 = vadd.f32 1e-05, %v6925_v11  ;;  %v9124_v48 = vld [vmem:[%s7525_s3 + $0x10] sm:$0xff]   ;;  %v9125_v11 = vld [vmem:[%s7525_s3 + $0x8] sm:$0xff]  }
0x217e   :  { %v6994_v62 = vpop.f32.mrf.mxu1 }
0x217f   :  { %9234 = vrsqrt.f32 %v6926_v34  ;;  %v6995_v3 = vadd.f32 1e-05, %v6994_v62  ;;  %v9126_v34 = vld [vmem:[%s7525_s3] sm:$0xff]  }
0x2180   :  { %v8929_v24 = vpop.f32.mrf.mxu1  ;;  %v9127_v62 = vld [vmem:[%s7525_s3 + $0x40] ss:$0 sps:$4 sm:$0x11]  }
0x2181   :  { %9236 = vrsqrt.f32 %v6995_v3  ;;  %v7423_v3 = vsel %vm7421_vm15, 65535, %v9293_v30 }
0x2182   :  { %v7425_v24 = vand.u32 %v9127_v62, %v7423_v3 }
0x218a   :  { %v9233_v2 = vpop.eup %9232 }
0x218b   :  { %v7001_v56 = vmul.f32 %v9233_v2, %v10856_v54 }
0x218c   :  { %v9235_v15 = vpop.eup %9234 }
0x218d   :  { %v7020_v60 = vmul.f32 %v7008_v61, %v7001_v56  ;;  %v7002_v10 = vmul.f32 %v9235_v15, %v10859_v35  ;;  %v7080_v61 = vrot.slane %v503_v8, %v10778_v39 }
0x218e   :  { %v9237_v17 = vpop.eup %9236 }
0x218f   :  { %v7039_v19 = vadd.f32 %v7027_v59, %v7020_v60  ;;  %v7003_v20 = vmul.f32 %v9237_v17, %v10864_v44  ;;  %v7021_v38 = vmul.f32 %v7012_v47, %v7002_v10 }
0x2191   :  { %v7022_v21 = vmul.f32 %v7016_v9, %v7003_v20  ;;  %v7040_v22 = vadd.f32 %v7031_v16, %v7021_v38  ;;  %v7042_v54 = vmul.f32 %v7039_v19, %v7039_v19 }
0x2193   :  { %v7041_v63 = vadd.f32 %v7035_v18, %v7022_v21  ;;  %v7043_v0 = vmul.f32 %v7040_v22, %v7040_v22  ;;  %v7045_v23 = vmul.f32 %v7042_v54, %v7039_v19 }
0x2195   :  { %v7044_v55 = vmul.f32 %v7041_v63, %v7041_v63  ;;  %v7046_v58 = vmul.f32 %v7043_v0, %v7040_v22  ;;  %v7048_v49 = vmul.f32 0.044715, %v7045_v23 }
0x2197   :  { %v7047_v32 = vmul.f32 %v7044_v55, %v7041_v63  ;;  %v7049_v35 = vmul.f32 0.044715, %v7046_v58  ;;  %v7051_v7 = vadd.f32 %v7048_v49, %v7039_v19 }
0x2199   :  { %v7052_v27 = vadd.f32 %v7049_v35, %v7040_v22  ;;  %v7054_v33 = vmul.f32 0.7978846, %v7051_v7  ;;  %v7050_v52 = vmul.f32 0.044715, %v7047_v32 }
0x219b   :  { %v7055_v57 = vmul.f32 0.7978846, %v7052_v27  ;;  %9238 = vtanh.f32 %v7054_v33  ;;  %v7053_v41 = vadd.f32 %v7050_v52, %v7041_v63 }
0x219d   :  { %9240 = vtanh.f32 %v7055_v57  ;;  %v7056_v44 = vmul.f32 0.7978846, %v7053_v41  ;;  %v7806_v57 = vld [vmem:[%s7526_s11] ss:$0 sm:$0xff] }
0x219f   :  { %9242 = vtanh.f32 %v7056_v44 }
0x21a8   :  { %v9239_v43 = vpop.eup %9238 }
0x21a9   :  { %v7060_v6 = vadd.f32 1.0, %v9239_v43 }
0x21aa   :  { %v9241_v31 = vpop.eup %9240 }
0x21ab   :  { %v7061_v53 = vadd.f32 1.0, %v9241_v31  ;;  %v7063_v50 = vmul.f32 0.5, %v7060_v6 }
0x21ac   :  { %v9243_v51 = vpop.eup %9242 }
0x21ad   :  { %v7064_v46 = vmul.f32 0.5, %v7061_v53  ;;  %v7062_v36 = vadd.f32 1.0, %v9243_v51  ;;  %v7066_v25 = vmul.f32 %v7063_v50, %v7039_v19 }
0x21af   :  { %v7067_v40 = vmul.f32 %v7064_v46, %v7040_v22  ;;  %v7065_v12 = vmul.f32 0.5, %v7062_v36  ;;  %v7069_v5 = vpack.c.bf16 %v7066_v25, %v7066_v25 }
0x21b1   :  { %v7070_v45 = vpack.c.bf16 %v7067_v40, %v7067_v40  ;;  %v7068_v26 = vmul.f32 %v7065_v12, %v7041_v63 }
0x21b3   :  { %7290 = vmatprep.mubr.bf16.mxu1 %v7070_v45  ;;  %v7071_v42 = vpack.c.bf16 %v7068_v26, %v7068_v26 }
0x21b4   :  { %7291 = vmatmul.mubr.bf16.vlgmr.msra.gmra.mxu1 %v7069_v5 }
0x21b5   :  { %7805 = vmatmul.mubr.msk.bf16.vlgmr.msra.gmra.mxu0 %vm6394_vm11, %v7071_v42 }
0x21b6   :  { %7428 = vmatpush1.bf16.msra.mxu0 %v9119_v1 }
0x21b7   :  { %7429 = vmatprep.subr.bf16.mxu0 %v9293_v30 }
0x21ba   :  { %7430 = vmatpush1.bf16.msra.mxu0 %v9120_v13 }
0x21bb   :  { %7431 = vmatprep.subr.bf16.mxu0 %v9293_v30 }
0x21be   :  { %7432 = vmatpush1.bf16.msra.mxu0 %v9121_v28 }
0x21bf   :  { %7433 = vmatprep.subr.bf16.mxu0 %v9293_v30 }
0x21c2   :  { %7434 = vmatpush1.bf16.msra.mxu0 %v9122_v14 }
0x21c3   :  { %7435 = vmatprep.subr.bf16.mxu0 %v9293_v30 }
0x21c6   :  { %7436 = vmatpush1.bf16.msra.mxu0 %v9123_v4 }
0x21c7   :  { %7437 = vmatprep.subr.bf16.mxu0 %v9293_v30 }
0x21ca   :  { %7438 = vmatpush1.bf16.msra.mxu0 %v9124_v48 }
0x21cb   :  { %7439 = vmatprep.subr.bf16.mxu0 %v9293_v30 }
0x21ce   :  { %7440 = vmatpush1.bf16.msra.mxu0 %v9125_v11 }
0x21cf   :  { %7441 = vmatprep.subr.bf16.mxu0 %v9293_v30 }
0x21d2   :  { %7442 = vmatpush1.bf16.msra.mxu0 %v9126_v34 }
0x21d3   :  { %7457 = vmatprep.subr.bf16.mxu0 %v9293_v30 }
0x21d6   :  { %7458 = vmatpush2.bf16.msra.mxu0 %v7425_v24 }
0x2274   :  { %v7292_v2 = vpop.f32.mrf.mxu1 }
0x2275   :  { %v7293_v59 = vadd.f32 %v7292_v2, %v7076_v37  ;;  %v7333_v56 = vpop.f32.mrf.mxu0 }
0x2276   :  { %v7294_v47 = vpop.f32.mrf.mxu1 }
0x2277   :  { %v7334_v15 = vadd.f32 %v7333_v56, %v7293_v59  ;;  %v7295_v9 = vadd.f32 %v7294_v47, %v7080_v61  ;;  %v7335_v60 = vpop.f32.mrf.mxu0 }
0x2278   :  { %v7296_v30 = vpop.f32.mrf.mxu1 }
0x2279   :  { %v7340_v10 = vmul.f32 %v7334_v15, %v7334_v15  ;;  %v7336_v16 = vadd.f32 %v7335_v60, %v7295_v9  ;;  %v7337_v17 = vpop.f32.mrf.mxu0 }
0x227a   :  { %v7297_v18 = vpop.f32.mrf.mxu1 }
0x227b   :  { %v7342_v19 = vmul.f32 %v7340_v10, %v7334_v15  ;;  %v7341_v20 = vmul.f32 %v7336_v16, %v7336_v16  ;;  %v7338_v38 = vpop.f32.mrf.mxu0 }
0x227d   :  { %v7344_v21 = vmul.f32 0.044715, %v7342_v19  ;;  %v7343_v22 = vmul.f32 %v7341_v20, %v7336_v16 }
0x227f   :  { %v7346_v29 = vadd.f32 %v7344_v21, %v7334_v15  ;;  %v7345_v54 = vmul.f32 0.044715, %v7343_v22 }
0x2281   :  { %v7348_v39 = vmul.f32 0.7978846, %v7346_v29  ;;  %v7347_v63 = vadd.f32 %v7345_v54, %v7336_v16 }
0x2283   :  { %9244 = vtanh.f32 %v7348_v39  ;;  %v7349_v0 = vmul.f32 0.7978846, %v7347_v63 }
0x2285   :  { %9246 = vtanh.f32 %v7349_v0 }
0x2290   :  { %v9245_v23 = vpop.eup %9244 }
0x2291   :  { %v7352_v55 = vadd.f32 1.0, %v9245_v23 }
0x2292   :  { %v9247_v58 = vpop.eup %9246 }
0x2293   :  { %v7354_v49 = vmul.f32 0.5, %v7352_v55  ;;  %v7353_v32 = vadd.f32 1.0, %v9247_v58 }
0x2295   :  { %v7355_v35 = vmul.f32 0.5, %v7353_v32  ;;  %v7356_v7 = vmul.f32 %v7354_v49, %v7334_v15 }
0x2297   :  { %v7357_v27 = vmul.f32 %v7355_v35, %v7336_v16  ;;  %v7358_v52 = vpack.c.bf16 %v7356_v7, %v7356_v7 }
0x2299   :  { %v7359_v33 = vpack.c.bf16 %v7357_v27, %v7357_v27 }
0x229b   :  { %7816 = vmatprep.mubr.msk.bf16.mxu0 %vm7417_vm0, %v7359_v33 }
0x229c   :  { %7460 = vmatmul.mubr.bf16.vlgmr.msra.gmra.mxu0 %v7358_v52 }
0x235c   :  { %v7461_v41 = vpop.f32.mrf.mxu0 }
0x235d   :  { %v7462_v44 = vadd.f32 %v7806_v57, %v7461_v41 }
0x235e   :  { %v7463_v43 = vpop.f32.mrf.mxu0 }
0x235f   :  { %7468 = vst.msk [vmem:[%s7527_s15] sm:$0x3] %vm7467_vm1, %v7462_v44 }
0x2360   :  { %v7464_v6 = vpop.f32.mrf.mxu0 }
0x2362   :  { %v7465_v31 = vpop.f32.mrf.mxu0 }

</bundles_post_ra>
